<compile_context>
chip_gen: v7x
topology: tpu7x:2x2x1
jax: 0.10.0
libtpu: 0.0.40
codegen_flags: <defaults>
</compile_context>

<pallas_src>
import functools

import jax
import jax.numpy as jnp
from jax.experimental import pallas as pl
from jax.experimental.pallas import tpu as pltpu

LN_EPS = 1e-5  # torch.nn.LayerNorm default eps


def _ln(x, gamma, beta):
    mu = jnp.mean(x, axis=-1, keepdims=True)
    var = jnp.mean((x - mu) ** 2, axis=-1, keepdims=True)
    return (x - mu) * jax.lax.rsqrt(var + LN_EPS) * gamma + beta


def _mlp_decoder_kernel(min_scale,
                        glob_ref, local_ref,
                        wa_g_ref, wa_l_ref, ba_ref, ga_ref, bea_ref,
                        wls1_ref, bls1_ref, gl1_ref, bel1_ref, gs1_ref, bes1_ref,
                        wl2_ref, bl2_ref, ws2_ref, bs2_ref,
                        wp1_l_ref, wp1_g_ref, bp1_ref, gp1_ref, bep1_ref,
                        wp2_ref, bp2_ref, gp2_ref, bep2_ref,
                        wp3_ref, bp3_ref,
                        ls_ref, pi_ref):
    F, TN, G = glob_ref.shape
    H = local_ref.shape[1]
    T2 = wl2_ref.shape[1]          # 2 * future_steps
    M = F * TN

    glob = glob_ref[...].reshape(M, G)      # [F*TN, G]  bf16
    local = local_ref[...]                  # [TN, H]    bf16

    def mm(x, w_ref):
        return jnp.dot(x.astype(jnp.bfloat16), w_ref[...],
                       preferred_element_type=jnp.float32)

    def ln_relu(x, g_ref, b_ref):
        return jnp.maximum(_ln(x, g_ref[...], b_ref[...]), 0.0)

    # Local-side partial products of the split first-layer GEMMs: computed once
    # per agent tile and broadcast over the num_modes axis.
    la_aggr = mm(local, wa_l_ref)           # [TN, H] f32
    la_pi = mm(local, wp1_l_ref)            # [TN, H] f32

    def add_local(z, la):                   # z: [M, H] f32, la: [TN, H] f32
        return (z.reshape(F, TN, H) + la[None]).reshape(M, H)

    # ---- pi head: Linear -> LN -> ReLU -> Linear -> LN -> ReLU -> Linear(1)
    z = add_local(mm(glob, wp1_g_ref), la_pi) + bp1_ref[...]
    h = ln_relu(z, gp1_ref, bep1_ref)
    h = ln_relu(mm(h, wp2_ref) + bp2_ref[...], gp2_ref, bep2_ref)
    pi = mm(h, wp3_ref) + bp3_ref[...]      # [M, 1]
    pi_ref[...] = pi.reshape(F, TN, 1)

    # ---- aggregation embed: Linear -> LN -> ReLU
    z = add_local(mm(glob, wa_g_ref), la_aggr) + ba_ref[...]
    out = ln_relu(z, ga_ref, bea_ref)       # [M, H]

    # ---- fused first linears of the loc & scale heads: [M,H] @ [H,2H]
    h2 = mm(out, wls1_ref) + bls1_ref[...]  # [M, 2H]
    h_loc = ln_relu(h2[:, :H], gl1_ref, bel1_ref)
    h_scl = ln_relu(h2[:, H:], gs1_ref, bes1_ref)

    loc = mm(h_loc, wl2_ref) + bl2_ref[...]              # [M, 2T]
    s = mm(h_scl, ws2_ref) + bs2_ref[...]                # [M, 2T]
    s = jnp.where(s > 0.0, s, jnp.exp(jnp.minimum(s, 0.0)) - 1.0)  # ELU(a=1)
    s = s + (1.0 + min_scale)

    # fused, lane-dense output slab [M, 4T]
    ls_ref[...] = jnp.concatenate([loc, s], axis=-1).reshape(F, TN, 2 * T2)


@functools.partial(jax.jit, static_argnames=("future_steps", "min_scale", "tile_n"))
def mlp_decoder_forward(params, local_embed, global_embed, *,
                        future_steps, min_scale=1e-3, tile_n=128):
    """Pallas implementation of MLPDecoder.forward (uncertain=True)."""
    (wa, ba, ga, bea,
     wl1, bl1, gl1, bel1, wl2, bl2,
     ws1, bs1, gs1, bes1, ws2, bs2,
     wp1, bp1, gp1, bep1, wp2, bp2, gp2, bep2, wp3, bp3) = params

    F_modes, N, G = global_embed.shape
    H = local_embed.shape[-1]
    T2 = 2 * future_steps

    # Tile over the agent axis (multiple of 8 sublanes); all modes live inside
    # each tile so the local features are read once per agent, not per mode.
    n_ceil = pl.cdiv(N, 8) * 8
    tile_n = max(8, (min(tile_n, n_ceil) // 8) * 8)
    n_pad = pl.cdiv(N, tile_n) * tile_n
    if n_pad != N:
        local_embed = jnp.pad(local_embed, ((0, n_pad - N), (0, 0)))
        global_embed = jnp.pad(global_embed, ((0, 0), (0, n_pad - N), (0, 0)))

    bf = jnp.bfloat16
    glob = global_embed.astype(bf)          # [F, n_pad, G]
    local = local_embed.astype(bf)          # [n_pad, H]

    # Split first-layer weights so the concatenated inputs never materialize.
    wa_g, wa_l = wa[:G].astype(bf), wa[G:].astype(bf)       # cat((global, local))
    wp1_l, wp1_g = wp1[:H].astype(bf), wp1[H:].astype(bf)   # cat((local, global))
    # Fuse the loc/scale-head first linears into one lane-dense [H, 2H] GEMM.
    wls1 = jnp.concatenate([wl1, ws1], axis=1).astype(bf)
    bls1 = jnp.concatenate([bl1, bs1], axis=1)

    inputs = (glob, local,
              wa_g, wa_l, ba, ga, bea,
              wls1, bls1, gl1, bel1, gs1, bes1,
              wl2.astype(bf), bl2, ws2.astype(bf), bs2,
              wp1_l, wp1_g, bp1, gp1, bep1,
              wp2.astype(bf), bp2, gp2, bep2,
              wp3.astype(bf), bp3)

    grid = (n_pad // tile_n,)
    const2 = lambda i: (0, 0)   # weights/LN params: VMEM-resident across steps

    in_specs = [
        pl.BlockSpec((F_modes, tile_n, G), lambda i: (0, i, 0)),
        pl.BlockSpec((tile_n, H), lambda i: (i, 0)),
    ] + [pl.BlockSpec(x.shape, const2) for x in inputs[2:]]

    out_specs = (
        pl.BlockSpec((F_modes, tile_n, 2 * T2), lambda i: (0, i, 0)),
        pl.BlockSpec((F_modes, tile_n, 1), lambda i: (0, i, 0)),
    )
    out_shapes = (
        jax.ShapeDtypeStruct((F_modes, n_pad, 2 * T2), jnp.float32),  # loc|scale
        jax.ShapeDtypeStruct((F_modes, n_pad, 1), jnp.float32),       # pi
    )

    M = F_modes * n_pad
    flops = 2 * M * ((G + H) * H * 2 + H * (2 * H) + 2 * H * T2 + H * H + H)
    bytes_accessed = (glob.size * 2 + local.size * 2
                      + sum(int(x.size) * x.dtype.itemsize for x in inputs[2:])
                      + M * (2 * T2 + 1) * 4)
    cost = pl.CostEstimate(flops=flops, transcendentals=M * (T2 + 6),
                           bytes_accessed=bytes_accessed)

    # TODO(synk): if xprof shows exposed DMA at very small tile_n, consider
    # pipeline_mode=pl.Buffered(3) on the activation BlockSpecs.
    ls, pi = pl.pallas_call(
        functools.partial(_mlp_decoder_kernel, min_scale),
        grid=grid,
        in_specs=in_specs,
        out_specs=out_specs,
        out_shape=out_shapes,
        compiler_params=pltpu.CompilerParams(
            dimension_semantics=("parallel",),
            vmem_limit_bytes=32 * 1024 * 1024),
        cost_estimate=cost,
    )(*inputs)

    ls = ls[:, :N]                                           # drop row padding
    loc = ls[..., :T2].reshape(F_modes, N, future_steps, 2)
    scale = ls[..., T2:].reshape(F_modes, N, future_steps, 2)
    pi = pi[:, :N, 0].T                                      # [N, F]
    return jnp.concatenate([loc, scale], axis=-1), pi        # [F, N, T, 4], [N, F]


# ---------------------------------------------------------------------------
# Deterministic parameter init mirroring init_weights():
#   Linear: xavier_uniform weight, zero bias.   LayerNorm: ones weight, zero bias.
# Weights are stored transposed ([in, out]) so the kernel computes x @ W.
# ---------------------------------------------------------------------------
def init_params(key, H, G, T):
    def xavier(k, fan_in, fan_out):
        bound = (6.0 / (fan_in + fan_out)) ** 0.5
        return jax.random.uniform(k, (fan_in, fan_out), jnp.float32, -bound, bound)

    def zeros(n):
        return jnp.zeros((1, n), jnp.float32)

    def ones(n):
        return jnp.ones((1, n), jnp.float32)

    ks = jax.random.split(key, 8)
    params = (
        # aggr_embed
        xavier(ks[0], G + H, H), zeros(H), ones(H), zeros(H),
        # loc head
        xavier(ks[1], H, H), zeros(H), ones(H), zeros(H),
        xavier(ks[2], H, 2 * T), zeros(2 * T),
        # scale head
        xavier(ks[3], H, H), zeros(H), ones(H), zeros(H),
        xavier(ks[4], H, 2 * T), zeros(2 * T),
        # pi head
        xavier(ks[5], H + G, H), zeros(H), ones(H), zeros(H),
        xavier(ks[6], H, H), zeros(H), ones(H), zeros(H),
        xavier(ks[7], H, 1), zeros(1),
    )
    return params


# Pure-JAX f32 reference (mirrors the PyTorch forward) for a sanity check.
def reference_forward(params, local_embed, global_embed, *, future_steps, min_scale=1e-3):
    (wa, ba, ga, bea,
     wl1, bl1, gl1, bel1, wl2, bl2,
     ws1, bs1, gs1, bes1, ws2, bs2,
     wp1, bp1, gp1, bep1, wp2, bp2, gp2, bep2, wp3, bp3) = params

    F_modes, N, G = global_embed.shape
    H = local_embed.shape[-1]
    local_b = jnp.broadcast_to(local_embed[None], (F_modes, N, H))

    def ln(x, g, b):
        mu = jnp.mean(x, -1, keepdims=True)
        var = jnp.mean((x - mu) ** 2, -1, keepdims=True)
        return (x - mu) / jnp.sqrt(var + LN_EPS) * g + b

    x_pi = jnp.concatenate([local_b, global_embed], -1)
    h = jnp.maximum(ln(x_pi @ wp1 + bp1, gp1, bep1), 0.0)
    h = jnp.maximum(ln(h @ wp2 + bp2, gp2, bep2), 0.0)
    pi = (h @ wp3 + bp3)[..., 0].T

    x_aggr = jnp.concatenate([global_embed, local_b], -1)
    out = jnp.maximum(ln(x_aggr @ wa + ba, ga, bea), 0.0)

    h = jnp.maximum(ln(out @ wl1 + bl1, gl1, bel1), 0.0)
    loc = (h @ wl2 + bl2).reshape(F_modes, N, future_steps, 2)

    h = jnp.maximum(ln(out @ ws1 + bs1, gs1, bes1), 0.0)
    s = h @ ws2 + bs2
    s = jnp.where(s > 0.0, s, jnp.exp(s) - 1.0)
    scale = s.reshape(F_modes, N, future_steps, 2) + 1.0 + min_scale
    return jnp.concatenate([loc, scale], -1), pi


if __name__ == "__main__":
    # local_channels = global_channels = 64, future_steps = 8, num_modes = 6,
    # N (num agents) = 40; tile_n=16 exercises a multi-step grid + row padding.
    H, G, T, F_modes, N = 64, 64, 8, 6, 40
    min_scale = 1e-3

    key = jax.random.PRNGKey(0)
    k_param, k_local, k_global = jax.random.split(key, 3)
    params = init_params(k_param, H, G, T)
    local_embed = jax.random.normal(k_local, (N, H), jnp.float32)
    global_embed = jax.random.normal(k_global, (F_modes, N, G), jnp.float32)

    out, pi = mlp_decoder_forward(params, local_embed, global_embed,
                                  future_steps=T, min_scale=min_scale, tile_n=16)
    out, pi = jax.block_until_ready((out, pi))

    assert out.shape == (F_modes, N, T, 4)
    assert pi.shape == (N, F_modes)

    out_ref, pi_ref = reference_forward(params, local_embed, global_embed,
                                        future_steps=T, min_scale=min_scale)
    # Kernel uses bf16 matmul operands (f32 accumulation / LN / ELU), so allow a
    # slightly looser tolerance against the pure-f32 reference.
    assert jnp.allclose(out, out_ref, atol=5e-2, rtol=5e-2), \
        float(jnp.max(jnp.abs(out - out_ref)))
    assert jnp.allclose(pi, pi_ref, atol=5e-2, rtol=5e-2), \
        float(jnp.max(jnp.abs(pi - pi_ref)))

    print("KERNEL_OK")
</pallas_src>

<mosaic_0001>
module attributes {stable_mosaic.version = 11 : i64} {
  func.func @_mlp_decoder_kernel(%arg0: i32, %arg1: memref<6x16x64xbf16, #tpu.memory_space<vmem>>, %arg2: memref<16x64xbf16, #tpu.memory_space<vmem>>, %arg3: memref<64x64xbf16, #tpu.memory_space<vmem>>, %arg4: memref<64x64xbf16, #tpu.memory_space<vmem>>, %arg5: memref<1x64xf32, #tpu.memory_space<vmem>>, %arg6: memref<1x64xf32, #tpu.memory_space<vmem>>, %arg7: memref<1x64xf32, #tpu.memory_space<vmem>>, %arg8: memref<64x128xbf16, #tpu.memory_space<vmem>>, %arg9: memref<1x128xf32, #tpu.memory_space<vmem>>, %arg10: memref<1x64xf32, #tpu.memory_space<vmem>>, %arg11: memref<1x64xf32, #tpu.memory_space<vmem>>, %arg12: memref<1x64xf32, #tpu.memory_space<vmem>>, %arg13: memref<1x64xf32, #tpu.memory_space<vmem>>, %arg14: memref<64x16xbf16, #tpu.memory_space<vmem>>, %arg15: memref<1x16xf32, #tpu.memory_space<vmem>>, %arg16: memref<64x16xbf16, #tpu.memory_space<vmem>>, %arg17: memref<1x16xf32, #tpu.memory_space<vmem>>, %arg18: memref<64x64xbf16, #tpu.memory_space<vmem>>, %arg19: memref<64x64xbf16, #tpu.memory_space<vmem>>, %arg20: memref<1x64xf32, #tpu.memory_space<vmem>>, %arg21: memref<1x64xf32, #tpu.memory_space<vmem>>, %arg22: memref<1x64xf32, #tpu.memory_space<vmem>>, %arg23: memref<64x64xbf16, #tpu.memory_space<vmem>>, %arg24: memref<1x64xf32, #tpu.memory_space<vmem>>, %arg25: memref<1x64xf32, #tpu.memory_space<vmem>>, %arg26: memref<1x64xf32, #tpu.memory_space<vmem>>, %arg27: memref<64x1xbf16, #tpu.memory_space<vmem>>, %arg28: memref<1x1xf32, #tpu.memory_space<vmem>>, %arg29: memref<6x16x32xf32, #tpu.memory_space<vmem>>, %arg30: memref<6x16x1xf32, #tpu.memory_space<vmem>>) attributes {dimension_semantics = [#tpu.dimension_semantics<parallel>], iteration_bounds = array<i64: 3>, scalar_prefetch = 0 : i64, scratch_operands = 0 : i64, tpu.core_type = #tpu.core_type<tc>, window_params = [{transform_indices = @transform_0, window_bounds = array<i64: 6, 16, 64>}, {transform_indices = @transform_1, window_bounds = array<i64: 16, 64>}, {pipeline_mode = #tpu.pipeline_mode<synchronous>, transform_indices = @transform_2, window_bounds = array<i64: 64, 64>}, {pipeline_mode = #tpu.pipeline_mode<synchronous>, transform_indices = @transform_3, window_bounds = array<i64: 64, 64>}, {pipeline_mode = #tpu.pipeline_mode<synchronous>, transform_indices = @transform_4, window_bounds = array<i64: 1, 64>}, {pipeline_mode = #tpu.pipeline_mode<synchronous>, transform_indices = @transform_5, window_bounds = array<i64: 1, 64>}, {pipeline_mode = #tpu.pipeline_mode<synchronous>, transform_indices = @transform_6, window_bounds = array<i64: 1, 64>}, {pipeline_mode = #tpu.pipeline_mode<synchronous>, transform_indices = @transform_7, window_bounds = array<i64: 64, 128>}, {pipeline_mode = #tpu.pipeline_mode<synchronous>, transform_indices = @transform_8, window_bounds = array<i64: 1, 128>}, {pipeline_mode = #tpu.pipeline_mode<synchronous>, transform_indices = @transform_9, window_bounds = array<i64: 1, 64>}, {pipeline_mode = #tpu.pipeline_mode<synchronous>, transform_indices = @transform_10, window_bounds = array<i64: 1, 64>}, {pipeline_mode = #tpu.pipeline_mode<synchronous>, transform_indices = @transform_11, window_bounds = array<i64: 1, 64>}, {pipeline_mode = #tpu.pipeline_mode<synchronous>, transform_indices = @transform_12, window_bounds = array<i64: 1, 64>}, {pipeline_mode = #tpu.pipeline_mode<synchronous>, transform_indices = @transform_13, window_bounds = array<i64: 64, 16>}, {pipeline_mode = #tpu.pipeline_mode<synchronous>, transform_indices = @transform_14, window_bounds = array<i64: 1, 16>}, {pipeline_mode = #tpu.pipeline_mode<synchronous>, transform_indices = @transform_15, window_bounds = array<i64: 64, 16>}, {pipeline_mode = #tpu.pipeline_mode<synchronous>, transform_indices = @transform_16, window_bounds = array<i64: 1, 16>}, {pipeline_mode = #tpu.pipeline_mode<synchronous>, transform_indices = @transform_17, window_bounds = array<i64: 64, 64>}, {pipeline_mode = #tpu.pipeline_mode<synchronous>, transform_indices = @transform_18, window_bounds = array<i64: 64, 64>}, {pipeline_mode = #tpu.pipeline_mode<synchronous>, transform_indices = @transform_19, window_bounds = array<i64: 1, 64>}, {pipeline_mode = #tpu.pipeline_mode<synchronous>, transform_indices = @transform_20, window_bounds = array<i64: 1, 64>}, {pipeline_mode = #tpu.pipeline_mode<synchronous>, transform_indices = @transform_21, window_bounds = array<i64: 1, 64>}, {pipeline_mode = #tpu.pipeline_mode<synchronous>, transform_indices = @transform_22, window_bounds = array<i64: 64, 64>}, {pipeline_mode = #tpu.pipeline_mode<synchronous>, transform_indices = @transform_23, window_bounds = array<i64: 1, 64>}, {pipeline_mode = #tpu.pipeline_mode<synchronous>, transform_indices = @transform_24, window_bounds = array<i64: 1, 64>}, {pipeline_mode = #tpu.pipeline_mode<synchronous>, transform_indices = @transform_25, window_bounds = array<i64: 1, 64>}, {pipeline_mode = #tpu.pipeline_mode<synchronous>, transform_indices = @transform_26, window_bounds = array<i64: 64, 1>}, {pipeline_mode = #tpu.pipeline_mode<synchronous>, transform_indices = @transform_27, window_bounds = array<i64: 1, 1>}, {transform_indices = @transform_28, window_bounds = array<i64: 6, 16, 32>}, {transform_indices = @transform_29, window_bounds = array<i64: 6, 16, 1>}]} {
    %c0 = arith.constant 0 : index
    %c0_0 = arith.constant 0 : index
    %c0_1 = arith.constant 0 : index
    %0 = vector.load %arg1[%c0, %c0_0, %c0_1] : memref<6x16x64xbf16, #tpu.memory_space<vmem>>, vector<6x16x64xbf16>
    %1 = vector.shape_cast %0 : vector<6x16x64xbf16> to vector<96x64xbf16>
    %c0_2 = arith.constant 0 : index
    %c0_3 = arith.constant 0 : index
    %2 = vector.load %arg2[%c0_2, %c0_3] : memref<16x64xbf16, #tpu.memory_space<vmem>>, vector<16x64xbf16>
    %c0_4 = arith.constant 0 : index
    %c0_5 = arith.constant 0 : index
    %3 = vector.load %arg4[%c0_4, %c0_5] : memref<64x64xbf16, #tpu.memory_space<vmem>>, vector<64x64xbf16>
    %cst = arith.constant dense<0.000000e+00> : vector<16x64xf32>
    %4 = tpu.matmul %2, %3, %cst {dimension_numbers = #tpu.dot_dimension_numbers<[1], [0], [0], [1], [0, 0, 1, 1], [], []>} : vector<16x64xbf16>, vector<64x64xbf16>, vector<16x64xf32> -> vector<16x64xf32>
    %c0_6 = arith.constant 0 : index
    %c0_7 = arith.constant 0 : index
    %5 = vector.load %arg18[%c0_6, %c0_7] : memref<64x64xbf16, #tpu.memory_space<vmem>>, vector<64x64xbf16>
    %cst_8 = arith.constant dense<0.000000e+00> : vector<16x64xf32>
    %6 = tpu.matmul %2, %5, %cst_8 {dimension_numbers = #tpu.dot_dimension_numbers<[1], [0], [0], [1], [0, 0, 1, 1], [], []>} : vector<16x64xbf16>, vector<64x64xbf16>, vector<16x64xf32> -> vector<16x64xf32>
    %c0_9 = arith.constant 0 : index
    %c0_10 = arith.constant 0 : index
    %7 = vector.load %arg19[%c0_9, %c0_10] : memref<64x64xbf16, #tpu.memory_space<vmem>>, vector<64x64xbf16>
    %cst_11 = arith.constant dense<0.000000e+00> : vector<96x64xf32>
    %8 = tpu.matmul %1, %7, %cst_11 {dimension_numbers = #tpu.dot_dimension_numbers<[1], [0], [0], [1], [0, 0, 1, 1], [], []>} : vector<96x64xbf16>, vector<64x64xbf16>, vector<96x64xf32> -> vector<96x64xf32>
    %9 = vector.shape_cast %8 : vector<96x64xf32> to vector<6x16x64xf32>
    %10 = vector.shape_cast %6 : vector<16x64xf32> to vector<1x16x64xf32>
    %11 = vector.broadcast %10 : vector<1x16x64xf32> to vector<6x16x64xf32>
    %12 = arith.addf %9, %11 : vector<6x16x64xf32>
    %13 = vector.shape_cast %12 : vector<6x16x64xf32> to vector<96x64xf32>
    %c0_12 = arith.constant 0 : index
    %c0_13 = arith.constant 0 : index
    %14 = vector.load %arg20[%c0_12, %c0_13] : memref<1x64xf32, #tpu.memory_space<vmem>>, vector<1x64xf32>
    %15 = vector.broadcast %14 : vector<1x64xf32> to vector<96x64xf32>
    %16 = arith.addf %13, %15 : vector<96x64xf32>
    %c0_14 = arith.constant 0 : index
    %c0_15 = arith.constant 0 : index
    %17 = vector.load %arg21[%c0_14, %c0_15] : memref<1x64xf32, #tpu.memory_space<vmem>>, vector<1x64xf32>
    %c0_16 = arith.constant 0 : index
    %c0_17 = arith.constant 0 : index
    %18 = vector.load %arg22[%c0_16, %c0_17] : memref<1x64xf32, #tpu.memory_space<vmem>>, vector<1x64xf32>
    %cst_18 = arith.constant dense<0.000000e+00> : vector<96xf32>
    %19 = vector.multi_reduction <add>, %16, %cst_18 [1] : vector<96x64xf32> to vector<96xf32>
    %20 = vector.shape_cast %19 : vector<96xf32> to vector<96x1xf32>
    %cst_19 = arith.constant 6.400000e+01 : f32
    %21 = vector.broadcast %cst_19 : f32 to vector<96x1xf32>
    %22 = arith.divf %20, %21 : vector<96x1xf32>
    %23 = vector.broadcast %22 : vector<96x1xf32> to vector<96x64xf32>
    %24 = arith.subf %16, %23 : vector<96x64xf32>
    %25 = arith.mulf %24, %24 : vector<96x64xf32>
    %cst_20 = arith.constant dense<0.000000e+00> : vector<96xf32>
    %26 = vector.multi_reduction <add>, %25, %cst_20 [1] : vector<96x64xf32> to vector<96xf32>
    %27 = vector.shape_cast %26 : vector<96xf32> to vector<96x1xf32>
    %cst_21 = arith.constant 6.400000e+01 : f32
    %28 = vector.broadcast %cst_21 : f32 to vector<96x1xf32>
    %29 = arith.divf %27, %28 : vector<96x1xf32>
    %30 = vector.broadcast %22 : vector<96x1xf32> to vector<96x64xf32>
    %31 = arith.subf %16, %30 : vector<96x64xf32>
    %cst_22 = arith.constant 9.99999974E-6 : f32
    %32 = vector.broadcast %cst_22 : f32 to vector<96x1xf32>
    %33 = arith.addf %29, %32 : vector<96x1xf32>
    %34 = math.rsqrt %33 : vector<96x1xf32>
    %35 = vector.broadcast %34 : vector<96x1xf32> to vector<96x64xf32>
    %36 = arith.mulf %31, %35 : vector<96x64xf32>
    %37 = vector.broadcast %17 : vector<1x64xf32> to vector<96x64xf32>
    %38 = arith.mulf %36, %37 : vector<96x64xf32>
    %39 = vector.broadcast %18 : vector<1x64xf32> to vector<96x64xf32>
    %40 = arith.addf %38, %39 : vector<96x64xf32>
    %cst_23 = arith.constant 0.000000e+00 : f32
    %41 = vector.broadcast %cst_23 : f32 to vector<96x64xf32>
    %42 = arith.maximumf %40, %41 : vector<96x64xf32>
    %43 = arith.truncf %42 : vector<96x64xf32> to vector<96x64xbf16>
    %c0_24 = arith.constant 0 : index
    %c0_25 = arith.constant 0 : index
    %44 = vector.load %arg23[%c0_24, %c0_25] : memref<64x64xbf16, #tpu.memory_space<vmem>>, vector<64x64xbf16>
    %cst_26 = arith.constant dense<0.000000e+00> : vector<96x64xf32>
    %45 = tpu.matmul %43, %44, %cst_26 {dimension_numbers = #tpu.dot_dimension_numbers<[1], [0], [0], [1], [0, 0, 1, 1], [], []>} : vector<96x64xbf16>, vector<64x64xbf16>, vector<96x64xf32> -> vector<96x64xf32>
    %c0_27 = arith.constant 0 : index
    %c0_28 = arith.constant 0 : index
    %46 = vector.load %arg24[%c0_27, %c0_28] : memref<1x64xf32, #tpu.memory_space<vmem>>, vector<1x64xf32>
    %47 = vector.broadcast %46 : vector<1x64xf32> to vector<96x64xf32>
    %48 = arith.addf %45, %47 : vector<96x64xf32>
    %c0_29 = arith.constant 0 : index
    %c0_30 = arith.constant 0 : index
    %49 = vector.load %arg25[%c0_29, %c0_30] : memref<1x64xf32, #tpu.memory_space<vmem>>, vector<1x64xf32>
    %c0_31 = arith.constant 0 : index
    %c0_32 = arith.constant 0 : index
    %50 = vector.load %arg26[%c0_31, %c0_32] : memref<1x64xf32, #tpu.memory_space<vmem>>, vector<1x64xf32>
    %cst_33 = arith.constant dense<0.000000e+00> : vector<96xf32>
    %51 = vector.multi_reduction <add>, %48, %cst_33 [1] : vector<96x64xf32> to vector<96xf32>
    %52 = vector.shape_cast %51 : vector<96xf32> to vector<96x1xf32>
    %cst_34 = arith.constant 6.400000e+01 : f32
    %53 = vector.broadcast %cst_34 : f32 to vector<96x1xf32>
    %54 = arith.divf %52, %53 : vector<96x1xf32>
    %55 = vector.broadcast %54 : vector<96x1xf32> to vector<96x64xf32>
    %56 = arith.subf %48, %55 : vector<96x64xf32>
    %57 = arith.mulf %56, %56 : vector<96x64xf32>
    %cst_35 = arith.constant dense<0.000000e+00> : vector<96xf32>
    %58 = vector.multi_reduction <add>, %57, %cst_35 [1] : vector<96x64xf32> to vector<96xf32>
    %59 = vector.shape_cast %58 : vector<96xf32> to vector<96x1xf32>
    %cst_36 = arith.constant 6.400000e+01 : f32
    %60 = vector.broadcast %cst_36 : f32 to vector<96x1xf32>
    %61 = arith.divf %59, %60 : vector<96x1xf32>
    %62 = vector.broadcast %54 : vector<96x1xf32> to vector<96x64xf32>
    %63 = arith.subf %48, %62 : vector<96x64xf32>
    %cst_37 = arith.constant 9.99999974E-6 : f32
    %64 = vector.broadcast %cst_37 : f32 to vector<96x1xf32>
    %65 = arith.addf %61, %64 : vector<96x1xf32>
    %66 = math.rsqrt %65 : vector<96x1xf32>
    %67 = vector.broadcast %66 : vector<96x1xf32> to vector<96x64xf32>
    %68 = arith.mulf %63, %67 : vector<96x64xf32>
    %69 = vector.broadcast %49 : vector<1x64xf32> to vector<96x64xf32>
    %70 = arith.mulf %68, %69 : vector<96x64xf32>
    %71 = vector.broadcast %50 : vector<1x64xf32> to vector<96x64xf32>
    %72 = arith.addf %70, %71 : vector<96x64xf32>
    %cst_38 = arith.constant 0.000000e+00 : f32
    %73 = vector.broadcast %cst_38 : f32 to vector<96x64xf32>
    %74 = arith.maximumf %72, %73 : vector<96x64xf32>
    %75 = arith.truncf %74 : vector<96x64xf32> to vector<96x64xbf16>
    %c0_39 = arith.constant 0 : index
    %c0_40 = arith.constant 0 : index
    %76 = vector.load %arg27[%c0_39, %c0_40] : memref<64x1xbf16, #tpu.memory_space<vmem>>, vector<64x1xbf16>
    %cst_41 = arith.constant dense<0.000000e+00> : vector<96x1xf32>
    %77 = tpu.matmul %75, %76, %cst_41 {dimension_numbers = #tpu.dot_dimension_numbers<[1], [0], [0], [1], [0, 0, 1, 1], [], []>} : vector<96x64xbf16>, vector<64x1xbf16>, vector<96x1xf32> -> vector<96x1xf32>
    %c0_42 = arith.constant 0 : index
    %c0_43 = arith.constant 0 : index
    %78 = vector.load %arg28[%c0_42, %c0_43] : memref<1x1xf32, #tpu.memory_space<vmem>>, vector<1x1xf32>
    %79 = vector.broadcast %78 : vector<1x1xf32> to vector<96x1xf32>
    %80 = arith.addf %77, %79 : vector<96x1xf32>
    %81 = vector.shape_cast %80 : vector<96x1xf32> to vector<6x16x1xf32>
    %c0_44 = arith.constant 0 : index
    %c0_45 = arith.constant 0 : index
    %c0_46 = arith.constant 0 : index
    %82 = vector.load %arg30[%c0_44, %c0_45, %c0_46] : memref<6x16x1xf32, #tpu.memory_space<vmem>>, vector<6x16x1xf32>
    tpu.vector_store %arg30[%c0_44, %c0_45, %c0_46], %81 {strides = array<i32>} : memref<6x16x1xf32, #tpu.memory_space<vmem>>, vector<6x16x1xf32>,
    %c0_47 = arith.constant 0 : index
    %c0_48 = arith.constant 0 : index
    %83 = vector.load %arg3[%c0_47, %c0_48] : memref<64x64xbf16, #tpu.memory_space<vmem>>, vector<64x64xbf16>
    %cst_49 = arith.constant dense<0.000000e+00> : vector<96x64xf32>
    %84 = tpu.matmul %1, %83, %cst_49 {dimension_numbers = #tpu.dot_dimension_numbers<[1], [0], [0], [1], [0, 0, 1, 1], [], []>} : vector<96x64xbf16>, vector<64x64xbf16>, vector<96x64xf32> -> vector<96x64xf32>
    %85 = vector.shape_cast %84 : vector<96x64xf32> to vector<6x16x64xf32>
    %86 = vector.shape_cast %4 : vector<16x64xf32> to vector<1x16x64xf32>
    %87 = vector.broadcast %86 : vector<1x16x64xf32> to vector<6x16x64xf32>
    %88 = arith.addf %85, %87 : vector<6x16x64xf32>
    %89 = vector.shape_cast %88 : vector<6x16x64xf32> to vector<96x64xf32>
    %c0_50 = arith.constant 0 : index
    %c0_51 = arith.constant 0 : index
    %90 = vector.load %arg5[%c0_50, %c0_51] : memref<1x64xf32, #tpu.memory_space<vmem>>, vector<1x64xf32>
    %91 = vector.broadcast %90 : vector<1x64xf32> to vector<96x64xf32>
    %92 = arith.addf %89, %91 : vector<96x64xf32>
    %c0_52 = arith.constant 0 : index
    %c0_53 = arith.constant 0 : index
    %93 = vector.load %arg6[%c0_52, %c0_53] : memref<1x64xf32, #tpu.memory_space<vmem>>, vector<1x64xf32>
    %c0_54 = arith.constant 0 : index
    %c0_55 = arith.constant 0 : index
    %94 = vector.load %arg7[%c0_54, %c0_55] : memref<1x64xf32, #tpu.memory_space<vmem>>, vector<1x64xf32>
    %cst_56 = arith.constant dense<0.000000e+00> : vector<96xf32>
    %95 = vector.multi_reduction <add>, %92, %cst_56 [1] : vector<96x64xf32> to vector<96xf32>
    %96 = vector.shape_cast %95 : vector<96xf32> to vector<96x1xf32>
    %cst_57 = arith.constant 6.400000e+01 : f32
    %97 = vector.broadcast %cst_57 : f32 to vector<96x1xf32>
    %98 = arith.divf %96, %97 : vector<96x1xf32>
    %99 = vector.broadcast %98 : vector<96x1xf32> to vector<96x64xf32>
    %100 = arith.subf %92, %99 : vector<96x64xf32>
    %101 = arith.mulf %100, %100 : vector<96x64xf32>
    %cst_58 = arith.constant dense<0.000000e+00> : vector<96xf32>
    %102 = vector.multi_reduction <add>, %101, %cst_58 [1] : vector<96x64xf32> to vector<96xf32>
    %103 = vector.shape_cast %102 : vector<96xf32> to vector<96x1xf32>
    %cst_59 = arith.constant 6.400000e+01 : f32
    %104 = vector.broadcast %cst_59 : f32 to vector<96x1xf32>
    %105 = arith.divf %103, %104 : vector<96x1xf32>
    %106 = vector.broadcast %98 : vector<96x1xf32> to vector<96x64xf32>
    %107 = arith.subf %92, %106 : vector<96x64xf32>
    %cst_60 = arith.constant 9.99999974E-6 : f32
    %108 = vector.broadcast %cst_60 : f32 to vector<96x1xf32>
    %109 = arith.addf %105, %108 : vector<96x1xf32>
    %110 = math.rsqrt %109 : vector<96x1xf32>
    %111 = vector.broadcast %110 : vector<96x1xf32> to vector<96x64xf32>
    %112 = arith.mulf %107, %111 : vector<96x64xf32>
    %113 = vector.broadcast %93 : vector<1x64xf32> to vector<96x64xf32>
    %114 = arith.mulf %112, %113 : vector<96x64xf32>
    %115 = vector.broadcast %94 : vector<1x64xf32> to vector<96x64xf32>
    %116 = arith.addf %114, %115 : vector<96x64xf32>
    %cst_61 = arith.constant 0.000000e+00 : f32
    %117 = vector.broadcast %cst_61 : f32 to vector<96x64xf32>
    %118 = arith.maximumf %116, %117 : vector<96x64xf32>
    %119 = arith.truncf %118 : vector<96x64xf32> to vector<96x64xbf16>
    %c0_62 = arith.constant 0 : index
    %c0_63 = arith.constant 0 : index
    %120 = vector.load %arg8[%c0_62, %c0_63] : memref<64x128xbf16, #tpu.memory_space<vmem>>, vector<64x128xbf16>
    %cst_64 = arith.constant dense<0.000000e+00> : vector<96x128xf32>
    %121 = tpu.matmul %119, %120, %cst_64 {dimension_numbers = #tpu.dot_dimension_numbers<[1], [0], [0], [1], [0, 0, 1, 1], [], []>} : vector<96x64xbf16>, vector<64x128xbf16>, vector<96x128xf32> -> vector<96x128xf32>
    %c0_65 = arith.constant 0 : index
    %c0_66 = arith.constant 0 : index
    %122 = vector.load %arg9[%c0_65, %c0_66] : memref<1x128xf32, #tpu.memory_space<vmem>>, vector<1x128xf32>
    %123 = vector.broadcast %122 : vector<1x128xf32> to vector<96x128xf32>
    %124 = arith.addf %121, %123 : vector<96x128xf32>
    %125 = vector.extract_strided_slice %124 {offsets = [0, 0], sizes = [96, 64], strides = [1, 1]} : vector<96x128xf32> to vector<96x64xf32>
    %c0_67 = arith.constant 0 : index
    %c0_68 = arith.constant 0 : index
    %126 = vector.load %arg10[%c0_67, %c0_68] : memref<1x64xf32, #tpu.memory_space<vmem>>, vector<1x64xf32>
    %c0_69 = arith.constant 0 : index
    %c0_70 = arith.constant 0 : index
    %127 = vector.load %arg11[%c0_69, %c0_70] : memref<1x64xf32, #tpu.memory_space<vmem>>, vector<1x64xf32>
    %cst_71 = arith.constant dense<0.000000e+00> : vector<96xf32>
    %128 = vector.multi_reduction <add>, %125, %cst_71 [1] : vector<96x64xf32> to vector<96xf32>
    %129 = vector.shape_cast %128 : vector<96xf32> to vector<96x1xf32>
    %cst_72 = arith.constant 6.400000e+01 : f32
    %130 = vector.broadcast %cst_72 : f32 to vector<96x1xf32>
    %131 = arith.divf %129, %130 : vector<96x1xf32>
    %132 = vector.broadcast %131 : vector<96x1xf32> to vector<96x64xf32>
    %133 = arith.subf %125, %132 : vector<96x64xf32>
    %134 = arith.mulf %133, %133 : vector<96x64xf32>
    %cst_73 = arith.constant dense<0.000000e+00> : vector<96xf32>
    %135 = vector.multi_reduction <add>, %134, %cst_73 [1] : vector<96x64xf32> to vector<96xf32>
    %136 = vector.shape_cast %135 : vector<96xf32> to vector<96x1xf32>
    %cst_74 = arith.constant 6.400000e+01 : f32
    %137 = vector.broadcast %cst_74 : f32 to vector<96x1xf32>
    %138 = arith.divf %136, %137 : vector<96x1xf32>
    %139 = vector.broadcast %131 : vector<96x1xf32> to vector<96x64xf32>
    %140 = arith.subf %125, %139 : vector<96x64xf32>
    %cst_75 = arith.constant 9.99999974E-6 : f32
    %141 = vector.broadcast %cst_75 : f32 to vector<96x1xf32>
    %142 = arith.addf %138, %141 : vector<96x1xf32>
    %143 = math.rsqrt %142 : vector<96x1xf32>
    %144 = vector.broadcast %143 : vector<96x1xf32> to vector<96x64xf32>
    %145 = arith.mulf %140, %144 : vector<96x64xf32>
    %146 = vector.broadcast %126 : vector<1x64xf32> to vector<96x64xf32>
    %147 = arith.mulf %145, %146 : vector<96x64xf32>
    %148 = vector.broadcast %127 : vector<1x64xf32> to vector<96x64xf32>
    %149 = arith.addf %147, %148 : vector<96x64xf32>
    %cst_76 = arith.constant 0.000000e+00 : f32
    %150 = vector.broadcast %cst_76 : f32 to vector<96x64xf32>
    %151 = arith.maximumf %149, %150 : vector<96x64xf32>
    %152 = vector.extract_strided_slice %124 {offsets = [0, 64], sizes = [96, 64], strides = [1, 1]} : vector<96x128xf32> to vector<96x64xf32>
    %c0_77 = arith.constant 0 : index
    %c0_78 = arith.constant 0 : index
    %153 = vector.load %arg12[%c0_77, %c0_78] : memref<1x64xf32, #tpu.memory_space<vmem>>, vector<1x64xf32>
    %c0_79 = arith.constant 0 : index
    %c0_80 = arith.constant 0 : index
    %154 = vector.load %arg13[%c0_79, %c0_80] : memref<1x64xf32, #tpu.memory_space<vmem>>, vector<1x64xf32>
    %cst_81 = arith.constant dense<0.000000e+00> : vector<96xf32>
    %155 = vector.multi_reduction <add>, %152, %cst_81 [1] : vector<96x64xf32> to vector<96xf32>
    %156 = vector.shape_cast %155 : vector<96xf32> to vector<96x1xf32>
    %cst_82 = arith.constant 6.400000e+01 : f32
    %157 = vector.broadcast %cst_82 : f32 to vector<96x1xf32>
    %158 = arith.divf %156, %157 : vector<96x1xf32>
    %159 = vector.broadcast %158 : vector<96x1xf32> to vector<96x64xf32>
    %160 = arith.subf %152, %159 : vector<96x64xf32>
    %161 = arith.mulf %160, %160 : vector<96x64xf32>
    %cst_83 = arith.constant dense<0.000000e+00> : vector<96xf32>
    %162 = vector.multi_reduction <add>, %161, %cst_83 [1] : vector<96x64xf32> to vector<96xf32>
    %163 = vector.shape_cast %162 : vector<96xf32> to vector<96x1xf32>
    %cst_84 = arith.constant 6.400000e+01 : f32
    %164 = vector.broadcast %cst_84 : f32 to vector<96x1xf32>
    %165 = arith.divf %163, %164 : vector<96x1xf32>
    %166 = vector.broadcast %158 : vector<96x1xf32> to vector<96x64xf32>
    %167 = arith.subf %152, %166 : vector<96x64xf32>
    %cst_85 = arith.constant 9.99999974E-6 : f32
    %168 = vector.broadcast %cst_85 : f32 to vector<96x1xf32>
    %169 = arith.addf %165, %168 : vector<96x1xf32>
    %170 = math.rsqrt %169 : vector<96x1xf32>
    %171 = vector.broadcast %170 : vector<96x1xf32> to vector<96x64xf32>
    %172 = arith.mulf %167, %171 : vector<96x64xf32>
    %173 = vector.broadcast %153 : vector<1x64xf32> to vector<96x64xf32>
    %174 = arith.mulf %172, %173 : vector<96x64xf32>
    %175 = vector.broadcast %154 : vector<1x64xf32> to vector<96x64xf32>
    %176 = arith.addf %174, %175 : vector<96x64xf32>
    %cst_86 = arith.constant 0.000000e+00 : f32
    %177 = vector.broadcast %cst_86 : f32 to vector<96x64xf32>
    %178 = arith.maximumf %176, %177 : vector<96x64xf32>
    %179 = arith.truncf %151 : vector<96x64xf32> to vector<96x64xbf16>
    %c0_87 = arith.constant 0 : index
    %c0_88 = arith.constant 0 : index
    %180 = vector.load %arg14[%c0_87, %c0_88] : memref<64x16xbf16, #tpu.memory_space<vmem>>, vector<64x16xbf16>
    %cst_89 = arith.constant dense<0.000000e+00> : vector<96x16xf32>
    %181 = tpu.matmul %179, %180, %cst_89 {dimension_numbers = #tpu.dot_dimension_numbers<[1], [0], [0], [1], [0, 0, 1, 1], [], []>} : vector<96x64xbf16>, vector<64x16xbf16>, vector<96x16xf32> -> vector<96x16xf32>
    %c0_90 = arith.constant 0 : index
    %c0_91 = arith.constant 0 : index
    %182 = vector.load %arg15[%c0_90, %c0_91] : memref<1x16xf32, #tpu.memory_space<vmem>>, vector<1x16xf32>
    %183 = vector.broadcast %182 : vector<1x16xf32> to vector<96x16xf32>
    %184 = arith.addf %181, %183 : vector<96x16xf32>
    %185 = arith.truncf %178 : vector<96x64xf32> to vector<96x64xbf16>
    %c0_92 = arith.constant 0 : index
    %c0_93 = arith.constant 0 : index
    %186 = vector.load %arg16[%c0_92, %c0_93] : memref<64x16xbf16, #tpu.memory_space<vmem>>, vector<64x16xbf16>
    %cst_94 = arith.constant dense<0.000000e+00> : vector<96x16xf32>
    %187 = tpu.matmul %185, %186, %cst_94 {dimension_numbers = #tpu.dot_dimension_numbers<[1], [0], [0], [1], [0, 0, 1, 1], [], []>} : vector<96x64xbf16>, vector<64x16xbf16>, vector<96x16xf32> -> vector<96x16xf32>
    %c0_95 = arith.constant 0 : index
    %c0_96 = arith.constant 0 : index
    %188 = vector.load %arg17[%c0_95, %c0_96] : memref<1x16xf32, #tpu.memory_space<vmem>>, vector<1x16xf32>
    %189 = vector.broadcast %188 : vector<1x16xf32> to vector<96x16xf32>
    %190 = arith.addf %187, %189 : vector<96x16xf32>
    %cst_97 = arith.constant 0.000000e+00 : f32
    %191 = vector.broadcast %cst_97 : f32 to vector<96x16xf32>
    %192 = arith.cmpf ogt, %190, %191 : vector<96x16xf32>
    %cst_98 = arith.constant 0.000000e+00 : f32
    %193 = vector.broadcast %cst_98 : f32 to vector<96x16xf32>
    %194 = arith.minimumf %190, %193 : vector<96x16xf32>
    %195 = math.exp %194 : vector<96x16xf32>
    %cst_99 = arith.constant 1.000000e+00 : f32
    %196 = vector.broadcast %cst_99 : f32 to vector<96x16xf32>
    %197 = arith.subf %195, %196 : vector<96x16xf32>
    %198 = arith.select %192, %190, %197 : vector<96x16xi1>, vector<96x16xf32>
    %cst_100 = arith.constant 1.001000e+00 : f32
    %199 = vector.broadcast %cst_100 : f32 to vector<96x16xf32>
    %200 = arith.addf %198, %199 : vector<96x16xf32>
    %201 = tpu.concatenate %184, %200 in 1 : vector<96x16xf32>, vector<96x16xf32> -> vector<96x32xf32>
    %202 = vector.shape_cast %201 : vector<96x32xf32> to vector<6x16x32xf32>
    %c0_101 = arith.constant 0 : index
    %c0_102 = arith.constant 0 : index
    %c0_103 = arith.constant 0 : index
    %203 = vector.load %arg29[%c0_101, %c0_102, %c0_103] : memref<6x16x32xf32, #tpu.memory_space<vmem>>, vector<6x16x32xf32>
    tpu.vector_store %arg29[%c0_101, %c0_102, %c0_103], %202 {strides = array<i32>} : memref<6x16x32xf32, #tpu.memory_space<vmem>>, vector<6x16x32xf32>,
    return
  }
  func.func @transform_0(%arg0: i32) -> (i32, i32, i32) {
    %c0_i32 = arith.constant 0 : i32
    %c0_i32_0 = arith.constant 0 : i32
    %c0_i32_1 = arith.constant 0 : i32
    return %c0_i32, %arg0, %c0_i32_0 : i32, i32, i32
  }
  func.func @transform_1(%arg0: i32) -> (i32, i32) {
    %c0_i32 = arith.constant 0 : i32
    %c0_i32_0 = arith.constant 0 : i32
    return %arg0, %c0_i32 : i32, i32
  }
  func.func @transform_2(%arg0: i32) -> (i32, i32) {
    %c0_i32 = arith.constant 0 : i32
    %c0_i32_0 = arith.constant 0 : i32
    %c0_i32_1 = arith.constant 0 : i32
    return %c0_i32, %c0_i32_0 : i32, i32
  }
  func.func @transform_3(%arg0: i32) -> (i32, i32) {
    %c0_i32 = arith.constant 0 : i32
    %c0_i32_0 = arith.constant 0 : i32
    %c0_i32_1 = arith.constant 0 : i32
    return %c0_i32, %c0_i32_0 : i32, i32
  }
  func.func @transform_4(%arg0: i32) -> (i32, i32) {
    %c0_i32 = arith.constant 0 : i32
    %c0_i32_0 = arith.constant 0 : i32
    %c0_i32_1 = arith.constant 0 : i32
    return %c0_i32, %c0_i32_0 : i32, i32
  }
  func.func @transform_5(%arg0: i32) -> (i32, i32) {
    %c0_i32 = arith.constant 0 : i32
    %c0_i32_0 = arith.constant 0 : i32
    %c0_i32_1 = arith.constant 0 : i32
    return %c0_i32, %c0_i32_0 : i32, i32
  }
  func.func @transform_6(%arg0: i32) -> (i32, i32) {
    %c0_i32 = arith.constant 0 : i32
    %c0_i32_0 = arith.constant 0 : i32
    %c0_i32_1 = arith.constant 0 : i32
    return %c0_i32, %c0_i32_0 : i32, i32
  }
  func.func @transform_7(%arg0: i32) -> (i32, i32) {
    %c0_i32 = arith.constant 0 : i32
    %c0_i32_0 = arith.constant 0 : i32
    %c0_i32_1 = arith.constant 0 : i32
    return %c0_i32, %c0_i32_0 : i32, i32
  }
  func.func @transform_8(%arg0: i32) -> (i32, i32) {
    %c0_i32 = arith.constant 0 : i32
    %c0_i32_0 = arith.constant 0 : i32
    %c0_i32_1 = arith.constant 0 : i32
    return %c0_i32, %c0_i32_0 : i32, i32
  }
  func.func @transform_9(%arg0: i32) -> (i32, i32) {
    %c0_i32 = arith.constant 0 : i32
    %c0_i32_0 = arith.constant 0 : i32
    %c0_i32_1 = arith.constant 0 : i32
    return %c0_i32, %c0_i32_0 : i32, i32
  }
  func.func @transform_10(%arg0: i32) -> (i32, i32) {
    %c0_i32 = arith.constant 0 : i32
    %c0_i32_0 = arith.constant 0 : i32
    %c0_i32_1 = arith.constant 0 : i32
    return %c0_i32, %c0_i32_0 : i32, i32
  }
  func.func @transform_11(%arg0: i32) -> (i32, i32) {
    %c0_i32 = arith.constant 0 : i32
    %c0_i32_0 = arith.constant 0 : i32
    %c0_i32_1 = arith.constant 0 : i32
    return %c0_i32, %c0_i32_0 : i32, i32
  }
  func.func @transform_12(%arg0: i32) -> (i32, i32) {
    %c0_i32 = arith.constant 0 : i32
    %c0_i32_0 = arith.constant 0 : i32
    %c0_i32_1 = arith.constant 0 : i32
    return %c0_i32, %c0_i32_0 : i32, i32
  }
  func.func @transform_13(%arg0: i32) -> (i32, i32) {
    %c0_i32 = arith.constant 0 : i32
    %c0_i32_0 = arith.constant 0 : i32
    %c0_i32_1 = arith.constant 0 : i32
    return %c0_i32, %c0_i32_0 : i32, i32
  }
  func.func @transform_14(%arg0: i32) -> (i32, i32) {
    %c0_i32 = arith.constant 0 : i32
    %c0_i32_0 = arith.constant 0 : i32
    %c0_i32_1 = arith.constant 0 : i32
    return %c0_i32, %c0_i32_0 : i32, i32
  }
  func.func @transform_15(%arg0: i32) -> (i32, i32) {
    %c0_i32 = arith.constant 0 : i32
    %c0_i32_0 = arith.constant 0 : i32
    %c0_i32_1 = arith.constant 0 : i32
    return %c0_i32, %c0_i32_0 : i32, i32
  }
  func.func @transform_16(%arg0: i32) -> (i32, i32) {
    %c0_i32 = arith.constant 0 : i32
    %c0_i32_0 = arith.constant 0 : i32
    %c0_i32_1 = arith.constant 0 : i32
    return %c0_i32, %c0_i32_0 : i32, i32
  }
  func.func @transform_17(%arg0: i32) -> (i32, i32) {
    %c0_i32 = arith.constant 0 : i32
    %c0_i32_0 = arith.constant 0 : i32
    %c0_i32_1 = arith.constant 0 : i32
    return %c0_i32, %c0_i32_0 : i32, i32
  }
  func.func @transform_18(%arg0: i32) -> (i32, i32) {
    %c0_i32 = arith.constant 0 : i32
    %c0_i32_0 = arith.constant 0 : i32
    %c0_i32_1 = arith.constant 0 : i32
    return %c0_i32, %c0_i32_0 : i32, i32
  }
  func.func @transform_19(%arg0: i32) -> (i32, i32) {
    %c0_i32 = arith.constant 0 : i32
    %c0_i32_0 = arith.constant 0 : i32
    %c0_i32_1 = arith.constant 0 : i32
    return %c0_i32, %c0_i32_0 : i32, i32
  }
  func.func @transform_20(%arg0: i32) -> (i32, i32) {
    %c0_i32 = arith.constant 0 : i32
    %c0_i32_0 = arith.constant 0 : i32
    %c0_i32_1 = arith.constant 0 : i32
    return %c0_i32, %c0_i32_0 : i32, i32
  }
  func.func @transform_21(%arg0: i32) -> (i32, i32) {
    %c0_i32 = arith.constant 0 : i32
    %c0_i32_0 = arith.constant 0 : i32
    %c0_i32_1 = arith.constant 0 : i32
    return %c0_i32, %c0_i32_0 : i32, i32
  }
  func.func @transform_22(%arg0: i32) -> (i32, i32) {
    %c0_i32 = arith.constant 0 : i32
    %c0_i32_0 = arith.constant 0 : i32
    %c0_i32_1 = arith.constant 0 : i32
    return %c0_i32, %c0_i32_0 : i32, i32
  }
  func.func @transform_23(%arg0: i32) -> (i32, i32) {
    %c0_i32 = arith.constant 0 : i32
    %c0_i32_0 = arith.constant 0 : i32
    %c0_i32_1 = arith.constant 0 : i32
    return %c0_i32, %c0_i32_0 : i32, i32
  }
  func.func @transform_24(%arg0: i32) -> (i32, i32) {
    %c0_i32 = arith.constant 0 : i32
    %c0_i32_0 = arith.constant 0 : i32
    %c0_i32_1 = arith.constant 0 : i32
    return %c0_i32, %c0_i32_0 : i32, i32
  }
  func.func @transform_25(%arg0: i32) -> (i32, i32) {
    %c0_i32 = arith.constant 0 : i32
    %c0_i32_0 = arith.constant 0 : i32
    %c0_i32_1 = arith.constant 0 : i32
    return %c0_i32, %c0_i32_0 : i32, i32
  }
  func.func @transform_26(%arg0: i32) -> (i32, i32) {
    %c0_i32 = arith.constant 0 : i32
    %c0_i32_0 = arith.constant 0 : i32
    %c0_i32_1 = arith.constant 0 : i32
    return %c0_i32, %c0_i32_0 : i32, i32
  }
  func.func @transform_27(%arg0: i32) -> (i32, i32) {
    %c0_i32 = arith.constant 0 : i32
    %c0_i32_0 = arith.constant 0 : i32
    %c0_i32_1 = arith.constant 0 : i32
    return %c0_i32, %c0_i32_0 : i32, i32
  }
  func.func @transform_28(%arg0: i32) -> (i32, i32, i32) {
    %c0_i32 = arith.constant 0 : i32
    %c0_i32_0 = arith.constant 0 : i32
    %c0_i32_1 = arith.constant 0 : i32
    return %c0_i32, %arg0, %c0_i32_0 : i32, i32, i32
  }
  func.func @transform_29(%arg0: i32) -> (i32, i32, i32) {
    %c0_i32 = arith.constant 0 : i32
    %c0_i32_0 = arith.constant 0 : i32
    %c0_i32_1 = arith.constant 0 : i32
    return %c0_i32, %arg0, %c0_i32_0 : i32, i32, i32
  }
}

</mosaic_0001>

<bundles_post_ra>
// kernel: mlp_decoder_forward.1
= control target key start
LH: loop header
LB: loop body
LE: loop exit
PB: predicated region body
PF: predicated region fallthrough
CT: control target
= control target key end

     0   :  { %s4509_s6 = smov 1   ;;  %s4510_s10 = smov 2   ;;  %s5793_s0 = inlined_call_operand.smem [shape: u32[30], index: -1, kind: input, shape index: {}] }
   0x1   :  { %s4550_s5 = sld [smem:[%s5793_s0]]   ;;  %s4511_s14 = smov 3  }
   0x2   :  { %s4555_s9 = sld [smem:[%s5793_s0 + %s4509_s6]]   ;;  %s4512_s18 = smov 4  }
   0x3   :  { %s4560_s13 = sld [smem:[%s5793_s0 + %s4510_s10]]   ;;  %s4513_s22 = smov 5  }
   0x4   :  { %s4565_s17 = sld [smem:[%s5793_s0 + %s4511_s14]]   ;;  %s4514_s26 = smov 6  }
   0x5   :  { %s4570_s21 = sld [smem:[%s5793_s0 + %s4512_s18]]   ;;  %s4515_s30 = smov 7  }
   0x6   :  { %s4575_s25 = sld [smem:[%s5793_s0 + %s4513_s22]]   ;;  %s4516_s4 = smov 8  }
   0x7   :  { %s4580_s29 = sld [smem:[%s5793_s0 + %s4514_s26]]   ;;  %s4517_s10 = smov 9  }
   0x8   :  { %s4585_s3 = sld [smem:[%s5793_s0 + %s4515_s30]]   ;;  %s4518_s15 = smov 10  }
   0x9   :  { %s4590_s8 = sld [smem:[%s5793_s0 + %s4516_s4]]   ;;  %s4519_s20 = smov 11  }
   0xa   :  { %s4595_s14 = sld [smem:[%s5793_s0 + %s4517_s10]]   ;;  %s4520_s26 = smov 12  }
   0xb   :  { %s4600_s19 = sld [smem:[%s5793_s0 + %s4518_s15]]   ;;  %s4521_s1 = smov 13  }
   0xc   :  { %5796 = sst [smem:[#allocation6_spill]] %s4575_s25  ;;  %s4522_s7 = smov 14  }
   0xd   :  { %5797 = sst [smem:[#allocation7_spill]] %s4580_s29  ;;  %s4523_s15 = smov 15  }
   0xe   :  { %s4605_s24 = sld [smem:[%s5793_s0 + %s4519_s20]]   ;;  %s4524_s22 = smov 16  }
   0xf   :  { %5798 = sst [smem:[#allocation8_spill]] %s4590_s8  ;;  %s4525_s28 = smov 17  }
  0x10   :  { %5799 = sst [smem:[#allocation9_spill]] %s4595_s14  ;;  %s4536_s23 = smov 28  }
  0x11   :  { %5800 = sst [smem:[#allocation10_spill]] %s4600_s19 }
  0x12   :  { %s4610_s30 = sld [smem:[%s5793_s0 + %s4520_s26]]  }
  0x13   :  { %s4615_s6 = sld [smem:[%s5793_s0 + %s4521_s1]]   ;;  %s4537_s1 = smov 29  }
  0x14   :  { %5801 = sst [smem:[#allocation11_spill]] %s4605_s24 }
  0x15   :  { %s4620_s12 = sld [smem:[%s5793_s0 + %s4522_s7]]   ;;  %s4526_s7 = smov 18  }
  0x16   :  { %s4625_s20 = sld [smem:[%s5793_s0 + %s4523_s15]]   ;;  %s4527_s15 = smov 19  }
  0x17   :  { %s4630_s27 = sld [smem:[%s5793_s0 + %s4524_s22]]   ;;  %s4528_s22 = smov 20  }
  0x18   :  { %5802 = sst [smem:[#allocation12_spill]] %s4610_s30 }
  0x19   :  { %5803 = sst [smem:[#allocation13_spill]] %s4615_s6 }
  0x1a   :  { %s4635_s4 = sld [smem:[%s5793_s0 + %s4525_s28]]   ;;  %s4529_s28 = smov 21  }
  0x1b   :  { %5804 = sst [smem:[#allocation14_spill]] %s4620_s12 }
  0x1c   :  { %5805 = sst [smem:[#allocation15_spill]] %s4625_s20 }
  0x1d   :  { %5806 = sst [smem:[#allocation16_spill]] %s4630_s27 }
  0x1e   :  { %s4640_s12 = sld [smem:[%s5793_s0 + %s4526_s7]]   ;;  %s4530_s7 = smov 22  }
  0x1f   :  { %s4645_s19 = sld [smem:[%s5793_s0 + %s4527_s15]]   ;;  %s4531_s15 = smov 23  }
  0x20   :  { %s4650_s27 = sld [smem:[%s5793_s0 + %s4528_s22]]   ;;  %s4532_s22 = smov 24  }
  0x21   :  { %s4655_s14 = sld [smem:[%s5793_s0 + %s4529_s28]]   ;;  %s4533_s28 = smov 25  }
  0x22   :  { %s4660_s6 = sld [smem:[%s5793_s0 + %s4530_s7]]   ;;  %s4534_s7 = smov 26  }
  0x23   :  { %s4665_s20 = sld [smem:[%s5793_s0 + %s4531_s15]]   ;;  %s4535_s15 = smov 27  }
  0x24   :  { %s4670_s30 = sld [smem:[%s5793_s0 + %s4532_s22]]  }
  0x25   :  { %s4675_s24 = sld [smem:[%s5793_s0 + %s4533_s28]]  }
  0x26   :  { %s4680_s8 = sld [smem:[%s5793_s0 + %s4534_s7]]  }
  0x27   :  { %s3857_s29 = sld [smem:[%s5793_s0 + %s4535_s15]]  }
  0x28   :  { %s4688_s25 = sld [smem:[%s5793_s0 + %s4536_s23]]  }
  0x2b   :  { %5807 = sst [smem:[#allocation17_spill]] %s4675_s24 }
  0x2c   :  { %s4693_s24 = sld [smem:[%s5793_s0 + %s4537_s1]]  }
  0x2d   :  { %v65_v0 = vstv %s3857_s29 }
  0x2e   :  { %66 = vst [vmem:[#allocation2] sm:$0x1] %v65_v0 }
  0x2f   :  { %s4695_s7 = smov 0   ;;  %s4697_s10 = smov 0  }
  0x30   :  { %s4699_s11 = smov 0  }
  0x31 LB: > { %s4711_s0 = sadd.s32 4294967295, %s4507_s11   ;;  %s4714_s29 = sadd.s32 1, %s4507_s11   ;;  %s4507_s11 = sphi %s4699_s11, %s5823_s11   ;;  %s4503_s10 = sphi %s4697_s10, %s5822_s10   ;;  %s4499_s7 = sphi %s4695_s7, %s5821_s7  }
  0x32   : > { %s76_s15 = ssub.s32 %s4507_s11, %s4714_s29  ;;  %s79_s16 = sadd.s32 1, %s4503_s10 }
  0x33   : > { %p77_p0 = scmp.eq.s32.totalorder %s76_s15, 0  ;;  %p86_p1 = scmp.ne.s32.totalorder %s4503_s10, %s4499_s7 }
  0x34   : > { %p87_p2 = scmp.eq.s32.totalorder %s4507_s11, 0  ;;  %p688_p3 = scmp.eq.s32.totalorder %s4711_s0, 2 }
  0x35   : > { %s4724_s18 = scalar_select %p77_p0, %s4503_s10, %s79_s16  }
  0x36   : > { %p88_p4 = por %p87_p2, %p86_p1  ;;  %p4726_p5 = por %p688_p3, %p86_p1 }
  0x37   : > { %p3863_p6 = scmp.ge.s32.totalorder %s4507_s11, 3 }
  0x39   : > { %814 = sbr.rel (%p3863_p6) target bundleno = 76 (0x4c), region = 120 }
  0x40   : > { %817 = sbr.rel (!%p88_p4) target bundleno = 76 (0x4c), region = 124  ;;  %s819_s22 = sand.u32 (%p88_p4), 1, %s4503_s10  }
  0x41   : > { %s3991_s26 = sshll.u32 (%p88_p4), %s4507_s11, 3  ;;  %s4238_s1 = smul.u32 (%p88_p4), 48, %s819_s22 }
  0x42   : > { %s824_s28 = scalar_lea.vmem (%p88_p4), %s4550_s5, %s3991_s26 }
  0x43   : > { %v840_v1 = vld [vmem:[%s824_s28] sm:$0xf] (%p88_p4)  ;;  %v842_v2 = vld [vmem:[%s824_s28 + $0x4] sm:$0xf] (%p88_p4)  ;;  %v844_v3 = vld [vmem:[%s824_s28 + $0x18] sm:$0xf] (%p88_p4) }
  0x44   : > { %v846_v4 = vld [vmem:[%s824_s28 + $0x1c] sm:$0xf] (%p88_p4)  ;;  %v848_v5 = vld [vmem:[%s824_s28 + $0x30] sm:$0xf] (%p88_p4)  ;;  %s821_s2 = scalar_lea.vmem (%p88_p4), [#allocation3], %s4238_s1 }
  0x45   : > { %841 = vst [vmem:[%s821_s2] sm:$0xf] (%p88_p4), %v840_v1  ;;  %843 = vst [vmem:[%s821_s2 + $0x4] sm:$0xf] (%p88_p4), %v842_v2  ;;  %v850_v6 = vld [vmem:[%s824_s28 + $0x34] sm:$0xf] (%p88_p4) }
  0x46   : > { %845 = vst [vmem:[%s821_s2 + $0x8] sm:$0xf] (%p88_p4), %v844_v3  ;;  %847 = vst [vmem:[%s821_s2 + $0xc] sm:$0xf] (%p88_p4), %v846_v4  ;;  %v852_v7 = vld [vmem:[%s824_s28 + $0x48] sm:$0xf] (%p88_p4) }
  0x47   : > { %849 = vst [vmem:[%s821_s2 + $0x10] sm:$0xf] %v848_v5  ;;  %v854_v8 = vld [vmem:[%s824_s28 + $0x4c] sm:$0xf]  ;;  %851 = vst [vmem:[%s821_s2 + $0x14] sm:$0xf] %v850_v6 }
  0x48   : > { %853 = vst [vmem:[%s821_s2 + $0x18] sm:$0xf] %v852_v7  ;;  %855 = vst [vmem:[%s821_s2 + $0x1c] sm:$0xf] %v854_v8  ;;  %v856_v9 = vld [vmem:[%s824_s28 + $0x60] sm:$0xf] }
  0x49   : > { %v858_v10 = vld [vmem:[%s824_s28 + $0x64] sm:$0xf]  ;;  %v860_v11 = vld [vmem:[%s824_s28 + $0x78] sm:$0xf]  ;;  %857 = vst [vmem:[%s821_s2 + $0x20] sm:$0xf] %v856_v9 }
  0x4a   : > { %859 = vst [vmem:[%s821_s2 + $0x24] sm:$0xf] %v858_v10  ;;  %861 = vst [vmem:[%s821_s2 + $0x28] sm:$0xf] %v860_v11  ;;  %v862_v12 = vld [vmem:[%s824_s28 + $0x7c] sm:$0xf] }
  0x4b   : > { %863 = vst [vmem:[%s821_s2 + $0x2c] sm:$0xf] %v862_v12 }
  0x4c PF: > { %p3866_p7 = scmp.ge.s32.totalorder %s4507_s11, 1  ;;  %p918_p8 = scmp.lt.s32.totalorder %s4507_s11, 4 }
  0x4e   : > { %p919_p9 = pnand %p3866_p7, %p918_p8 }
  0x4f   : > { %v4298_v13 = vld [vmem:[%s4565_s17] sm:$0xff] (!%p919_p9)   ;;  %v4538_v14 = vmov (!%p919_p9), 0.0   ;;  %v4300_v16 = vld [vmem:[%s4565_s17 + $0x8] sm:$0xff] (!%p919_p9)   ;;  %vm4539_vm0 = vmmov (!%p919_p9), 0   ;;  %s3867_s11 = sshll.u32 (!%p919_p9), %s4711_s0, 1  ;;  %v4303_v18 = vld [vmem:[%s4640_s12 + $0x10] sm:$0xff] (!%p919_p9)  }
  0x50   : > { %922 = sbr.rel (%p919_p9) target bundleno = 2564 (0xa04), region = 169  ;;  %4074 = vmatprep.subr.bf16.mxu1 (!%p919_p9), %v4538_v14  ;;  %v4299_v15 = vld [vmem:[%s4640_s12] sm:$0xff] (!%p919_p9)   ;;  %4082 = vmatprep.mubr.msk.bf16.mxu1 (!%p919_p9), %vm4539_vm0, %v4538_v14  ;;  %v4301_v17 = vld [vmem:[%s4640_s12 + $0x8] sm:$0xff] (!%p919_p9)   ;;  %p1010_p10 = scmp.lt.s32.totalorder (!%p919_p9), %s3867_s11, 5  ;;  %v4302_v19 = vld [vmem:[%s4565_s17 + $0x10] sm:$0xff] (!%p919_p9)   ;;  %vm1069_vm1 = vcmask (!%p919_p9), 523264  }
  0x51   : > { %4075 = vmatpush3.bf16.msra.mxu1 (!%p919_p9), %v4298_v13  ;;  %4098 = vmatprep.subr.bf16.mxu0 (!%p919_p9), %v4299_v15  ;;  %s925_s15 = sand.u32 (!%p919_p9), 1, %s4499_s7   ;;  %v4305_v20 = vld [vmem:[%s4640_s12 + $0x18] sm:$0xff] (!%p919_p9)   ;;  %v4308_v24 = vld [vmem:[%s4635_s4] sm:$0xff] (!%p919_p9)   ;;  %v4310_v27 = vld [vmem:[%s4635_s4 + $0x8] sm:$0xff] (!%p919_p9)   ;;  %s5809_s28 = sld [smem:[#allocation17_spill]] (!%p919_p9)  ;;  %vm2080_vm2 = vcmask (!%p919_p9), 7168  }
  0x52   : > { %4076 = vmatprep.subr.bf16.mxu1 (!%p919_p9), %v4538_v14  ;;  %4099 = vmatpush3.bf16.msra.mxu0 (!%p919_p9), %v4299_v15  ;;  %s4239_s26 = smul.u32 (!%p919_p9), 48, %s925_s15  ;;  %v4304_v21 = vld [vmem:[%s4565_s17 + $0x18] sm:$0xff] (!%p919_p9)   ;;  %v4312_v28 = vld [vmem:[%s4635_s4 + $0x10] sm:$0xff] (!%p919_p9)   ;;  %v3896_v46 = vld [vmem:[%s4645_s19] ss:$0 sm:$0xff] (!%p919_p9)  ;;  %s5810_s2 = sld [smem:[#allocation6_spill]] (!%p919_p9) }
  0x53   : > { %4100 = vmatprep.subr.bf16.mxu0 (!%p919_p9), %v4301_v17  ;;  %v4314_v31 = vld [vmem:[%s4635_s4 + $0x18] sm:$0xff] (!%p919_p9)   ;;  %s5812_s7 = sld [smem:[#allocation8_spill]] (!%p919_p9)  ;;  %vm3537_vm15 = vcmask (!%p919_p9), 130048  }
  0x54   : > { %s927_s1 = scalar_lea.vmem (!%p919_p9), [#allocation3], %s4239_s26  ;;  %s5813_s26 = sld [smem:[#allocation11_spill]] (!%p919_p9) }
  0x55   : > { %4077 = vmatpush3.bf16.msra.mxu1 (!%p919_p9), %v4300_v16  ;;  %v4750_v22 = vld [vmem:[%s927_s1] sm:$0xff] (!%p919_p9)   ;;  %v4755_v25 = vld [vmem:[%s927_s1 + $0x8] sm:$0xff] (!%p919_p9)   ;;  %v4757_v26 = vld [vmem:[%s927_s1 + $0x10] sm:$0xff] (!%p919_p9)  }
  0x56   : > { %4078 = vmatprep.subr.bf16.mxu1 (!%p919_p9), %v4538_v14  ;;  %4101 = vmatpush3.bf16.msra.mxu0 (!%p919_p9), %v4301_v17  ;;  %v4767_v29 = vld [vmem:[%s927_s1 + $0x18] sm:$0xff] (!%p919_p9)   ;;  %v4769_v30 = vld [vmem:[%s927_s1 + $0x20] sm:$0xff] (!%p919_p9)   ;;  %v4776_v32 = vld [vmem:[%s927_s1 + $0x28] sm:$0xff] (!%p919_p9)   ;;  %s5814_s1 = sld [smem:[#allocation12_spill]] (!%p919_p9) }
  0x57   : > { %s5825_s11 = smov (!%p1010_p10, %s3867_s11), 5  ;;  %4102 = vmatprep.subr.bf16.mxu0 %v4303_v18  ;;  %4106 = vmatprep.mubr.msk.bf16.mxu0 %vm1069_vm1, %v4750_v22 }
  0x58   : > { %s3868_s16 = sshll.u32 %s5825_s11, 2  ;;  %s5811_s11 = sld [smem:[#allocation7_spill]] }
  0x59   : > { %s1013_s22 = scalar_lea.vmem %s4555_s9, %s3868_s16  ;;  %4079 = vmatpush3.bf16.msra.mxu1 %v4302_v19  ;;  %s5302_s16 = smul.u32 96, %s925_s15 }
  0x5a   : > { %4080 = vmatprep.subr.bf16.mxu1 %v4538_v14  ;;  %4103 = vmatpush3.bf16.msra.mxu0 %v4303_v18  ;;  %v4306_v23 = vld [vmem:[%s1013_s22] sm:$0xff]   ;;  %s4540_s15 = smov 64  }
  0x5b   : > { %4104 = vmatprep.subr.bf16.mxu0 %v4305_v20  ;;  %s5305_s22 = scalar_lea.vmem [#allocation5], %s5302_s16 }
  0x5d   : > { %4081 = vmatpush3.bf16.msra.mxu1 %v4304_v21 }
  0x5e   : > { %4086 = vmatprep.subr.bf16.mxu1 %v4538_v14  ;;  %4105 = vmatpush3.bf16.msra.mxu0 %v4305_v20 }
  0x60   : > { %4083 = vmatmul.mubr.msk.bf16.vlgmr.msra.gmra.mrb[0].mxu1 %vm1069_vm1, %v4306_v23 }
  0x61   : > { %4087 = vmatpush3.bf16.msra.mxu1 %v4308_v24  ;;  %4094 = vmatprep.mubr.msk.bf16.mxu1 %vm4539_vm0, %v4538_v14  ;;  %vm3550_vm0 = vcmask 261120  }
  0x62   : > { %4107 = vmatmul.mubr.msk.bf16.vlgmr.msra.gmra.mrb[0].mxu0 %vm1069_vm1, %v4755_v25  ;;  %4088 = vmatprep.subr.bf16.mxu1 %v4538_v14 }
  0x63   : > { %4110 = vmatprep.mubr.msk.bf16.mxu0 %vm1069_vm1, %v4757_v26 }
  0x65   : > { %4089 = vmatpush3.bf16.msra.mxu1 %v4310_v27 }
  0x66   : > { %4090 = vmatprep.subr.bf16.mxu1 %v4538_v14 }
  0x69   : > { %4091 = vmatpush3.bf16.msra.mxu1 %v4312_v28 }
  0x6a   : > { %4111 = vmatmul.mubr.msk.bf16.gmra.mrb[4].mxu0 %vm1069_vm1, %v4767_v29  ;;  %4092 = vmatprep.subr.bf16.mxu1 %v4538_v14 }
  0x6b   : > { %4114 = vmatprep.mubr.msk.bf16.mxu0 %vm1069_vm1, %v4769_v30 }
  0x6d   : > { %4093 = vmatpush3.bf16.msra.mxu1 %v4314_v31 }
  0x70   : > { %4095 = vmatmul.mubr.msk.bf16.vlgmr.msra.gmra.mrb[4].mxu1 %vm1069_vm1, %v4306_v23 }
  0x72   : > { %4115 = vmatmul.mubr.msk.bf16.gmra.mrb[8].mxu0 %vm1069_vm1, %v4776_v32 }
 0x133   : > { %v4781_v33 = vpop.f32.mrb[0].mxu1 }
 0x134   : > { %v4084_v34 = vpop.f32.mrb[1].mxu1 }
 0x135   : > { %v4783_v35 = vpop.f32.mrb[2].mxu1  ;;  %v4108_v36 = vpop.f32.mrb[0].mxu0 }
 0x136   : > { %v4085_v37 = vpop.f32.mrb[3].mxu1  ;;  %v1301_v38 = vpop.f32.mrb[1].mxu0 }
 0x137   : > { %v4109_v39 = vpop.f32.mrb[2].mxu0 }
 0x138   : > { %v1304_v40 = vpop.f32.mrb[3].mxu0 }
 0x13d   : > { %v4112_v41 = vpop.f32.mrb[4].mxu0 }
 0x13e   : > { %v1317_v42 = vpop.f32.mrb[5].mxu0 }
 0x13f   : > { %v4113_v43 = vpop.f32.mrb[6].mxu0 }
 0x140   : > { %v1320_v44 = vpop.f32.mrb[7].mxu0 }
 0x143   : > { %v1180_v45 = vpop.f32.mrb[4].mxu1 }
 0x144   : > { %v4096_v47 = vpop.f32.mrb[5].mxu1  ;;  %v1350_v48 = vadd.f32 %v4108_v36, %v1180_v45  ;;  %v1348_v49 = vadd.f32 %v1301_v38, %v1180_v45  ;;  %v1352_v50 = vadd.f32 %v1317_v42, %v1180_v45  ;;  %v1354_v51 = vadd.f32 %v4112_v41, %v1180_v45 }
 0x145   : > { %v4116_v52 = vpop.f32.mrb[8].mxu0  ;;  %v1183_v53 = vpop.f32.mrb[6].mxu1 }
 0x146   : > { %v1358_v54 = vadd.f32 %v4116_v52, %v1180_v45  ;;  %v1333_v55 = vpop.f32.mrb[9].mxu0  ;;  %v4097_v56 = vpop.f32.mrb[7].mxu1  ;;  %v1369_v57 = vadd.f32 %v3896_v46, %v1350_v48  ;;  %v1367_v58 = vadd.f32 %v3896_v46, %v1348_v49  ;;  %v1351_v59 = vadd.f32 %v4109_v39, %v1183_v53 }
 0x147   : > { %v1356_v60 = vadd.f32 %v1333_v55, %v1180_v45  ;;  %v4117_v61 = vpop.f32.mrb[10].mxu0  ;;  %v1349_v62 = vadd.f32 %v1304_v40, %v1183_v53  ;;  %v1353_v63 = vadd.f32 %v1320_v44, %v1183_v53  ;;  %v1355_v7 = vadd.f32 %v4113_v43, %v1183_v53 }
 0x148   : > { %v1359_v0 = vadd.f32 %v4117_v61, %v1183_v53  ;;  %v1336_v1 = vpop.f32.mrb[11].mxu0  ;;  %v1387_v2 = vsel %vm1069_vm1, %v1369_v57, 0.0  ;;  %v1381_v3 = vsel %vm1069_vm1, %v1367_v58, 0.0  ;;  %v1370_v4 = vadd.f32 %v3896_v46, %v1351_v59 }
 0x149   : > { %v1357_v5 = vadd.f32 %v1336_v1, %v1183_v53  ;;  %1388 = vadd.xlane.f32.xlu1 %v1387_v2  ;;  %1382 = vadd.xlane.f32.xlu0 %v1381_v3  ;;  %v1368_v6 = vadd.f32 %v3896_v46, %v1349_v62  ;;  %v1371_v10 = vadd.f32 %v3896_v46, %v1352_v50 }
 0x14a   : > { %v1390_v8 = vsel %vm1069_vm1, %v1370_v4, 0.0  ;;  %v1372_v11 = vadd.f32 %v3896_v46, %v1353_v63  ;;  %v1373_v14 = vadd.f32 %v3896_v46, %v1354_v51  ;;  %v1374_v15 = vadd.f32 %v3896_v46, %v1355_v7 }
 0x14b   : > { %v1384_v9 = vsel %vm1069_vm1, %v1368_v6, 0.0  ;;  %v1393_v12 = vsel %vm1069_vm1, %v1371_v10, 0.0  ;;  %v1375_v18 = vadd.f32 %v3896_v46, %v1356_v60  ;;  %v1376_v19 = vadd.f32 %v3896_v46, %v1357_v5 }
 0x14c   : > { %v1396_v13 = vsel %vm1069_vm1, %v1372_v11, 0.0  ;;  %v1399_v16 = vsel %vm1069_vm1, %v1373_v14, 0.0  ;;  %v1402_v17 = vsel %vm1069_vm1, %v1374_v15, 0.0  ;;  %v4796_v23 = vadd.f32 %v3896_v46, %v1358_v54 }
 0x14d   : > { %1391 = vadd.xlane.f32.xlu1 %v1390_v8  ;;  %1385 = vadd.xlane.f32.xlu0 %v1384_v9  ;;  %v1405_v20 = vsel %vm1069_vm1, %v1375_v18, 0.0  ;;  %v1408_v21 = vsel %vm1069_vm1, %v1376_v19, 0.0  ;;  %v4798_v24 = vadd.f32 %v3896_v46, %v1359_v0 }
 0x14e   : > { %v1411_v27 = vsel %vm1069_vm1, %v4796_v23, 0.0 }
 0x14f   : > { %v1414_v28 = vsel %vm1069_vm1, %v4798_v24, 0.0 }
 0x151   : > { %1394 = vadd.xlane.f32.xlu0 %v1393_v12  ;;  %1397 = vadd.xlane.f32.xlu1 %v1396_v13 }
 0x155   : > { %1400 = vadd.xlane.f32.xlu0 %v1399_v16  ;;  %1403 = vadd.xlane.f32.xlu1 %v1402_v17 }
 0x159   : > { %1406 = vadd.xlane.f32.xlu0 %v1405_v20  ;;  %1409 = vadd.xlane.f32.xlu1 %v1408_v21 }
 0x15d   : > { %1412 = vadd.xlane.f32.xlu0 %v1411_v27  ;;  %1415 = vadd.xlane.f32.xlu1 %v1414_v28 }
 0x1d6   : > { %v1389_v31 = vpop.xlane.xlu1 %1388  ;;  %v1383_v34 = vpop.xlane.xlu0 %1382 }
 0x1d7   : > { %v1420_v36 = vmul.f32 0.015625, %v1389_v31  ;;  %v1418_v37 = vmul.f32 0.015625, %v1383_v34 }
 0x1d9   : > { %v4804_v38 = vsub.f32 %v1369_v57, %v1420_v36  ;;  %v4806_v39 = vsub.f32 %v1367_v58, %v1418_v37 }
 0x1da   : > { %v1392_v40 = vpop.xlane.xlu1 %1391  ;;  %v1386_v41 = vpop.xlane.xlu0 %1385 }
 0x1db   : > { %v1421_v42 = vmul.f32 0.015625, %v1392_v40  ;;  %v1419_v43 = vmul.f32 0.015625, %v1386_v41  ;;  %v1442_v44 = vmul.f32 %v4806_v39, %v4806_v39  ;;  %v1444_v48 = vmul.f32 %v4804_v38, %v4804_v38  ;;  %v4317_v40 = vld [vmem:[%s4660_s6] sm:$0xff]   ;;  %v4318_v41 = vld [vmem:[%s4660_s6 + $0x8] sm:$0xff]  }
 0x1dc   : > { %4118 = vmatprep.subr.bf16.mxu1 %v4317_v40 }
 0x1dd   : > { %v4810_v45 = vsub.f32 %v1370_v4, %v1421_v42  ;;  %v4812_v46 = vsub.f32 %v1368_v6, %v1419_v43  ;;  %v1454_v47 = vsel %vm1069_vm1, %v1442_v44, 0.0  ;;  %v1460_v57 = vsel %vm1069_vm1, %v1444_v48, 0.0  ;;  %4119 = vmatpush3.bf16.msra.mxu1 %v4317_v40  ;;  %v4319_v42 = vld [vmem:[%s4660_s6 + $0x10] sm:$0xff]   ;;  %v4320_v43 = vld [vmem:[%s4660_s6 + $0x18] sm:$0xff]   ;;  %v4871_v44 = vld [vmem:[%s4560_s13] sm:$0xff]  }
 0x1de   : > { %v1395_v49 = vpop.xlane.xlu0 %1394  ;;  %v1398_v50 = vpop.xlane.xlu1 %1397  ;;  %1455 = vadd.xlane.f32.xlu0 %v1454_v47  ;;  %4120 = vmatprep.subr.bf16.mxu1 %v4318_v41 }
 0x1df   : > { %v1422_v51 = vmul.f32 0.015625, %v1395_v49  ;;  %v1423_v52 = vmul.f32 0.015625, %v1398_v50  ;;  %v1443_v53 = vmul.f32 %v4812_v46, %v4812_v46  ;;  %v1445_v54 = vmul.f32 %v4810_v45, %v4810_v45 }
 0x1e1   : > { %v4821_v55 = vsub.f32 %v1371_v10, %v1422_v51  ;;  %v4823_v56 = vsub.f32 %v1372_v11, %v1423_v52  ;;  %v1457_v58 = vsel %vm1069_vm1, %v1443_v53, 0.0  ;;  %v1463_v0 = vsel %vm1069_vm1, %v1445_v54, 0.0  ;;  %4121 = vmatpush3.bf16.msra.mxu1 %v4318_v41 }
 0x1e2   : > { %v1401_v59 = vpop.xlane.xlu0 %1400  ;;  %v1404_v60 = vpop.xlane.xlu1 %1403  ;;  %1461 = vadd.xlane.f32.xlu0 %v1460_v57  ;;  %1458 = vadd.xlane.f32.xlu1 %v1457_v58 }
 0x1e3   : > { %v1424_v61 = vmul.f32 0.015625, %v1401_v59  ;;  %v1425_v62 = vmul.f32 0.015625, %v1404_v60  ;;  %v1446_v63 = vmul.f32 %v4821_v55, %v4821_v55  ;;  %v1447_v4 = vmul.f32 %v4823_v56, %v4823_v56  ;;  %4122 = vmatprep.subr.bf16.mxu1 %v4319_v42 }
 0x1e5   : > { %v4830_v1 = vsub.f32 %v1373_v14, %v1424_v61  ;;  %v4832_v2 = vsub.f32 %v1374_v15, %v1425_v62  ;;  %v1466_v3 = vsel %vm1069_vm1, %v1446_v63, 0.0  ;;  %v1469_v14 = vsel %vm1069_vm1, %v1447_v4, 0.0  ;;  %4123 = vmatpush3.bf16.msra.mxu1 %v4319_v42 }
 0x1e6   : > { %1467 = vadd.xlane.f32.xlu0 %v1466_v3  ;;  %v1407_v5 = vpop.xlane.xlu0 %1406  ;;  %1464 = vadd.xlane.f32.xlu1 %v1463_v0  ;;  %v1410_v6 = vpop.xlane.xlu1 %1409 }
 0x1e7   : > { %v1426_v7 = vmul.f32 0.015625, %v1407_v5  ;;  %v1427_v8 = vmul.f32 0.015625, %v1410_v6  ;;  %v1448_v9 = vmul.f32 %v4830_v1, %v4830_v1  ;;  %v1449_v10 = vmul.f32 %v4832_v2, %v4832_v2  ;;  %4124 = vmatprep.subr.bf16.mxu1 %v4320_v43 }
 0x1e9   : > { %v4841_v11 = vsub.f32 %v1375_v18, %v1426_v7  ;;  %v4843_v12 = vsub.f32 %v1376_v19, %v1427_v8  ;;  %v1472_v13 = vsel %vm1069_vm1, %v1448_v9, 0.0  ;;  %v1475_v27 = vsel %vm1069_vm1, %v1449_v10, 0.0  ;;  %4125 = vmatpush3.bf16.msra.mxu1 %v4320_v43  ;;  %v4875_v7 = vld [vmem:[%s4650_s27] ss:$0 sm:$0xff] }
 0x1ea   : > { %1473 = vadd.xlane.f32.xlu0 %v1472_v13  ;;  %v1413_v15 = vpop.xlane.xlu0 %1412  ;;  %1470 = vadd.xlane.f32.xlu1 %v1469_v14  ;;  %v1416_v16 = vpop.xlane.xlu1 %1415 }
 0x1eb   : > { %v1428_v17 = vmul.f32 0.015625, %v1413_v15  ;;  %v1429_v20 = vmul.f32 0.015625, %v1416_v16  ;;  %v1450_v21 = vmul.f32 %v4841_v11, %v4841_v11  ;;  %v1451_v31 = vmul.f32 %v4843_v12, %v4843_v12  ;;  %4158 = vmatprep.subr.bf16.mxu1 %v4871_v44 }
 0x1ed   : > { %v4851_v18 = vsub.f32 %v4796_v23, %v1428_v17  ;;  %v4854_v19 = vsub.f32 %v4798_v24, %v1429_v20  ;;  %v1478_v28 = vsel %vm1069_vm1, %v1450_v21, 0.0  ;;  %v1481_v23 = vsel %vm1069_vm1, %v1451_v31, 0.0 }
 0x1ee   : > { %1479 = vadd.xlane.f32.xlu0 %v1478_v28  ;;  %1476 = vadd.xlane.f32.xlu1 %v1475_v27  ;;  %v4880_v28 = vld [vmem:[%s4655_s14] ss:$0 sm:$0xff] }
 0x1ef   : > { %v1452_v34 = vmul.f32 %v4851_v18, %v4851_v18  ;;  %v1453_v24 = vmul.f32 %v4854_v19, %v4854_v19 }
 0x1f1   : > { %v1484_v36 = vsel %vm1069_vm1, %v1452_v34, 0.0  ;;  %v1487_v37 = vsel %vm1069_vm1, %v1453_v24, 0.0 }
 0x1f2   : > { %1485 = vadd.xlane.f32.xlu0 %v1484_v36  ;;  %1482 = vadd.xlane.f32.xlu1 %v1481_v23 }
 0x1f6   : > { %1488 = vadd.xlane.f32.xlu1 %v1487_v37 }
 0x26b   : > { %v1456_v47 = vpop.xlane.xlu0 %1455 }
 0x26c   : > { %v1490_v48 = vmul.f32 0.015625, %v1456_v47 }
 0x26e   : > { %v1502_v49 = vadd.f32 1e-05, %v1490_v48 }
 0x26f   : > { %v1462_v50 = vpop.xlane.xlu0 %1461  ;;  %v1459_v51 = vpop.xlane.xlu1 %1458 }
 0x270   : > { %4341 = vrsqrt.f32 %v1502_v49  ;;  %v1492_v52 = vmul.f32 0.015625, %v1462_v50  ;;  %v1491_v53 = vmul.f32 0.015625, %v1459_v51 }
 0x272   : > { %v1504_v54 = vadd.f32 1e-05, %v1492_v52  ;;  %v1503_v57 = vadd.f32 1e-05, %v1491_v53 }
 0x273   : > { %v1468_v58 = vpop.xlane.xlu0 %1467  ;;  %v1465_v59 = vpop.xlane.xlu1 %1464 }
 0x274   : > { %4343 = vrsqrt.f32 %v1504_v54  ;;  %v1494_v60 = vmul.f32 0.015625, %v1468_v58  ;;  %v1493_v61 = vmul.f32 0.015625, %v1465_v59 }
 0x275   : > { %4345 = vrsqrt.f32 %v1503_v57 }
 0x276   : > { %v1506_v62 = vadd.f32 1e-05, %v1494_v60  ;;  %v1505_v63 = vadd.f32 1e-05, %v1493_v61 }
 0x277   : > { %v1474_v0 = vpop.xlane.xlu0 %1473  ;;  %v1471_v3 = vpop.xlane.xlu1 %1470 }
 0x278   : > { %4347 = vrsqrt.f32 %v1506_v62  ;;  %v1496_v4 = vmul.f32 0.015625, %v1474_v0  ;;  %v1495_v5 = vmul.f32 0.015625, %v1471_v3 }
 0x279   : > { %4349 = vrsqrt.f32 %v1505_v63 }
 0x27a   : > { %v4342_v6 = vpop.eup %4341  ;;  %v1508_v8 = vadd.f32 1e-05, %v1496_v4  ;;  %v1507_v9 = vadd.f32 1e-05, %v1495_v5 }
 0x27b   : > { %v1526_v10 = vmul.f32 %v4342_v6, %v4806_v39  ;;  %v1480_v13 = vpop.xlane.xlu0 %1479  ;;  %v1477_v14 = vpop.xlane.xlu1 %1476 }
 0x27c   : > { %4351 = vrsqrt.f32 %v1508_v8  ;;  %v1498_v15 = vmul.f32 0.015625, %v1480_v13  ;;  %v1497_v16 = vmul.f32 0.015625, %v1477_v14 }
 0x27d   : > { %4353 = vrsqrt.f32 %v1507_v9  ;;  %v1544_v17 = vmul.f32 %v4875_v7, %v1526_v10 }
 0x27e   : > { %v4344_v20 = vpop.eup %4343  ;;  %v1510_v21 = vadd.f32 1e-05, %v1498_v15  ;;  %v1509_v27 = vadd.f32 1e-05, %v1497_v16  ;;  %v4322_v15 = vld [vmem:[%s4560_s13 + $0x8] sm:$0xff]  }
 0x27f   : > { %v4346_v31 = vpop.eup %4345  ;;  %v1528_v34 = vmul.f32 %v4344_v20, %v4804_v38  ;;  %v1486_v36 = vpop.xlane.xlu0 %1485  ;;  %v1562_v40 = vadd.f32 %v4880_v28, %v1544_v17 }
 0x280   : > { %v1483_v23 = vpop.xlane.xlu1 %1482  ;;  %v1527_v39 = vmul.f32 %v4346_v31, %v4812_v46  ;;  %4355 = vrsqrt.f32 %v1510_v21  ;;  %v1500_v24 = vmul.f32 0.015625, %v1486_v36 }
 0x281   : > { %v1499_v37 = vmul.f32 0.015625, %v1483_v23  ;;  %4357 = vrsqrt.f32 %v1509_v27  ;;  %v1546_v42 = vmul.f32 %v4875_v7, %v1528_v34  ;;  %v1574_v53 = vmax.f32 %v1562_v40, 0.0 }
 0x282   : > { %v4348_v41 = vpop.eup %4347  ;;  %v1512_v43 = vadd.f32 1e-05, %v1500_v24  ;;  %v1545_v48 = vmul.f32 %v4875_v7, %v1527_v39  ;;  %v4323_v39 = vld [vmem:[%s4560_s13 + $0x10] sm:$0xff]  }
 0x283   : > { %v1511_v47 = vadd.f32 1e-05, %v1499_v37  ;;  %v4350_v49 = vpop.eup %4349  ;;  %v1530_v38 = vmul.f32 %v4348_v41, %v4821_v55  ;;  %v1564_v61 = vadd.f32 %v4880_v28, %v1546_v42 }
 0x284   : > { %v1489_v50 = vpop.xlane.xlu1 %1488  ;;  %v1529_v51 = vmul.f32 %v4350_v49, %v4810_v45  ;;  %4359 = vrsqrt.f32 %v1512_v43  ;;  %v1563_v52 = vadd.f32 %v4880_v28, %v1545_v48 }
 0x285   : > { %v1501_v46 = vmul.f32 0.015625, %v1489_v50  ;;  %4361 = vrsqrt.f32 %v1511_v47  ;;  %v1548_v54 = vmul.f32 %v4875_v7, %v1530_v38  ;;  %v1576_v5 = vmax.f32 %v1564_v61, 0.0  ;;  %v4324_v47 = vld [vmem:[%s4560_s13 + $0x18] sm:$0xff]  }
 0x286   : > { %v4352_v57 = vpop.eup %4351  ;;  %v1547_v58 = vmul.f32 %v4875_v7, %v1529_v51  ;;  %v1575_v60 = vmax.f32 %v1563_v52, 0.0 }
 0x287   : > { %v1513_v59 = vadd.f32 1e-05, %v1501_v46  ;;  %v4354_v62 = vpop.eup %4353  ;;  %v1532_v55 = vmul.f32 %v4352_v57, %v4830_v1  ;;  %v1566_v3 = vadd.f32 %v4880_v28, %v1548_v54 }
 0x288   : > { %v1531_v45 = vmul.f32 %v4354_v62, %v4823_v56  ;;  %v1586_v63 = vpack.c.bf16 %v1575_v60, %v1574_v53  ;;  %v1565_v0 = vadd.f32 %v4880_v28, %v1547_v58 }
 0x289   : > { %4363 = vrsqrt.f32 %v1513_v59  ;;  %v1550_v9 = vmul.f32 %v4875_v7, %v1532_v55  ;;  %v1578_v16 = vmax.f32 %v1566_v3, 0.0 }
 0x28a   : > { %v4356_v4 = vpop.eup %4355  ;;  %4126 = vmatprep.mubr.msk.bf16.mxu1 %vm1069_vm1, %v1586_v63  ;;  %v1577_v6 = vmax.f32 %v1565_v0, 0.0  ;;  %v1549_v8 = vmul.f32 %v4875_v7, %v1531_v45 }
 0x28b   : > { %v4358_v10 = vpop.eup %4357  ;;  %v1534_v1 = vmul.f32 %v4356_v4, %v4841_v11  ;;  %v1568_v27 = vadd.f32 %v4880_v28, %v1550_v9 }
 0x28c   : > { %v1533_v56 = vmul.f32 %v4358_v10, %v4832_v2  ;;  %v1587_v13 = vpack.c.bf16 %v1577_v6, %v1576_v5  ;;  %v1567_v14 = vadd.f32 %v4880_v28, %v1549_v8 }
 0x28d   : > { %v1552_v31 = vmul.f32 %v4875_v7, %v1534_v1  ;;  %v1580_v40 = vmax.f32 %v1568_v27, 0.0 }
 0x28e   : > { %v4360_v17 = vpop.eup %4359  ;;  %4127 = vmatmul.mubr.msk.bf16.vlgmr.msra.gmra.mrb[8].mxu1 %vm1069_vm1, %v1587_v13  ;;  %v1579_v20 = vmax.f32 %v1567_v14, 0.0  ;;  %v1551_v21 = vmul.f32 %v4875_v7, %v1533_v56 }
 0x28f   : > { %v4362_v34 = vpop.eup %4361  ;;  %v1536_v11 = vmul.f32 %v4360_v17, %v4851_v18  ;;  %4159 = vmatpush3.bf16.msra.mxu1 %v4871_v44  ;;  %v1570_v18 = vadd.f32 %v4880_v28, %v1552_v31 }
 0x290   : > { %v1535_v2 = vmul.f32 %v4362_v34, %v4843_v12  ;;  %v1588_v36 = vpack.c.bf16 %v1579_v20, %v1578_v16  ;;  %4160 = vmatprep.subr.bf16.mxu1 %v4322_v15  ;;  %v1569_v23 = vadd.f32 %v4880_v28, %v1551_v21 }
 0x291   : > { %v1554_v24 = vmul.f32 %v4875_v7, %v1536_v11  ;;  %v1582_v38 = vmax.f32 %v1570_v18, 0.0 }
 0x292   : > { %4130 = vmatprep.mubr.msk.bf16.mxu1 %vm1069_vm1, %v1588_v36  ;;  %v1581_v41 = vmax.f32 %v1569_v23, 0.0  ;;  %v1553_v42 = vmul.f32 %v4875_v7, %v1535_v2  ;;  %v3933_v2 = vld [vmem:[%s4570_s21] ss:$0 sm:$0xff] }
 0x293   : > { %v4364_v37 = vpop.eup %4363  ;;  %4161 = vmatpush3.bf16.msra.mxu1 %v4322_v15  ;;  %v1572_v49 = vadd.f32 %v4880_v28, %v1554_v24 }
 0x294   : > { %v1537_v44 = vmul.f32 %v4364_v37, %v4854_v19  ;;  %v1589_v12 = vpack.c.bf16 %v1581_v41, %v1580_v40  ;;  %4162 = vmatprep.subr.bf16.mxu1 %v4323_v39  ;;  %v1571_v43 = vadd.f32 %v4880_v28, %v1553_v42 }
 0x295   : > { %v1584_v19 = vmax.f32 %v1572_v49, 0.0 }
 0x296   : > { %v1555_v48 = vmul.f32 %v4875_v7, %v1537_v44  ;;  %4131 = vmatmul.mubr.msk.bf16.gmra.mrb[12].mxu1 %vm1069_vm1, %v1589_v12  ;;  %v1583_v50 = vmax.f32 %v1571_v43, 0.0  ;;  %v3899_v7 = vld [vmem:[%s4665_s20] ss:$0 sm:$0xff] }
 0x297   : > { %4163 = vmatpush3.bf16.msra.mxu1 %v4323_v39 }
 0x298   : > { %v1573_v51 = vadd.f32 %v4880_v28, %v1555_v48  ;;  %v1590_v46 = vpack.c.bf16 %v1583_v50, %v1582_v38  ;;  %4164 = vmatprep.subr.bf16.mxu1 %v4324_v47 }
 0x29a   : > { %v1585_v52 = vmax.f32 %v1573_v51, 0.0  ;;  %4134 = vmatprep.mubr.msk.bf16.mxu1 %vm1069_vm1, %v1590_v46 }
 0x29b   : > { %4165 = vmatpush3.bf16.msra.mxu1 %v4324_v47 }
 0x29c   : > { %v1591_v53 = vpack.c.bf16 %v1585_v52, %v1584_v19 }
 0x29e   : > { %4135 = vmatmul.mubr.msk.bf16.gmra.mrb[16].mxu1 %vm1069_vm1, %v1591_v53 }
 0x29f   : > { %4166 = vmatprep.mubr.msk.bf16.mxu1 %vm1069_vm1, %v4750_v22 }
 0x2a6   : > { %4167 = vmatmul.mubr.msk.bf16.vlgmr.msra.gmra.mrb[20].mxu1 %vm1069_vm1, %v4755_v25 }
 0x2a7   : > { %4170 = vmatprep.mubr.msk.bf16.mxu1 %vm1069_vm1, %v4757_v26 }
 0x2ae   : > { %4171 = vmatmul.mubr.msk.bf16.gmra.mrb[24].mxu1 %vm1069_vm1, %v4767_v29 }
 0x2af   : > { %4174 = vmatprep.mubr.msk.bf16.mxu1 %vm1069_vm1, %v4769_v30 }
 0x2b6   : > { %4175 = vmatmul.mubr.msk.bf16.gmra.mrb[28].mxu1 %vm1069_vm1, %v4776_v32 }
 0x361   : > { %v4128_v28 = vpop.f32.mrb[8].mxu1 }
 0x362   : > { %v1683_v54 = vpop.f32.mrb[9].mxu1  ;;  %v4941_v25 = vadd.f32 %v4128_v28, %v3899_v7 }
 0x363   : > { %v4939_v57 = vadd.f32 %v3899_v7, %v1683_v54  ;;  %v4129_v22 = vpop.f32.mrb[10].mxu1 }
 0x364   : > { %v1686_v58 = vpop.f32.mrb[11].mxu1  ;;  %v4947_v29 = vadd.f32 %v4129_v22, %v3899_v7  ;;  %v1738_v60 = vsel %vm1069_vm1, %v4941_v25, 0.0 }
 0x365   : > { %v4943_v59 = vadd.f32 %v3899_v7, %v1686_v58  ;;  %v1732_v26 = vsel %vm1069_vm1, %v4939_v57, 0.0 }
 0x366   : > { %1733 = vadd.xlane.f32.xlu0 %v1732_v26  ;;  %v1741_v45 = vsel %vm1069_vm1, %v4947_v29, 0.0 }
 0x367   : > { %v1735_v30 = vsel %vm1069_vm1, %v4943_v59, 0.0 }
 0x368   : > { %1736 = vadd.xlane.f32.xlu1 %v1735_v30 }
 0x369   : > { %v4132_v32 = vpop.f32.mrb[12].mxu1 }
 0x36a   : > { %1739 = vadd.xlane.f32.xlu0 %v1738_v60  ;;  %v1699_v61 = vpop.f32.mrb[13].mxu1  ;;  %v4957_v0 = vadd.f32 %v4132_v32, %v3899_v7 }
 0x36b   : > { %v4953_v62 = vadd.f32 %v3899_v7, %v1699_v61  ;;  %v4133_v55 = vpop.f32.mrb[14].mxu1 }
 0x36c   : > { %1742 = vadd.xlane.f32.xlu1 %v1741_v45  ;;  %v1702_v63 = vpop.f32.mrb[15].mxu1  ;;  %v4963_v5 = vadd.f32 %v4133_v55, %v3899_v7  ;;  %v1750_v9 = vsel %vm1069_vm1, %v4957_v0, 0.0 }
 0x36d   : > { %v4959_v3 = vadd.f32 %v3899_v7, %v1702_v63  ;;  %v1744_v4 = vsel %vm1069_vm1, %v4953_v62, 0.0 }
 0x36e   : > { %1745 = vadd.xlane.f32.xlu0 %v1744_v4  ;;  %v1753_v13 = vsel %vm1069_vm1, %v4963_v5, 0.0 }
 0x36f   : > { %v1747_v6 = vsel %vm1069_vm1, %v4959_v3, 0.0 }
 0x370   : > { %1748 = vadd.xlane.f32.xlu1 %v1747_v6 }
 0x371   : > { %v4136_v8 = vpop.f32.mrb[16].mxu1 }
 0x372   : > { %1751 = vadd.xlane.f32.xlu0 %v1750_v9  ;;  %v1715_v10 = vpop.f32.mrb[17].mxu1  ;;  %v4973_v15 = vadd.f32 %v4136_v8, %v3899_v7 }
 0x373   : > { %v4969_v1 = vadd.f32 %v3899_v7, %v1715_v10  ;;  %v4137_v56 = vpop.f32.mrb[18].mxu1 }
 0x374   : > { %1754 = vadd.xlane.f32.xlu1 %v1753_v13  ;;  %v1718_v14 = vpop.f32.mrb[19].mxu1  ;;  %v4979_v20 = vadd.f32 %v4137_v56, %v3899_v7  ;;  %v1762_v31 = vsel %vm1069_vm1, %v4973_v15, 0.0 }
 0x375   : > { %v4975_v16 = vadd.f32 %v3899_v7, %v1718_v14  ;;  %v1756_v17 = vsel %vm1069_vm1, %v4969_v1, 0.0 }
 0x376   : > { %1757 = vadd.xlane.f32.xlu0 %v1756_v17  ;;  %v1765_v39 = vsel %vm1069_vm1, %v4979_v20, 0.0 }
 0x377   : > { %v1759_v21 = vsel %vm1069_vm1, %v4975_v16, 0.0 }
 0x378   : > { %1760 = vadd.xlane.f32.xlu1 %v1759_v21 }
 0x379   : > { %v4168_v27 = vpop.f32.mrb[20].mxu1 }
 0x37a   : > { %v2208_v34 = vadd.f32 %v4168_v27, %v4781_v33  ;;  %v2159_v11 = vpop.f32.mrb[21].mxu1  ;;  %1763 = vadd.xlane.f32.xlu0 %v1762_v31 }
 0x37b   : > { %v2206_v36 = vadd.f32 %v2159_v11, %v4781_v33  ;;  %v4169_v23 = vpop.f32.mrb[22].mxu1 }
 0x37c   : > { %v2209_v24 = vadd.f32 %v4169_v23, %v4783_v35  ;;  %v2162_v37 = vpop.f32.mrb[23].mxu1  ;;  %1766 = vadd.xlane.f32.xlu1 %v1765_v39  ;;  %v4998_v44 = vadd.f32 %v3933_v2, %v2208_v34 }
 0x37d   : > { %v2207_v40 = vadd.f32 %v2162_v37, %v4783_v35  ;;  %v4992_v41 = vadd.f32 %v3933_v2, %v2206_v36 }
 0x37e   : > { %v5002_v47 = vadd.f32 %v3933_v2, %v2209_v24  ;;  %v2245_v51 = vsel %vm1069_vm1, %v4998_v44, 0.0 }
 0x37f   : > { %v2239_v42 = vsel %vm1069_vm1, %v4992_v41, 0.0  ;;  %v4996_v18 = vadd.f32 %v3933_v2, %v2207_v40 }
 0x380   : > { %2240 = vadd.xlane.f32.xlu0 %v2239_v42  ;;  %v2248_v53 = vsel %vm1069_vm1, %v5002_v47, 0.0 }
 0x381   : > { %v4172_v12 = vpop.f32.mrb[24].mxu1  ;;  %v2242_v43 = vsel %vm1069_vm1, %v4996_v18, 0.0 }
 0x382   : > { %v2212_v48 = vadd.f32 %v4172_v12, %v4781_v33  ;;  %v2175_v49 = vpop.f32.mrb[25].mxu1  ;;  %2243 = vadd.xlane.f32.xlu1 %v2242_v43 }
 0x383   : > { %v2210_v38 = vadd.f32 %v2175_v49, %v4781_v33  ;;  %v4173_v50 = vpop.f32.mrb[26].mxu1 }
 0x384   : > { %v2213_v46 = vadd.f32 %v4173_v50, %v4783_v35  ;;  %v2178_v19 = vpop.f32.mrb[27].mxu1  ;;  %2246 = vadd.xlane.f32.xlu0 %v2245_v51  ;;  %v5018_v22 = vadd.f32 %v3933_v2, %v2212_v48 }
 0x385   : > { %v2211_v52 = vadd.f32 %v2178_v19, %v4783_v35  ;;  %v5012_v7 = vadd.f32 %v3933_v2, %v2210_v38 }
 0x386   : > { %2249 = vadd.xlane.f32.xlu1 %v2248_v53  ;;  %v5022_v30 = vadd.f32 %v3933_v2, %v2213_v46  ;;  %v2257_v45 = vsel %vm1069_vm1, %v5018_v22, 0.0 }
 0x387   : > { %v2251_v28 = vsel %vm1069_vm1, %v5012_v7, 0.0  ;;  %v5016_v54 = vadd.f32 %v3933_v2, %v2211_v52 }
 0x388   : > { %2252 = vadd.xlane.f32.xlu0 %v2251_v28  ;;  %v2260_v8 = vsel %vm1069_vm1, %v5022_v30, 0.0 }
 0x389   : > { %v4176_v58 = vpop.f32.mrb[28].mxu1  ;;  %v2254_v26 = vsel %vm1069_vm1, %v5016_v54, 0.0 }
 0x38a   : > { %v2216_v32 = vadd.f32 %v4176_v58, %v4781_v33  ;;  %v2191_v60 = vpop.f32.mrb[29].mxu1  ;;  %2255 = vadd.xlane.f32.xlu1 %v2254_v26 }
 0x38b   : > { %v2214_v61 = vadd.f32 %v2191_v60, %v4781_v33  ;;  %v4177_v55 = vpop.f32.mrb[30].mxu1 }
 0x38c   : > { %v2217_v63 = vadd.f32 %v4177_v55, %v4783_v35  ;;  %v2194_v4 = vpop.f32.mrb[31].mxu1  ;;  %2258 = vadd.xlane.f32.xlu0 %v2257_v45  ;;  %v5038_v56 = vadd.f32 %v3933_v2, %v2216_v32 }
 0x38d   : > { %v2215_v6 = vadd.f32 %v2194_v4, %v4783_v35  ;;  %v5032_v9 = vadd.f32 %v3933_v2, %v2214_v61 }
 0x38e   : > { %2261 = vadd.xlane.f32.xlu1 %v2260_v8  ;;  %v5042_v14 = vadd.f32 %v3933_v2, %v2217_v63  ;;  %v2269_v35 = vsel %vm1069_vm1, %v5038_v56, 0.0 }
 0x38f   : > { %v2263_v10 = vsel %vm1069_vm1, %v5032_v9, 0.0  ;;  %v5036_v33 = vadd.f32 %v3933_v2, %v2215_v6 }
 0x390   : > { %2264 = vadd.xlane.f32.xlu0 %v2263_v10  ;;  %v2272_v17 = vsel %vm1069_vm1, %v5042_v14, 0.0 }
 0x391   : > { %v2266_v13 = vsel %vm1069_vm1, %v5036_v33, 0.0 }
 0x392   : > { %2267 = vadd.xlane.f32.xlu1 %v2266_v13 }
 0x394   : > { %2270 = vadd.xlane.f32.xlu0 %v2269_v35 }
 0x396   : > { %2273 = vadd.xlane.f32.xlu1 %v2272_v17 }
 0x3f3   : > { %v1734_v21 = vpop.xlane.xlu0 %1733 }
 0x3f4   : > { %v1768_v27 = vmul.f32 0.015625, %v1734_v21 }
 0x3f5   : > { %v1737_v31 = vpop.xlane.xlu1 %1736 }
 0x3f6   : > { %v5049_v34 = vsub.f32 %v4939_v57, %v1768_v27  ;;  %v1769_v11 = vmul.f32 0.015625, %v1737_v31 }
 0x3f7   : > { %v1740_v36 = vpop.xlane.xlu0 %1739 }
 0x3f8   : > { %v5052_v2 = vsub.f32 %v4943_v59, %v1769_v11  ;;  %v1770_v23 = vmul.f32 0.015625, %v1740_v36  ;;  %v1792_v39 = vmul.f32 %v5049_v34, %v5049_v34 }
 0x3f9   : > { %v1743_v24 = vpop.xlane.xlu1 %1742 }
 0x3fa   : > { %v5057_v37 = vsub.f32 %v4941_v25, %v1770_v23  ;;  %v1771_v40 = vmul.f32 0.015625, %v1743_v24  ;;  %v1804_v42 = vsel %vm1069_vm1, %v1792_v39, 0.0  ;;  %v1793_v57 = vmul.f32 %v5052_v2, %v5052_v2 }
 0x3fb   : > { %v1746_v12 = vpop.xlane.xlu0 %1745  ;;  %1805 = vadd.xlane.f32.xlu0 %v1804_v42 }
 0x3fc   : > { %v5063_v43 = vsub.f32 %v4947_v29, %v1771_v40  ;;  %v1772_v59 = vmul.f32 0.015625, %v1746_v12  ;;  %v1807_v48 = vsel %vm1069_vm1, %v1793_v57, 0.0  ;;  %v1794_v49 = vmul.f32 %v5057_v37, %v5057_v37 }
 0x3fd   : > { %1808 = vadd.xlane.f32.xlu1 %v1807_v48  ;;  %v1749_v25 = vpop.xlane.xlu1 %1748 }
 0x3fe   : > { %v5069_v38 = vsub.f32 %v4953_v62, %v1772_v59  ;;  %v1773_v50 = vmul.f32 0.015625, %v1749_v25  ;;  %v1810_v51 = vsel %vm1069_vm1, %v1794_v49, 0.0  ;;  %v1795_v46 = vmul.f32 %v5063_v43, %v5063_v43 }
 0x3ff   : > { %v1752_v19 = vpop.xlane.xlu0 %1751  ;;  %1811 = vadd.xlane.f32.xlu0 %v1810_v51 }
 0x400   : > { %v5075_v29 = vsub.f32 %v4959_v3, %v1773_v50  ;;  %v1774_v52 = vmul.f32 0.015625, %v1752_v19  ;;  %v1813_v53 = vsel %vm1069_vm1, %v1795_v46, 0.0  ;;  %v1796_v28 = vmul.f32 %v5069_v38, %v5069_v38 }
 0x401   : > { %1814 = vadd.xlane.f32.xlu1 %v1813_v53  ;;  %v1755_v62 = vpop.xlane.xlu1 %1754 }
 0x402   : > { %v5081_v58 = vsub.f32 %v4957_v0, %v1774_v52  ;;  %v1775_v26 = vmul.f32 0.015625, %v1755_v62  ;;  %v1816_v32 = vsel %vm1069_vm1, %v1796_v28, 0.0  ;;  %v1797_v60 = vmul.f32 %v5075_v29, %v5075_v29 }
 0x403   : > { %1817 = vadd.xlane.f32.xlu0 %v1816_v32  ;;  %v1758_v3 = vpop.xlane.xlu0 %1757 }
 0x404   : > { %v5087_v61 = vsub.f32 %v4963_v5, %v1775_v26  ;;  %v1776_v55 = vmul.f32 0.015625, %v1758_v3  ;;  %v1819_v45 = vsel %vm1069_vm1, %v1797_v60, 0.0  ;;  %v1798_v63 = vmul.f32 %v5081_v58, %v5081_v58 }
 0x405   : > { %1820 = vadd.xlane.f32.xlu1 %v1819_v45  ;;  %v1761_v0 = vpop.xlane.xlu1 %1760  ;;  %v4325_v45 = vld [vmem:[%s4680_s8] sm:$0xff]  }
 0x406   : > { %v5093_v4 = vsub.f32 %v4969_v1, %v1776_v55  ;;  %v1777_v6 = vmul.f32 0.015625, %v1761_v0  ;;  %v1822_v8 = vsel %vm1069_vm1, %v1798_v63, 0.0  ;;  %v1799_v10 = vmul.f32 %v5087_v61, %v5087_v61  ;;  %4138 = vmatprep.subr.bf16.mxu0 %v4325_v45 }
 0x407   : > { %1823 = vadd.xlane.f32.xlu0 %v1822_v8  ;;  %v1764_v5 = vpop.xlane.xlu0 %1763  ;;  %4139 = vmatpush3.bf16.msra.mxu0 %v4325_v45 }
 0x408   : > { %v5099_v13 = vsub.f32 %v4975_v16, %v1777_v6  ;;  %v1778_v35 = vmul.f32 0.015625, %v1764_v5  ;;  %v1825_v17 = vsel %vm1069_vm1, %v1799_v10, 0.0  ;;  %v1800_v21 = vmul.f32 %v5093_v4, %v5093_v4 }
 0x409   : > { %1826 = vadd.xlane.f32.xlu1 %v1825_v17  ;;  %v1767_v1 = vpop.xlane.xlu1 %1766 }
 0x40a   : > { %v5105_v27 = vsub.f32 %v4973_v15, %v1778_v35  ;;  %v1779_v31 = vmul.f32 0.015625, %v1767_v1  ;;  %v1828_v11 = vsel %vm1069_vm1, %v1800_v21, 0.0  ;;  %v1801_v36 = vmul.f32 %v5099_v13, %v5099_v13  ;;  %v4326_v21 = vld [vmem:[%s4680_s8 + $0x8] sm:$0xff]  }
 0x40b   : > { %1829 = vadd.xlane.f32.xlu0 %v1828_v11  ;;  %4140 = vmatprep.subr.bf16.mxu0 %v4326_v21 }
 0x40c   : > { %v5111_v16 = vsub.f32 %v4979_v20, %v1779_v31  ;;  %v1831_v23 = vsel %vm1069_vm1, %v1801_v36, 0.0  ;;  %v1802_v39 = vmul.f32 %v5105_v27, %v5105_v27  ;;  %4141 = vmatpush3.bf16.msra.mxu0 %v4326_v21 }
 0x40d   : > { %v2241_v24 = vpop.xlane.xlu0 %2240  ;;  %1832 = vadd.xlane.f32.xlu1 %v1831_v23 }
 0x40e   : > { %v2275_v40 = vmul.f32 0.015625, %v2241_v24  ;;  %v1834_v15 = vsel %vm1069_vm1, %v1802_v39, 0.0  ;;  %v1803_v42 = vmul.f32 %v5111_v16, %v5111_v16 }
 0x40f   : > { %1835 = vadd.xlane.f32.xlu0 %v1834_v15  ;;  %v2244_v57 = vpop.xlane.xlu1 %2243  ;;  %v4327_v15 = vld [vmem:[%s4680_s8 + $0x10] sm:$0xff]  }
 0x410   : > { %v5120_v12 = vsub.f32 %v4992_v41, %v2275_v40  ;;  %v2276_v20 = vmul.f32 0.015625, %v2244_v57  ;;  %v1837_v59 = vsel %vm1069_vm1, %v1803_v42, 0.0  ;;  %4142 = vmatprep.subr.bf16.mxu0 %v4327_v15 }
 0x411   : > { %v2247_v48 = vpop.xlane.xlu0 %2246  ;;  %1838 = vadd.xlane.f32.xlu1 %v1837_v59  ;;  %4143 = vmatpush3.bf16.msra.mxu0 %v4327_v15 }
 0x412   : > { %v5124_v49 = vsub.f32 %v4996_v18, %v2276_v20  ;;  %v2277_v25 = vmul.f32 0.015625, %v2247_v48  ;;  %v2299_v50 = vmul.f32 %v5120_v12, %v5120_v12 }
 0x413   : > { %v2250_v51 = vpop.xlane.xlu1 %2249 }
 0x414   : > { %v5129_v46 = vsub.f32 %v4998_v44, %v2277_v25  ;;  %v2278_v19 = vmul.f32 0.015625, %v2250_v51  ;;  %v2311_v41 = vsel %vm1069_vm1, %v2299_v50, 0.0  ;;  %v2300_v52 = vmul.f32 %v5124_v49, %v5124_v49  ;;  %v4328_v51 = vld [vmem:[%s4680_s8 + $0x18] sm:$0xff]  }
 0x415   : > { %2312 = vadd.xlane.f32.xlu0 %v2311_v41  ;;  %v2253_v53 = vpop.xlane.xlu0 %2252  ;;  %4144 = vmatprep.subr.bf16.mxu0 %v4328_v51 }
 0x416   : > { %v5135_v18 = vsub.f32 %v5002_v47, %v2278_v19  ;;  %v2279_v28 = vmul.f32 0.015625, %v2253_v53  ;;  %v2314_v62 = vsel %vm1069_vm1, %v2300_v52, 0.0  ;;  %v2301_v26 = vmul.f32 %v5129_v46, %v5129_v46  ;;  %4145 = vmatpush3.bf16.msra.mxu0 %v4328_v51 }
 0x417   : > { %2315 = vadd.xlane.f32.xlu1 %v2314_v62  ;;  %v2256_v44 = vpop.xlane.xlu1 %2255  ;;  %v5197_v62 = vld [vmem:[%s4585_s3] sm:$0xff]  }
 0x418   : > { %v5141_v32 = vsub.f32 %v5012_v7, %v2279_v28  ;;  %v2280_v60 = vmul.f32 0.015625, %v2256_v44  ;;  %v2317_v3 = vsel %vm1069_vm1, %v2301_v26, 0.0  ;;  %v2302_v55 = vmul.f32 %v5135_v18, %v5135_v18  ;;  %4178 = vmatprep.subr.bf16.mxu0 %v5197_v62 }
 0x419   : > { %2318 = vadd.xlane.f32.xlu0 %v2317_v3  ;;  %v2259_v47 = vpop.xlane.xlu0 %2258 }
 0x41a   : > { %v5148_v63 = vsub.f32 %v5016_v54, %v2280_v60  ;;  %v2281_v0 = vmul.f32 0.015625, %v2259_v47  ;;  %v2320_v6 = vsel %vm1069_vm1, %v2302_v55, 0.0  ;;  %v2303_v7 = vmul.f32 %v5141_v32, %v5141_v32 }
 0x41b   : > { %2321 = vadd.xlane.f32.xlu1 %v2320_v6  ;;  %v2262_v8 = vpop.xlane.xlu1 %2261 }
 0x41c   : > { %v5154_v10 = vsub.f32 %v5018_v22, %v2281_v0  ;;  %v2282_v5 = vmul.f32 0.015625, %v2262_v8  ;;  %v2323_v35 = vsel %vm1069_vm1, %v2303_v7, 0.0  ;;  %v2304_v17 = vmul.f32 %v5148_v63, %v5148_v63 }
 0x41d   : > { %2324 = vadd.xlane.f32.xlu0 %v2323_v35  ;;  %v2265_v54 = vpop.xlane.xlu0 %2264 }
 0x41e   : > { %v5161_v1 = vsub.f32 %v5022_v30, %v2282_v5  ;;  %v2283_v31 = vmul.f32 0.015625, %v2265_v54  ;;  %v2326_v11 = vsel %vm1069_vm1, %v2304_v17, 0.0  ;;  %v2305_v22 = vmul.f32 %v5154_v10, %v5154_v10 }
 0x41f   : > { %2327 = vadd.xlane.f32.xlu1 %v2326_v11  ;;  %v2268_v36 = vpop.xlane.xlu1 %2267 }
 0x420   : > { %v5167_v23 = vsub.f32 %v5032_v9, %v2283_v31  ;;  %v2284_v39 = vmul.f32 0.015625, %v2268_v36  ;;  %v2329_v24 = vsel %vm1069_vm1, %v2305_v22, 0.0  ;;  %v2306_v40 = vmul.f32 %v5161_v1, %v5161_v1 }
 0x421   : > { %2330 = vadd.xlane.f32.xlu0 %v2329_v24  ;;  %v2271_v30 = vpop.xlane.xlu0 %2270  ;;  %v5201_v24 = vld [vmem:[%s4670_s30] ss:$0 sm:$0xff] }
 0x422   : > { %v5174_v42 = vsub.f32 %v5036_v33, %v2284_v39  ;;  %v2285_v57 = vmul.f32 0.015625, %v2271_v30  ;;  %v2332_v20 = vsel %vm1069_vm1, %v2306_v40, 0.0  ;;  %v2307_v9 = vmul.f32 %v5167_v23, %v5167_v23 }
 0x423   : > { %2333 = vadd.xlane.f32.xlu1 %v2332_v20  ;;  %v2274_v59 = vpop.xlane.xlu1 %2273 }
 0x424   : > { %v5180_v48 = vsub.f32 %v5038_v56, %v2285_v57  ;;  %v2286_v25 = vmul.f32 0.015625, %v2274_v59  ;;  %v2335_v50 = vsel %vm1069_vm1, %v2307_v9, 0.0  ;;  %v2308_v33 = vmul.f32 %v5174_v42, %v5174_v42  ;;  %v5205_v9 = vld [vmem:[%s5809_s28] ss:$0 sm:$0xff]  ;;  %s5815_s28 = sld [smem:[#allocation15_spill]] }
 0x425   : > { %2336 = vadd.xlane.f32.xlu0 %v2335_v50 }
 0x426   : > { %v5187_v19 = vsub.f32 %v5042_v14, %v2286_v25  ;;  %v2338_v41 = vsel %vm1069_vm1, %v2308_v33, 0.0  ;;  %v2309_v52 = vmul.f32 %v5180_v48, %v5180_v48 }
 0x427   : > { %2339 = vadd.xlane.f32.xlu1 %v2338_v41 }
 0x428   : > { %v2341_v56 = vsel %vm1069_vm1, %v2309_v52, 0.0  ;;  %v2310_v53 = vmul.f32 %v5187_v19, %v5187_v19 }
 0x429   : > { %2342 = vadd.xlane.f32.xlu0 %v2341_v56 }
 0x42a   : > { %v2344_v28 = vsel %vm1069_vm1, %v2310_v53, 0.0 }
 0x42b   : > { %2345 = vadd.xlane.f32.xlu1 %v2344_v28 }
 0x488   : > { %v1806_v14 = vpop.xlane.xlu0 %1805 }
 0x489   : > { %v1840_v26 = vmul.f32 0.015625, %v1806_v14 }
 0x48a   : > { %v1809_v44 = vpop.xlane.xlu1 %1808 }
 0x48b   : > { %v1852_v60 = vadd.f32 1e-05, %v1840_v26  ;;  %v1841_v3 = vmul.f32 0.015625, %v1809_v44 }
 0x48c   : > { %v1812_v55 = vpop.xlane.xlu0 %1811 }
 0x48d   : > { %4365 = vrsqrt.f32 %v1852_v60  ;;  %v1853_v47 = vadd.f32 1e-05, %v1841_v3  ;;  %v1842_v45 = vmul.f32 0.015625, %v1812_v55 }
 0x48e   : > { %v1815_v0 = vpop.xlane.xlu1 %1814 }
 0x48f   : > { %4367 = vrsqrt.f32 %v1853_v47  ;;  %v1854_v6 = vadd.f32 1e-05, %v1842_v45  ;;  %v1843_v7 = vmul.f32 0.015625, %v1815_v0 }
 0x490   : > { %v1818_v8 = vpop.xlane.xlu0 %1817 }
 0x491   : > { %4369 = vrsqrt.f32 %v1854_v6  ;;  %v1855_v5 = vadd.f32 1e-05, %v1843_v7  ;;  %v1844_v35 = vmul.f32 0.015625, %v1818_v8 }
 0x492   : > { %v1821_v17 = vpop.xlane.xlu1 %1820 }
 0x493   : > { %4371 = vrsqrt.f32 %v1855_v5  ;;  %v1856_v54 = vadd.f32 1e-05, %v1844_v35  ;;  %v1845_v21 = vmul.f32 0.015625, %v1821_v17 }
 0x494   : > { %v1824_v31 = vpop.xlane.xlu0 %1823 }
 0x495   : > { %4373 = vrsqrt.f32 %v1856_v54  ;;  %v1857_v11 = vadd.f32 1e-05, %v1845_v21  ;;  %v1846_v22 = vmul.f32 0.015625, %v1824_v31 }
 0x496   : > { %v1827_v36 = vpop.xlane.xlu1 %1826 }
 0x497   : > { %v4366_v39 = vpop.eup %4365  ;;  %4375 = vrsqrt.f32 %v1857_v11  ;;  %v1858_v40 = vadd.f32 1e-05, %v1846_v22  ;;  %v1847_v30 = vmul.f32 0.015625, %v1827_v36 }
 0x498   : > { %v1876_v15 = vmul.f32 %v4366_v39, %v5049_v34  ;;  %v1830_v57 = vpop.xlane.xlu0 %1829 }
 0x499   : > { %v4368_v20 = vpop.eup %4367  ;;  %4377 = vrsqrt.f32 %v1858_v40  ;;  %v1859_v59 = vadd.f32 1e-05, %v1847_v30  ;;  %v1848_v25 = vmul.f32 0.015625, %v1830_v57 }
 0x49a   : > { %v1877_v50 = vmul.f32 %v4368_v20, %v5052_v2  ;;  %v1833_v33 = vpop.xlane.xlu1 %1832  ;;  %v1894_v51 = vmul.f32 %v5201_v24, %v1876_v15 }
 0x49b   : > { %v4370_v41 = vpop.eup %4369  ;;  %4379 = vrsqrt.f32 %v1859_v59  ;;  %v1860_v52 = vadd.f32 1e-05, %v1848_v25  ;;  %v1849_v56 = vmul.f32 0.015625, %v1833_v33 }
 0x49c   : > { %v1878_v53 = vmul.f32 %v4370_v41, %v5057_v37  ;;  %v1836_v28 = vpop.xlane.xlu0 %1835  ;;  %v1895_v34 = vmul.f32 %v5201_v24, %v1877_v50  ;;  %v1912_v14 = vadd.f32 %v5205_v9, %v1894_v51 }
 0x49d   : > { %v4372_v26 = vpop.eup %4371  ;;  %4381 = vrsqrt.f32 %v1860_v52  ;;  %v1861_v44 = vadd.f32 1e-05, %v1849_v56  ;;  %v1850_v60 = vmul.f32 0.015625, %v1836_v28  ;;  %v4330_v52 = vld [vmem:[%s4585_s3 + $0x8] sm:$0xff]  }
 0x49e   : > { %v1896_v2 = vmul.f32 %v5201_v24, %v1878_v53  ;;  %v1879_v3 = vmul.f32 %v4372_v26, %v5063_v43  ;;  %v1839_v55 = vpop.xlane.xlu1 %1838  ;;  %v1913_v47 = vadd.f32 %v5205_v9, %v1895_v34  ;;  %v1924_v6 = vmax.f32 %v1912_v14, 0.0 }
 0x49f   : > { %v4374_v45 = vpop.eup %4373  ;;  %4383 = vrsqrt.f32 %v1861_v44  ;;  %v1862_v0 = vadd.f32 1e-05, %v1850_v60  ;;  %v1851_v37 = vmul.f32 0.015625, %v1839_v55 }
 0x4a0   : > { %v1914_v7 = vadd.f32 %v5205_v9, %v1896_v2  ;;  %v1897_v8 = vmul.f32 %v5201_v24, %v1879_v3  ;;  %v1880_v5 = vmul.f32 %v4374_v45, %v5069_v38  ;;  %v1925_v35 = vmax.f32 %v1913_v47, 0.0 }
 0x4a1   : > { %v4376_v17 = vpop.eup %4375  ;;  %4385 = vrsqrt.f32 %v1862_v0  ;;  %v1863_v54 = vadd.f32 1e-05, %v1851_v37  ;;  %v4331_v37 = vld [vmem:[%s4585_s3 + $0x10] sm:$0xff]  }
 0x4a2   : > { %v1915_v43 = vadd.f32 %v5205_v9, %v1897_v8  ;;  %v1881_v21 = vmul.f32 %v4376_v17, %v5075_v29  ;;  %v2313_v31 = vpop.xlane.xlu0 %2312  ;;  %v1936_v11 = vpack.c.bf16 %v1925_v35, %v1924_v6  ;;  %v1898_v39 = vmul.f32 %v5201_v24, %v1880_v5 }
 0x4a3   : > { %v4378_v22 = vpop.eup %4377  ;;  %4387 = vrsqrt.f32 %v1863_v54  ;;  %v2347_v36 = vmul.f32 0.015625, %v2313_v31  ;;  %v1926_v40 = vmax.f32 %v1914_v7, 0.0 }
 0x4a4   : > { %v1927_v30 = vmax.f32 %v1915_v43, 0.0  ;;  %v1882_v38 = vmul.f32 %v4378_v22, %v5081_v58  ;;  %4146 = vmatprep.mubr.msk.bf16.mxu0 %vm1069_vm1, %v1936_v11  ;;  %v2316_v15 = vpop.xlane.xlu1 %2315  ;;  %v1899_v57 = vmul.f32 %v5201_v24, %v1881_v21  ;;  %v1916_v25 = vadd.f32 %v5205_v9, %v1898_v39 }
 0x4a5   : > { %v4380_v20 = vpop.eup %4379  ;;  %v2359_v59 = vadd.f32 1e-05, %v2347_v36  ;;  %v2348_v29 = vmul.f32 0.015625, %v2316_v15 }
 0x4a6   : > { %v1883_v50 = vmul.f32 %v4380_v20, %v5087_v61  ;;  %v2319_v33 = vpop.xlane.xlu0 %2318  ;;  %v1937_v51 = vpack.c.bf16 %v1927_v30, %v1926_v40  ;;  %v1917_v41 = vadd.f32 %v5205_v9, %v1899_v57  ;;  %v1900_v56 = vmul.f32 %v5201_v24, %v1882_v38  ;;  %v4332_v30 = vld [vmem:[%s4585_s3 + $0x18] sm:$0xff]  }
 0x4a7   : > { %v4382_v58 = vpop.eup %4381  ;;  %4389 = vrsqrt.f32 %v2359_v59  ;;  %v2360_v53 = vadd.f32 1e-05, %v2348_v29  ;;  %v2349_v28 = vmul.f32 0.015625, %v2319_v33  ;;  %v1928_v34 = vmax.f32 %v1916_v25, 0.0 }
 0x4a8   : > { %v1884_v14 = vmul.f32 %v4382_v58, %v5093_v4  ;;  %4147 = vmatmul.mubr.msk.bf16.vlgmr.msra.gmra.mrb[12].mxu0 %vm1069_vm1, %v1937_v51  ;;  %v2322_v26 = vpop.xlane.xlu1 %2321  ;;  %v1929_v44 = vmax.f32 %v1917_v41, 0.0  ;;  %v1901_v61 = vmul.f32 %v5201_v24, %v1883_v50  ;;  %v1918_v60 = vadd.f32 %v5205_v9, %v1900_v56  ;;  %v5250_v50 = vld [vmem:[%s5810_s2] ss:$0 sm:$0xff]  ;;  %s5816_s2 = sld [smem:[#allocation13_spill]] }
 0x4a9   : > { %v4384_v2 = vpop.eup %4383  ;;  %4391 = vrsqrt.f32 %v2360_v53  ;;  %v2361_v3 = vadd.f32 1e-05, %v2349_v28  ;;  %v2350_v55 = vmul.f32 0.015625, %v2322_v26  ;;  %4179 = vmatpush3.bf16.msra.mxu0 %v5197_v62  ;;  %v5255_v28 = vld [vmem:[%s5811_s11] ss:$0 sm:$0xff]  ;;  %s5817_s11 = sld [smem:[#allocation9_spill]] }
 0x4aa   : > { %v1885_v47 = vmul.f32 %v4384_v2, %v5099_v13  ;;  %v2325_v45 = vpop.xlane.xlu0 %2324  ;;  %v1938_v0 = vpack.c.bf16 %v1929_v44, %v1928_v34  ;;  %4180 = vmatprep.subr.bf16.mxu0 %v4330_v52  ;;  %v1919_v4 = vadd.f32 %v5205_v9, %v1901_v61  ;;  %v1902_v5 = vmul.f32 %v5201_v24, %v1884_v14 }
 0x4ab   : > { %v4386_v6 = vpop.eup %4385  ;;  %4393 = vrsqrt.f32 %v2361_v3  ;;  %v2362_v7 = vadd.f32 1e-05, %v2350_v55  ;;  %v2351_v8 = vmul.f32 0.015625, %v2325_v45  ;;  %v1930_v62 = vmax.f32 %v1918_v60, 0.0 }
 0x4ac   : > { %v1886_v35 = vmul.f32 %v4386_v6, %v5105_v27  ;;  %4150 = vmatprep.mubr.msk.bf16.mxu0 %vm1069_vm1, %v1938_v0  ;;  %v2328_v17 = vpop.xlane.xlu1 %2327  ;;  %v1931_v13 = vmax.f32 %v1919_v4, 0.0  ;;  %v1903_v54 = vmul.f32 %v5201_v24, %v1885_v47  ;;  %v1920_v11 = vadd.f32 %v5205_v9, %v1902_v5 }
 0x4ad   : > { %v4388_v43 = vpop.eup %4387  ;;  %4395 = vrsqrt.f32 %v2362_v7  ;;  %v2363_v21 = vadd.f32 1e-05, %v2351_v8  ;;  %v2352_v31 = vmul.f32 0.015625, %v2328_v17  ;;  %4181 = vmatpush3.bf16.msra.mxu0 %v4330_v52 }
 0x4ae   : > { %v1887_v22 = vmul.f32 %v4388_v43, %v5111_v16  ;;  %v2331_v36 = vpop.xlane.xlu0 %2330  ;;  %v1939_v27 = vpack.c.bf16 %v1931_v13, %v1930_v62  ;;  %v1921_v39 = vadd.f32 %v5205_v9, %v1903_v54  ;;  %4182 = vmatprep.subr.bf16.mxu0 %v4331_v37  ;;  %v1904_v40 = vmul.f32 %v5201_v24, %v1886_v35 }
 0x4af   : > { %4397 = vrsqrt.f32 %v2363_v21  ;;  %v2364_v38 = vadd.f32 1e-05, %v2352_v31  ;;  %v2353_v15 = vmul.f32 0.015625, %v2331_v36  ;;  %v1932_v20 = vmax.f32 %v1920_v11, 0.0 }
 0x4b0   : > { %4151 = vmatmul.mubr.msk.bf16.gmra.mrb[16].mxu0 %vm1069_vm1, %v1939_v27  ;;  %v2334_v57 = vpop.xlane.xlu1 %2333  ;;  %v1933_v59 = vmax.f32 %v1921_v39, 0.0  ;;  %v1905_v16 = vmul.f32 %v5201_v24, %v1887_v22  ;;  %v1922_v29 = vadd.f32 %v5205_v9, %v1904_v40 }
 0x4b1   : > { %v4390_v25 = vpop.eup %4389  ;;  %4399 = vrsqrt.f32 %v2364_v38  ;;  %v2365_v33 = vadd.f32 1e-05, %v2353_v15  ;;  %v2354_v51 = vmul.f32 0.015625, %v2334_v57  ;;  %4183 = vmatpush3.bf16.msra.mxu0 %v4331_v37 }
 0x4b2   : > { %v2383_v41 = vmul.f32 %v4390_v25, %v5120_v12  ;;  %v2337_v52 = vpop.xlane.xlu0 %2336  ;;  %v1940_v56 = vpack.c.bf16 %v1933_v59, %v1932_v20  ;;  %v1923_v58 = vadd.f32 %v5205_v9, %v1905_v16  ;;  %4184 = vmatprep.subr.bf16.mxu0 %v4332_v30  ;;  %v1934_v44 = vmax.f32 %v1922_v29, 0.0 }
 0x4b3   : > { %v4392_v53 = vpop.eup %4391  ;;  %4401 = vrsqrt.f32 %v2365_v33  ;;  %v2366_v24 = vadd.f32 1e-05, %v2354_v51  ;;  %v2355_v34 = vmul.f32 0.015625, %v2337_v52 }
 0x4b4   : > { %v2384_v14 = vmul.f32 %v4392_v53, %v5124_v49  ;;  %4154 = vmatprep.mubr.msk.bf16.mxu0 %vm1069_vm1, %v1940_v56  ;;  %v2340_v26 = vpop.xlane.xlu1 %2339  ;;  %v1935_v61 = vmax.f32 %v1923_v58, 0.0  ;;  %v2401_v12 = vmul.f32 %v5250_v50, %v2383_v41 }
 0x4b5   : > { %v4394_v60 = vpop.eup %4393  ;;  %4403 = vrsqrt.f32 %v2366_v24  ;;  %v2367_v2 = vadd.f32 1e-05, %v2355_v34  ;;  %v2356_v9 = vmul.f32 0.015625, %v2340_v26  ;;  %4185 = vmatpush3.bf16.msra.mxu0 %v4332_v30 }
 0x4b6   : > { %v2385_v3 = vmul.f32 %v4394_v60, %v5129_v46  ;;  %v2343_v55 = vpop.xlane.xlu0 %2342  ;;  %v1941_v47 = vpack.c.bf16 %v1935_v61, %v1934_v44  ;;  %v2402_v45 = vmul.f32 %v5250_v50, %v2384_v14  ;;  %v2419_v49 = vadd.f32 %v5255_v28, %v2401_v12 }
 0x4b7   : > { %v4396_v0 = vpop.eup %4395  ;;  %4405 = vrsqrt.f32 %v2367_v2  ;;  %v2368_v4 = vadd.f32 1e-05, %v2356_v9  ;;  %v2357_v37 = vmul.f32 0.015625, %v2343_v55 }
 0x4b8   : > { %v2403_v6 = vmul.f32 %v5250_v50, %v2385_v3  ;;  %v2386_v7 = vmul.f32 %v4396_v0, %v5135_v18  ;;  %4155 = vmatmul.mubr.msk.bf16.gmra.mrb[20].mxu0 %vm1069_vm1, %v1941_v47  ;;  %v2346_v8 = vpop.xlane.xlu1 %2345  ;;  %v2420_v5 = vadd.f32 %v5255_v28, %v2402_v45  ;;  %v2431_v62 = vmax.f32 %v2419_v49, 0.0 }
 0x4b9   : > { %v4398_v46 = vpop.eup %4397  ;;  %4407 = vrsqrt.f32 %v2368_v4  ;;  %v2369_v35 = vadd.f32 1e-05, %v2357_v37  ;;  %v2358_v17 = vmul.f32 0.015625, %v2346_v8  ;;  %v3912_v4 = vld [vmem:[#allocation2] ss:$0 sm:$0xff] }
 0x4ba   : > { %v2421_v13 = vadd.f32 %v5255_v28, %v2403_v6  ;;  %v2404_v54 = vmul.f32 %v5250_v50, %v2386_v7  ;;  %v2387_v43 = vmul.f32 %v4398_v46, %v5141_v32  ;;  %v2432_v21 = vmax.f32 %v2420_v5, 0.0 }
 0x4bb   : > { %v4400_v31 = vpop.eup %4399  ;;  %4409 = vrsqrt.f32 %v2369_v35  ;;  %v2370_v18 = vadd.f32 1e-05, %v2358_v17 }
 0x4bc   : > { %v2422_v11 = vadd.f32 %v5255_v28, %v2404_v54  ;;  %v2388_v22 = vmul.f32 %v4400_v31, %v5148_v63  ;;  %v2443_v36 = vpack.c.bf16 %v2432_v21, %v2431_v62  ;;  %v2405_v39 = vmul.f32 %v5250_v50, %v2387_v43 }
 0x4bd   : > { %v4402_v27 = vpop.eup %4401  ;;  %4411 = vrsqrt.f32 %v2370_v18  ;;  %v2433_v40 = vmax.f32 %v2421_v13, 0.0 }
 0x4be   : > { %v2434_v30 = vmax.f32 %v2422_v11, 0.0  ;;  %v2389_v38 = vmul.f32 %v4402_v27, %v5154_v10  ;;  %4186 = vmatprep.mubr.msk.bf16.mxu0 %vm1069_vm1, %v2443_v36  ;;  %v2406_v32 = vmul.f32 %v5250_v50, %v2388_v22  ;;  %v2423_v57 = vadd.f32 %v5255_v28, %v2405_v39 }
 0x4bf   : > { %v4404_v15 = vpop.eup %4403 }
 0x4c0   : > { %v2390_v20 = vmul.f32 %v4404_v15, %v5161_v1  ;;  %v2444_v59 = vpack.c.bf16 %v2434_v30, %v2433_v40  ;;  %v2424_v63 = vadd.f32 %v5255_v28, %v2406_v32  ;;  %v2407_v16 = vmul.f32 %v5250_v50, %v2389_v38  ;;  %v3936_v38 = vld [vmem:[%s5812_s7] ss:$0 sm:$0xff]  ;;  %s5818_s7 = sld [smem:[#allocation10_spill]] }
 0x4c1   : > { %v4406_v29 = vpop.eup %4405  ;;  %v2435_v25 = vmax.f32 %v2423_v57, 0.0 }
 0x4c2   : > { %v2391_v33 = vmul.f32 %v4406_v29, %v5167_v23  ;;  %4187 = vmatmul.mubr.msk.bf16.vlgmr.msra.gmra.mrb[24].mxu0 %vm1069_vm1, %v2444_v59  ;;  %v2436_v10 = vmax.f32 %v2424_v63, 0.0  ;;  %v2408_v51 = vmul.f32 %v5250_v50, %v2390_v20  ;;  %v2425_v41 = vadd.f32 %v5255_v28, %v2407_v16 }
 0x4c3   : > { %v4408_v52 = vpop.eup %4407 }
 0x4c4   : > { %v2392_v56 = vmul.f32 %v4408_v52, %v5174_v42  ;;  %v2445_v1 = vpack.c.bf16 %v2436_v10, %v2435_v25  ;;  %v2426_v58 = vadd.f32 %v5255_v28, %v2408_v51  ;;  %v2409_v24 = vmul.f32 %v5250_v50, %v2391_v33 }
 0x4c5   : > { %v4410_v53 = vpop.eup %4409  ;;  %v2437_v23 = vmax.f32 %v2425_v41, 0.0 }
 0x4c6   : > { %v2393_v34 = vmul.f32 %v4410_v53, %v5180_v48  ;;  %4190 = vmatprep.mubr.msk.bf16.mxu0 %vm1069_vm1, %v2445_v1  ;;  %v2438_v14 = vmax.f32 %v2426_v58, 0.0  ;;  %v2410_v26 = vmul.f32 %v5250_v50, %v2392_v56  ;;  %v2427_v61 = vadd.f32 %v5255_v28, %v2409_v24 }
 0x4c7   : > { %v4412_v44 = vpop.eup %4411 }
 0x4c8   : > { %v2394_v12 = vmul.f32 %v4412_v44, %v5187_v19  ;;  %v2446_v42 = vpack.c.bf16 %v2438_v14, %v2437_v23  ;;  %v2428_v60 = vadd.f32 %v5255_v28, %v2410_v26  ;;  %v2411_v2 = vmul.f32 %v5250_v50, %v2393_v34 }
 0x4c9   : > { %v2439_v48 = vmax.f32 %v2427_v61, 0.0 }
 0x4ca   : > { %4191 = vmatmul.mubr.msk.bf16.gmra.mrb[28].mxu0 %vm1069_vm1, %v2446_v42  ;;  %v2440_v9 = vmax.f32 %v2428_v60, 0.0  ;;  %v2412_v3 = vmul.f32 %v5250_v50, %v2394_v12  ;;  %v2429_v55 = vadd.f32 %v5255_v28, %v2411_v2 }
 0x4cc   : > { %v2447_v47 = vpack.c.bf16 %v2440_v9, %v2439_v48  ;;  %v2430_v45 = vadd.f32 %v5255_v28, %v2412_v3  ;;  %v2441_v19 = vmax.f32 %v2429_v55, 0.0 }
 0x4ce   : > { %4194 = vmatprep.mubr.msk.bf16.mxu0 %vm1069_vm1, %v2447_v47  ;;  %v2442_v49 = vmax.f32 %v2430_v45, 0.0 }
 0x4d0   : > { %v2448_v0 = vpack.c.bf16 %v2442_v49, %v2441_v19 }
 0x4d2   : > { %4195 = vmatmul.mubr.msk.bf16.gmra.mrb[32].mxu0 %vm1069_vm1, %v2448_v0 }
 0x57b   : > { %v4148_v37 = vpop.f32.mrb[12].mxu0 }
 0x57c   : > { %v2042_v50 = vadd.f32 %v4148_v37, %v3912_v4  ;;  %v2033_v6 = vpop.f32.mrb[13].mxu0 }
 0x57d   : > { %v2034_v7 = vadd.f32 %v3912_v4, %v2033_v6  ;;  %v4149_v8 = vpop.f32.mrb[14].mxu0 }
 0x57e   : > { %2083 = vst.msk [vmem:[%s5305_s22 + $0x10] sm:$0xff] %vm2080_vm2, %v2042_v50  ;;  %v2045_v28 = vadd.f32 %v4149_v8, %v3912_v4  ;;  %v2036_v5 = vpop.f32.mrb[15].mxu0 }
 0x57f   : > { %2081 = vst.msk [vmem:[%s5305_s22] sm:$0xff] %vm2080_vm2, %v2034_v7  ;;  %v2037_v46 = vadd.f32 %v3912_v4, %v2036_v5 }
 0x580   : > { %2084 = vst.msk [vmem:[%s5305_s22 + $0x18] sm:$0xff] %vm2080_vm2, %v2045_v28 }
 0x581   : > { %2082 = vst.msk [vmem:[%s5305_s22 + $0x8] sm:$0xff] %vm2080_vm2, %v2037_v46 }
 0x583   : > { %v4152_v35 = vpop.f32.mrb[16].mxu0 }
 0x584   : > { %v2058_v17 = vadd.f32 %v4152_v35, %v3912_v4  ;;  %v2049_v62 = vpop.f32.mrb[17].mxu0 }
 0x585   : > { %v2050_v13 = vadd.f32 %v3912_v4, %v2049_v62  ;;  %v4153_v54 = vpop.f32.mrb[18].mxu0 }
 0x586   : > { %2087 = vst.msk [vmem:[%s5305_s22 + $0x30] sm:$0xff] %vm2080_vm2, %v2058_v17  ;;  %v2061_v43 = vadd.f32 %v4153_v54, %v3912_v4  ;;  %v2052_v21 = vpop.f32.mrb[19].mxu0  ;;  %v3949_v17 = vld [vmem:[%s5813_s26] ss:$0 sm:$0xff]  ;;  %s4541_s26 = smov 16  }
 0x587   : > { %2085 = vst.msk [vmem:[%s5305_s22 + $0x20] sm:$0xff] %vm2080_vm2, %v2050_v13  ;;  %v2053_v31 = vadd.f32 %v3912_v4, %v2052_v21 }
 0x588   : > { %2088 = vst.msk [vmem:[%s5305_s22 + $0x38] sm:$0xff] %vm2080_vm2, %v2061_v43 }
 0x589   : > { %2086 = vst.msk [vmem:[%s5305_s22 + $0x28] sm:$0xff] %vm2080_vm2, %v2053_v31 }
 0x58b   : > { %v4156_v18 = vpop.f32.mrb[20].mxu0 }
 0x58c   : > { %v2074_v11 = vadd.f32 %v4156_v18, %v3912_v4  ;;  %v2065_v22 = vpop.f32.mrb[21].mxu0 }
 0x58d   : > { %v2066_v36 = vadd.f32 %v3912_v4, %v2065_v22  ;;  %v4157_v27 = vpop.f32.mrb[22].mxu0 }
 0x58e   : > { %2091 = vst.msk [vmem:[%s5305_s22 + $0x50] sm:$0xff] %vm2080_vm2, %v2074_v11  ;;  %v2077_v39 = vadd.f32 %v4157_v27, %v3912_v4  ;;  %v2068_v40 = vpop.f32.mrb[23].mxu0 }
 0x58f   : > { %2089 = vst.msk [vmem:[%s5305_s22 + $0x40] sm:$0xff] %vm2080_vm2, %v2066_v36  ;;  %v2069_v30 = vadd.f32 %v3912_v4, %v2068_v40 }
 0x590   : > { %2092 = vst.msk [vmem:[%s5305_s22 + $0x58] sm:$0xff] %vm2080_vm2, %v2077_v39 }
 0x591   : > { %2090 = vst.msk [vmem:[%s5305_s22 + $0x48] sm:$0xff] %vm2080_vm2, %v2069_v30 }
 0x595   : > { %v4188_v32 = vpop.f32.mrb[24].mxu0 }
 0x596   : > { %v5332_v15 = vadd.f32 %v4188_v32, %v3936_v38  ;;  %v2540_v57 = vpop.f32.mrb[25].mxu0 }
 0x597   : > { %v5334_v20 = vadd.f32 %v3936_v38, %v2540_v57  ;;  %v4189_v59 = vpop.f32.mrb[26].mxu0 }
 0x598   : > { %2811 = vrot.lane.b32.xlu1 %v5332_v15, %s4540_s15  ;;  %v2543_v63 = vpop.f32.mrb[27].mxu0  ;;  %v5344_v25 = vadd.f32 %v4189_v59, %v3936_v38 }
 0x599   : > { %v5338_v16 = vadd.f32 %v3936_v38, %v2543_v63  ;;  %2807 = vrot.lane.b32.xlu0 %v5334_v20, %s4540_s15 }
 0x59c   : > { %2809 = vrot.lane.b32.xlu1 %v5338_v16, %s4540_s15 }
 0x59d   : > { %v4192_v29 = vpop.f32.mrb[28].mxu0 }
 0x59e   : > { %v2556_v33 = vpop.f32.mrb[29].mxu0  ;;  %v5354_v56 = vadd.f32 %v4192_v29, %v3936_v38 }
 0x59f   : > { %v5346_v10 = vadd.f32 %v3936_v38, %v2556_v33  ;;  %v4193_v51 = vpop.f32.mrb[30].mxu0 }
 0x5a0   : > { %2813 = vrot.lane.b32.xlu1 %v5344_v25, %s4540_s15  ;;  %v2559_v41 = vpop.f32.mrb[31].mxu0  ;;  %v5360_v58 = vadd.f32 %v4193_v51, %v3936_v38 }
 0x5a1   : > { %v5350_v52 = vadd.f32 %v3936_v38, %v2559_v41  ;;  %2815 = vrot.lane.b32.xlu0 %v5346_v10, %s4540_s15 }
 0x5a4   : > { %2817 = vrot.lane.b32.xlu1 %v5350_v52, %s4540_s15 }
 0x5a5   : > { %2819 = vrot.lane.b32.xlu0 %v5354_v56, %s4540_s15  ;;  %v4196_v1 = vpop.f32.mrb[32].mxu0 }
 0x5a6   : > { %v2572_v53 = vpop.f32.mrb[33].mxu0  ;;  %v5370_v26 = vadd.f32 %v4196_v1, %v3936_v38 }
 0x5a7   : > { %v5362_v24 = vadd.f32 %v3936_v38, %v2572_v53  ;;  %v4197_v34 = vpop.f32.mrb[34].mxu0 }
 0x5a8   : > { %2821 = vrot.lane.b32.xlu1 %v5360_v58, %s4540_s15  ;;  %v2575_v23 = vpop.f32.mrb[35].mxu0  ;;  %v5376_v44 = vadd.f32 %v4197_v34, %v3936_v38 }
 0x5a9   : > { %v5366_v14 = vadd.f32 %v3936_v38, %v2575_v23  ;;  %2823 = vrot.lane.b32.xlu0 %v5362_v24, %s4540_s15 }
 0x5ac   : > { %2825 = vrot.lane.b32.xlu1 %v5366_v14, %s4540_s15 }
 0x5ad   : > { %2827 = vrot.lane.b32.xlu0 %v5370_v26, %s4540_s15 }
 0x5b0   : > { %2829 = vrot.lane.b32.xlu1 %v5376_v44, %s4540_s15 }
 0x60a   : > { %v2812_v61 = vpop.permute.xlu1 %2811 }
 0x60b   : > { %v2808_v12 = vpop.permute.xlu0 %2807  ;;  %v2849_v48 = vsel %vm1069_vm1, %v2812_v61, 0.0 }
 0x60c   : > { %v2843_v42 = vsel %vm1069_vm1, %v2808_v12, 0.0 }
 0x60d   : > { %2844 = vadd.xlane.f32.xlu0 %v2843_v42 }
 0x60e   : > { %v2810_v60 = vpop.permute.xlu1 %2809 }
 0x60f   : > { %v2846_v2 = vsel %vm1069_vm1, %v2810_v60, 0.0 }
 0x610   : > { %2847 = vadd.xlane.f32.xlu1 %v2846_v2 }
 0x611   : > { %2850 = vadd.xlane.f32.xlu0 %v2849_v48 }
 0x612   : > { %v2814_v9 = vpop.permute.xlu1 %2813 }
 0x613   : > { %v2816_v3 = vpop.permute.xlu0 %2815  ;;  %v2852_v55 = vsel %vm1069_vm1, %v2814_v9, 0.0 }
 0x614   : > { %v2855_v49 = vsel %vm1069_vm1, %v2816_v3, 0.0 }
 0x615   : > { %2853 = vadd.xlane.f32.xlu0 %v2852_v55 }
 0x616   : > { %v2818_v47 = vpop.permute.xlu1 %2817 }
 0x617   : > { %v2820_v45 = vpop.permute.xlu0 %2819  ;;  %v2858_v19 = vsel %vm1069_vm1, %v2818_v47, 0.0 }
 0x618   : > { %2859 = vadd.xlane.f32.xlu1 %v2858_v19  ;;  %v2861_v50 = vsel %vm1069_vm1, %v2820_v45, 0.0 }
 0x619   : > { %2856 = vadd.xlane.f32.xlu0 %v2855_v49 }
 0x61a   : > { %v2822_v0 = vpop.permute.xlu1 %2821 }
 0x61b   : > { %v2824_v4 = vpop.permute.xlu0 %2823  ;;  %v2864_v37 = vsel %vm1069_vm1, %v2822_v0, 0.0 }
 0x61c   : > { %2865 = vadd.xlane.f32.xlu1 %v2864_v37  ;;  %v2867_v8 = vsel %vm1069_vm1, %v2824_v4, 0.0 }
 0x61d   : > { %2862 = vadd.xlane.f32.xlu0 %v2861_v50 }
 0x61e   : > { %v2826_v6 = vpop.permute.xlu1 %2825 }
 0x61f   : > { %v2870_v7 = vsel %vm1069_vm1, %v2826_v6, 0.0  ;;  %v2828_v28 = vpop.permute.xlu0 %2827 }
 0x620   : > { %2871 = vadd.xlane.f32.xlu1 %v2870_v7  ;;  %v2873_v35 = vsel %vm1069_vm1, %v2828_v28, 0.0 }
 0x621   : > { %2868 = vadd.xlane.f32.xlu0 %v2867_v8 }
 0x622   : > { %v2830_v5 = vpop.permute.xlu1 %2829 }
 0x623   : > { %v2876_v46 = vsel %vm1069_vm1, %v2830_v5, 0.0 }
 0x624   : > { %2877 = vadd.xlane.f32.xlu1 %v2876_v46 }
 0x625   : > { %2874 = vadd.xlane.f32.xlu0 %v2873_v35 }
 0x63b   : > { %3052 = vrot.lane.b32.xlu0 %v3949_v17, %s4540_s15 }
 0x69a   : > { %v2845_v62 = vpop.xlane.xlu0 %2844 }
 0x69b   : > { %v2879_v13 = vmul.f32 0.015625, %v2845_v62 }
 0x69d   : > { %v5395_v54 = vsub.f32 %v5334_v20, %v2879_v13  ;;  %v2848_v18 = vpop.xlane.xlu1 %2847 }
 0x69e   : > { %v2851_v43 = vpop.xlane.xlu0 %2850  ;;  %v2880_v36 = vmul.f32 0.015625, %v2848_v18 }
 0x69f   : > { %v2903_v21 = vmul.f32 %v5395_v54, %v5395_v54  ;;  %v2881_v31 = vmul.f32 0.015625, %v2851_v43 }
 0x6a0   : > { %v5410_v32 = vsub.f32 %v5338_v16, %v2880_v36 }
 0x6a1   : > { %v5400_v11 = vsub.f32 %v5332_v15, %v2881_v31  ;;  %2927 = vrot.lane.b32.xlu0 %v2903_v21, %s4540_s15 }
 0x6a2   : > { %v2854_v22 = vpop.xlane.xlu0 %2853  ;;  %v2904_v51 = vmul.f32 %v5410_v32, %v5410_v32 }
 0x6a3   : > { %v2882_v27 = vmul.f32 0.015625, %v2854_v22  ;;  %v2905_v39 = vmul.f32 %v5400_v11, %v5400_v11 }
 0x6a5   : > { %v5406_v40 = vsub.f32 %v5344_v25, %v2882_v27  ;;  %2931 = vrot.lane.b32.xlu1 %v2905_v39, %s4540_s15  ;;  %v2860_v30 = vpop.xlane.xlu1 %2859 }
 0x6a6   : > { %v2857_v38 = vpop.xlane.xlu0 %2856  ;;  %v2884_v63 = vmul.f32 0.015625, %v2860_v30 }
 0x6a7   : > { %v2906_v57 = vmul.f32 %v5406_v40, %v5406_v40  ;;  %v2883_v41 = vmul.f32 0.015625, %v2857_v38 }
 0x6a8   : > { %v5425_v61 = vsub.f32 %v5350_v52, %v2884_v63 }
 0x6a9   : > { %2933 = vrot.lane.b32.xlu1 %v2906_v57, %s4540_s15  ;;  %v2866_v59 = vpop.xlane.xlu1 %2865  ;;  %v5430_v60 = vsub.f32 %v5346_v10, %v2883_v41 }
 0x6aa   : > { %v2886_v29 = vmul.f32 0.015625, %v2866_v59  ;;  %v2863_v33 = vpop.xlane.xlu0 %2862  ;;  %v2908_v9 = vmul.f32 %v5425_v61, %v5425_v61 }
 0x6ab   : > { %v2885_v1 = vmul.f32 0.015625, %v2863_v33  ;;  %v2907_v47 = vmul.f32 %v5430_v60, %v5430_v60 }
 0x6ac   : > { %v5418_v53 = vsub.f32 %v5360_v58, %v2886_v29 }
 0x6ad   : > { %v5421_v34 = vsub.f32 %v5354_v56, %v2885_v1  ;;  %2929 = vrot.lane.b32.xlu1 %v2904_v51, %s4540_s15  ;;  %v2872_v23 = vpop.xlane.xlu1 %2871 }
 0x6ae   : > { %v2910_v12 = vmul.f32 %v5418_v53, %v5418_v53  ;;  %v2869_v42 = vpop.xlane.xlu0 %2868  ;;  %v2888_v45 = vmul.f32 0.015625, %v2872_v23 }
 0x6af   : > { %v2909_v2 = vmul.f32 %v5421_v34, %v5421_v34  ;;  %v2887_v19 = vmul.f32 0.015625, %v2869_v42  ;;  %v2595_v42 = vsel %vm1069_vm1, %v5332_v15, 0.0 }
 0x6b0   : > { %v5451_v50 = vsub.f32 %v5366_v14, %v2888_v45  ;;  %v2598_v45 = vsel %vm1069_vm1, %v5344_v25, 0.0 }
 0x6b1   : > { %2939 = vrot.lane.b32.xlu0 %v2909_v2, %s4540_s15  ;;  %2941 = vrot.lane.b32.xlu1 %v2910_v12, %s4540_s15  ;;  %v2878_v48 = vpop.xlane.xlu1 %2877  ;;  %v5454_v6 = vsub.f32 %v5362_v24, %v2887_v19  ;;  %v2592_v12 = vsel %vm1069_vm1, %v5338_v16, 0.0  ;;  %v2601_v2 = vsel %vm1069_vm1, %v5346_v10, 0.0  ;;  %v2604_v19 = vsel %vm1069_vm1, %v5350_v52, 0.0 }
 0x6b2   : > { %v2890_v3 = vmul.f32 0.015625, %v2878_v48  ;;  %v2875_v55 = vpop.xlane.xlu0 %2874  ;;  %v2912_v8 = vmul.f32 %v5451_v50, %v5451_v50  ;;  %v3950_v48 = vld [vmem:[%s5814_s1] ss:$0 sm:$0xff]  ;;  %s5820_s1 = sld [smem:[#allocation14_spill]] }
 0x6b3   : > { %v2889_v49 = vmul.f32 0.015625, %v2875_v55  ;;  %v2911_v28 = vmul.f32 %v5454_v6, %v5454_v6  ;;  %v2619_v55 = vsel %vm1069_vm1, %v5370_v26, 0.0 }
 0x6b4   : > { %v5441_v0 = vsub.f32 %v5376_v44, %v2890_v3  ;;  %v2613_v3 = vsel %vm1069_vm1, %v5362_v24, 0.0 }
 0x6b5   : > { %v5444_v4 = vsub.f32 %v5370_v26, %v2889_v49  ;;  %2935 = vrot.lane.b32.xlu0 %v2907_v47, %s4540_s15  ;;  %2937 = vrot.lane.b32.xlu1 %v2908_v9, %s4540_s15  ;;  %v2607_v9 = vsel %vm1069_vm1, %v5354_v56, 0.0  ;;  %v2589_v47 = vsel %vm1069_vm1, %v5334_v20, 0.0  ;;  %v2610_v49 = vsel %vm1069_vm1, %v5360_v58, 0.0 }
 0x6b6   : > { %v2914_v37 = vmul.f32 %v5441_v0, %v5441_v0  ;;  %v5466_v5 = vpop.permute.xlu0 %3052 }
 0x6b7   : > { %v2913_v7 = vmul.f32 %v5444_v4, %v5444_v4 }
 0x6b9   : > { %2947 = vrot.lane.b32.xlu0 %v2913_v7, %s4540_s15  ;;  %2949 = vrot.lane.b32.xlu1 %v2914_v37, %s4540_s15  ;;  %v2616_v37 = vsel %vm1069_vm1, %v5366_v14, 0.0  ;;  %v2622_v7 = vsel %vm1069_vm1, %v5376_v44, 0.0 }
 0x6bd   : > { %2943 = vrot.lane.b32.xlu0 %v2911_v28, %s4540_s15  ;;  %2945 = vrot.lane.b32.xlu1 %v2912_v8, %s4540_s15  ;;  %v4333_v8 = vld [vmem:[%s5815_s28] sm:$0xff]  }
 0x6be   : > { %4218 = vmatprep.subr.bf16.mxu0 %v4333_v8 }
 0x6bf   : > { %4219 = vmatpush3.bf16.msra.mxu0 %v4333_v8 }
 0x713   : > { %v2928_v17 = vpop.permute.xlu0 %2927 }
 0x714   : > { %v2963_v13 = vsel %vm1069_vm1, %v2928_v17, 0.0 }
 0x717   : > { %v2932_v46 = vpop.permute.xlu1 %2931 }
 0x718   : > { %v2969_v35 = vsel %vm1069_vm1, %v2932_v46, 0.0 }
 0x719   : > { %2970 = vadd.xlane.f32.xlu0 %v2969_v35 }
 0x71b   : > { %v2934_v62 = vpop.permute.xlu1 %2933 }
 0x71c   : > { %v2972_v21 = vsel %vm1069_vm1, %v2934_v62, 0.0 }
 0x71d   : > { %2964 = vadd.xlane.f32.xlu0 %v2963_v13 }
 0x71f   : > { %v2930_v43 = vpop.permute.xlu1 %2929 }
 0x720   : > { %v2966_v31 = vsel %vm1069_vm1, %v2930_v43, 0.0 }
 0x721   : > { %2973 = vadd.xlane.f32.xlu0 %v2972_v21  ;;  %2967 = vadd.xlane.f32.xlu1 %v2966_v31 }
 0x723   : > { %v2940_v18 = vpop.permute.xlu0 %2939  ;;  %v2942_v22 = vpop.permute.xlu1 %2941 }
 0x724   : > { %v2981_v36 = vsel %vm1069_vm1, %v2940_v18, 0.0  ;;  %v2984_v27 = vsel %vm1069_vm1, %v2942_v22, 0.0  ;;  %v4334_v22 = vld [vmem:[%s5815_s28 + $0x8] sm:$0xff]  }
 0x725   : > { %2982 = vadd.xlane.f32.xlu0 %v2981_v36  ;;  %2985 = vadd.xlane.f32.xlu1 %v2984_v27 }
 0x726   : > { %4220 = vmatprep.subr.bf16.mxu0 %v4334_v22 }
 0x727   : > { %v2936_v39 = vpop.permute.xlu0 %2935  ;;  %v2938_v30 = vpop.permute.xlu1 %2937  ;;  %4221 = vmatpush3.bf16.msra.mxu0 %v4334_v22 }
 0x728   : > { %v2975_v38 = vsel %vm1069_vm1, %v2936_v39, 0.0  ;;  %v2978_v57 = vsel %vm1069_vm1, %v2938_v30, 0.0 }
 0x729   : > { %2976 = vadd.xlane.f32.xlu0 %v2975_v38  ;;  %2979 = vadd.xlane.f32.xlu1 %v2978_v57 }
 0x72b   : > { %v2948_v59 = vpop.permute.xlu0 %2947  ;;  %v2950_v63 = vpop.permute.xlu1 %2949 }
 0x72c   : > { %v2993_v29 = vsel %vm1069_vm1, %v2948_v59, 0.0  ;;  %v2996_v33 = vsel %vm1069_vm1, %v2950_v63, 0.0  ;;  %v4335_v59 = vld [vmem:[%s5815_s28 + $0x10] sm:$0xff]  }
 0x72d   : > { %2994 = vadd.xlane.f32.xlu0 %v2993_v29  ;;  %2997 = vadd.xlane.f32.xlu1 %v2996_v33 }
 0x72e   : > { %4222 = vmatprep.subr.bf16.mxu0 %v4335_v59 }
 0x72f   : > { %v2944_v51 = vpop.permute.xlu0 %2943  ;;  %v2946_v41 = vpop.permute.xlu1 %2945  ;;  %4223 = vmatpush3.bf16.msra.mxu0 %v4335_v59 }
 0x730   : > { %v2987_v1 = vsel %vm1069_vm1, %v2944_v51, 0.0  ;;  %v2990_v23 = vsel %vm1069_vm1, %v2946_v41, 0.0 }
 0x731   : > { %2988 = vadd.xlane.f32.xlu0 %v2987_v1  ;;  %2991 = vadd.xlane.f32.xlu1 %v2990_v23  ;;  %v4336_v23 = vld [vmem:[%s5815_s28 + $0x18] sm:$0xff]  }
 0x732   : > { %4224 = vmatprep.subr.bf16.mxu0 %v4336_v23 }
 0x733   : > { %4225 = vmatpush3.bf16.msra.mxu0 %v4336_v23 }
 0x735   : > { %2593 = vadd.xlane.f32.xlu0 %v2592_v12 }
 0x739   : > { %2596 = vadd.xlane.f32.xlu0 %v2595_v42 }
 0x73d   : > { %2602 = vadd.xlane.f32.xlu0 %v2601_v2 }
 0x741   : > { %2608 = vadd.xlane.f32.xlu0 %v2607_v9 }
 0x742   : > { %3072 = vrot.lane.b32.xlu1 %v3950_v48, %s4540_s15 }
 0x745   : > { %2614 = vadd.xlane.f32.xlu0 %v2613_v3 }
 0x749   : > { %2620 = vadd.xlane.f32.xlu0 %v2619_v55 }
 0x766   : > { %2590 = vadd.xlane.f32.xlu1 %v2589_v47 }
 0x76a   : > { %2599 = vadd.xlane.f32.xlu1 %v2598_v45 }
 0x76e   : > { %2605 = vadd.xlane.f32.xlu1 %v2604_v19 }
 0x772   : > { %2611 = vadd.xlane.f32.xlu1 %v2610_v49 }
 0x776   : > { %2617 = vadd.xlane.f32.xlu1 %v2616_v37 }
 0x77a   : > { %2623 = vadd.xlane.f32.xlu1 %v2622_v7 }
 0x7a6   : > { %v2971_v28 = vpop.xlane.xlu0 %2970 }
 0x7a7   : > { %v3001_v46 = vmul.f32 0.015625, %v2971_v28 }
 0x7a9   : > { %v3013_v62 = vadd.f32 1e-05, %v3001_v46 }
 0x7aa   : > { %v2965_v35 = vpop.xlane.xlu0 %2964 }
 0x7ab   : > { %v2999_v17 = vmul.f32 0.015625, %v2965_v35  ;;  %4413 = vrsqrt.f32 %v3013_v62 }
 0x7ad   : > { %v3011_v13 = vadd.f32 1e-05, %v2999_v17 }
 0x7ae   : > { %v2974_v43 = vpop.xlane.xlu0 %2973  ;;  %v2968_v21 = vpop.xlane.xlu1 %2967 }
 0x7af   : > { %v3002_v31 = vmul.f32 0.015625, %v2974_v43  ;;  %v3000_v18 = vmul.f32 0.015625, %v2968_v21  ;;  %4415 = vrsqrt.f32 %v3011_v13 }
 0x7b1   : > { %v3014_v36 = vadd.f32 1e-05, %v3002_v31  ;;  %v3012_v27 = vadd.f32 1e-05, %v3000_v18 }
 0x7b2   : > { %v2983_v39 = vpop.xlane.xlu0 %2982  ;;  %v2986_v30 = vpop.xlane.xlu1 %2985 }
 0x7b3   : > { %4417 = vrsqrt.f32 %v3014_v36  ;;  %v3005_v38 = vmul.f32 0.015625, %v2983_v39  ;;  %v3006_v57 = vmul.f32 0.015625, %v2986_v30 }
 0x7b4   : > { %4419 = vrsqrt.f32 %v3012_v27 }
 0x7b5   : > { %v3017_v63 = vadd.f32 1e-05, %v3005_v38  ;;  %v3018_v29 = vadd.f32 1e-05, %v3006_v57  ;;  %v4414_v2 = vpop.eup %4413 }
 0x7b6   : > { %v2977_v33 = vpop.xlane.xlu0 %2976  ;;  %v2980_v51 = vpop.xlane.xlu1 %2979  ;;  %v3037_v19 = vmul.f32 %v4414_v2, %v5400_v11 }
 0x7b7   : > { %4421 = vrsqrt.f32 %v3017_v63  ;;  %v3003_v41 = vmul.f32 0.015625, %v2977_v33  ;;  %v3004_v1 = vmul.f32 0.015625, %v2980_v51 }
 0x7b8   : > { %4423 = vrsqrt.f32 %v3018_v29  ;;  %v3057_v13 = vmul.f32 %v5466_v5, %v3037_v19 }
 0x7b9   : > { %v3015_v12 = vadd.f32 1e-05, %v3003_v41  ;;  %v3016_v42 = vadd.f32 1e-05, %v3004_v1  ;;  %v4416_v3 = vpop.eup %4415 }
 0x7ba   : > { %v2995_v48 = vpop.xlane.xlu0 %2994  ;;  %v2998_v9 = vpop.xlane.xlu1 %2997  ;;  %v3035_v8 = vmul.f32 %v4416_v3, %v5395_v54 }
 0x7bb   : > { %4425 = vrsqrt.f32 %v3015_v12  ;;  %v3009_v55 = vmul.f32 0.015625, %v2995_v48  ;;  %v3010_v47 = vmul.f32 0.015625, %v2998_v9 }
 0x7bc   : > { %4427 = vrsqrt.f32 %v3016_v42  ;;  %v3055_v54 = vmul.f32 %v5466_v5, %v3035_v8 }
 0x7bd   : > { %v4418_v45 = vpop.eup %4417  ;;  %v3021_v49 = vadd.f32 1e-05, %v3009_v55  ;;  %v3022_v37 = vadd.f32 1e-05, %v3010_v47 }
 0x7be   : > { %v4420_v7 = vpop.eup %4419  ;;  %v3038_v28 = vmul.f32 %v4418_v45, %v5406_v40  ;;  %v2992_v46 = vpop.xlane.xlu1 %2991 }
 0x7bf   : > { %v3036_v35 = vmul.f32 %v4420_v7, %v5410_v32  ;;  %4429 = vrsqrt.f32 %v3021_v49 }
 0x7c0   : > { %4431 = vrsqrt.f32 %v3022_v37  ;;  %v3058_v17 = vmul.f32 %v5466_v5, %v3038_v28 }
 0x7c1   : > { %v4422_v62 = vpop.eup %4421  ;;  %v3056_v43 = vmul.f32 %v5466_v5, %v3036_v35 }
 0x7c2   : > { %v4424_v11 = vpop.eup %4423  ;;  %v3041_v21 = vmul.f32 %v4422_v62, %v5421_v34  ;;  %v5518_v31 = vpop.permute.xlu1 %3072 }
 0x7c3   : > { %v3042_v40 = vmul.f32 %v4424_v11, %v5418_v53  ;;  %v3077_v32 = vadd.f32 %v5518_v31, %v3057_v13  ;;  %v3078_v18 = vadd.f32 %v5518_v31, %v3058_v17  ;;  %v3075_v22 = vadd.f32 %v5518_v31, %v3055_v54  ;;  %v2989_v17 = vpop.xlane.xlu0 %2988 }
 0x7c4   : > { %v3076_v36 = vadd.f32 %v5518_v31, %v3056_v43  ;;  %v3061_v30 = vmul.f32 %v5466_v5, %v3041_v21  ;;  %v3007_v62 = vmul.f32 0.015625, %v2989_v17  ;;  %v3008_v13 = vmul.f32 0.015625, %v2992_v46 }
 0x7c5   : > { %v4426_v27 = vpop.eup %4425  ;;  %v3089_v39 = vmax.f32 %v3077_v32, 0.0  ;;  %v3090_v57 = vmax.f32 %v3078_v18, 0.0  ;;  %v3087_v59 = vmax.f32 %v3075_v22, 0.0  ;;  %v3062_v29 = vmul.f32 %v5466_v5, %v3042_v40 }
 0x7c6   : > { %v4428_v38 = vpop.eup %4427  ;;  %v3039_v34 = vmul.f32 %v4426_v27, %v5430_v60  ;;  %v3088_v63 = vmax.f32 %v3076_v36, 0.0  ;;  %v3019_v43 = vadd.f32 1e-05, %v3007_v62  ;;  %v3020_v21 = vadd.f32 1e-05, %v3008_v13 }
 0x7c7   : > { %v3040_v53 = vmul.f32 %v4428_v38, %v5425_v61  ;;  %v3244_v33 = vpack.c.bf16 %v3090_v57, %v3089_v39  ;;  %v3081_v61 = vadd.f32 %v5518_v31, %v3061_v30  ;;  %v3082_v9 = vadd.f32 %v5518_v31, %v3062_v29  ;;  %v2594_v11 = vpop.xlane.xlu0 %2593 }
 0x7c8   : > { %v3243_v51 = vpack.c.bf16 %v3088_v63, %v3087_v59  ;;  %v3059_v41 = vmul.f32 %v5466_v5, %v3039_v34  ;;  %v2626_v54 = vmul.f32 0.015625, %v2594_v11  ;;  %4433 = vrsqrt.f32 %v3019_v43 }
 0x7c9   : > { %v4430_v1 = vpop.eup %4429  ;;  %v3060_v23 = vmul.f32 %v5466_v5, %v3040_v53  ;;  %3272 = vrot.lane.b32.xlu1 %v3244_v33, %s4540_s15  ;;  %v3093_v45 = vmax.f32 %v3081_v61, 0.0  ;;  %v3094_v49 = vmax.f32 %v3082_v9, 0.0  ;;  %4435 = vrsqrt.f32 %v3020_v21 }
 0x7ca   : > { %v4432_v12 = vpop.eup %4431  ;;  %v3045_v42 = vmul.f32 %v4430_v1, %v5444_v4  ;;  %3270 = vrot.lane.b32.xlu0 %v3243_v51, %s4540_s15  ;;  %v3079_v60 = vadd.f32 %v5518_v31, %v3059_v41  ;;  %v5548_v32 = vsub.f32 %v5338_v16, %v2626_v54 }
 0x7cb   : > { %v3046_v2 = vmul.f32 %v4432_v12, %v5441_v0  ;;  %v3080_v48 = vadd.f32 %v5518_v31, %v3060_v23  ;;  %v3246_v0 = vpack.c.bf16 %v3094_v49, %v3093_v45 }
 0x7cc   : > { %v3091_v3 = vmax.f32 %v3079_v60, 0.0  ;;  %v3065_v55 = vmul.f32 %v5466_v5, %v3045_v42  ;;  %v2650_v46 = vmul.f32 %v5548_v32, %v5548_v32 }
 0x7cd   : > { %v3092_v47 = vmax.f32 %v3080_v48, 0.0  ;;  %v3066_v4 = vmul.f32 %v5466_v5, %v3046_v2 }
 0x7ce   : > { %v3085_v37 = vadd.f32 %v5518_v31, %v3065_v55  ;;  %v2664_v16 = vsel %vm1069_vm1, %v2650_v46, 0.0 }
 0x7cf   : > { %v3245_v19 = vpack.c.bf16 %v3092_v47, %v3091_v3  ;;  %v3086_v7 = vadd.f32 %v5518_v31, %v3066_v4 }
 0x7d0   : > { %v3097_v8 = vmax.f32 %v3085_v37, 0.0 }
 0x7d1   : > { %3274 = vrot.lane.b32.xlu1 %v3245_v19, %s4540_s15  ;;  %v3098_v28 = vmax.f32 %v3086_v7, 0.0 }
 0x7d2   : > { %v4434_v30 = vpop.eup %4433 }
 0x7d3   : > { %v3248_v35 = vpack.c.bf16 %v3098_v28, %v3097_v8  ;;  %v4436_v34 = vpop.eup %4435  ;;  %v3043_v59 = vmul.f32 %v4434_v30, %v5454_v6 }
 0x7d4   : > { %v3044_v63 = vmul.f32 %v4436_v34, %v5451_v50 }
 0x7d5   : > { %3276 = vrot.lane.b32.xlu1 %v3246_v0, %s4540_s15  ;;  %v3063_v23 = vmul.f32 %v5466_v5, %v3043_v59  ;;  %v4339_v59 = vld [vmem:[%s5816_s2 + $0x10] sm:$0xff]  }
 0x7d7   : > { %v3083_v60 = vadd.f32 %v5518_v31, %v3063_v23 }
 0x7d9   : > { %3280 = vrot.lane.b32.xlu1 %v3248_v35, %s4540_s15 }
 0x7f3   : > { %v2591_v40 = vpop.xlane.xlu1 %2590 }
 0x7f4   : > { %v2625_v18 = vmul.f32 0.015625, %v2591_v40 }
 0x7f6   : > { %v5551_v22 = vsub.f32 %v5334_v20, %v2625_v18 }
 0x7f7   : > { %v2600_v36 = vpop.xlane.xlu1 %2599 }
 0x7f8   : > { %v2649_v27 = vmul.f32 %v5551_v22, %v5551_v22  ;;  %v2628_v49 = vmul.f32 0.015625, %v2600_v36 }
 0x7fa   : > { %v2661_v39 = vsel %vm1069_vm1, %v2649_v27, 0.0  ;;  %v5594_v0 = vsub.f32 %v5344_v25, %v2628_v49 }
 0x7fb   : > { %2662 = vadd.xlane.f32.xlu0 %v2661_v39  ;;  %v2606_v38 = vpop.xlane.xlu1 %2605 }
 0x7fc   : > { %v2630_v57 = vmul.f32 0.015625, %v2606_v38 }
 0x7fd   : > { %2665 = vadd.xlane.f32.xlu1 %v2664_v16  ;;  %v4338_v16 = vld [vmem:[%s5816_s2 + $0x8] sm:$0xff]  }
 0x7fe   : > { %v5560_v20 = vsub.f32 %v5350_v52, %v2630_v57  ;;  %v3064_v52 = vmul.f32 %v5466_v5, %v3044_v63  ;;  %v4337_v57 = vld [vmem:[%s5816_s2] sm:$0xff]   ;;  %v4340_v63 = vld [vmem:[%s5816_s2 + $0x18] sm:$0xff]  }
 0x7ff   : > { %v2612_v53 = vpop.xlane.xlu1 %2611  ;;  %4198 = vmatprep.subr.bf16.mxu1 %v4337_v57 }
 0x800   : > { %v2632_v29 = vmul.f32 0.015625, %v2612_v53  ;;  %v2654_v33 = vmul.f32 %v5560_v20, %v5560_v20  ;;  %v3084_v61 = vadd.f32 %v5518_v31, %v3064_v52  ;;  %v2597_v31 = vpop.xlane.xlu0 %2596  ;;  %4199 = vmatpush3.bf16.msra.mxu1 %v4337_v57 }
 0x801   : > { %v2627_v19 = vmul.f32 0.015625, %v2597_v31  ;;  %4200 = vmatprep.subr.bf16.mxu1 %v4338_v16 }
 0x802   : > { %v5567_v51 = vsub.f32 %v5360_v58, %v2632_v29  ;;  %v2676_v41 = vsel %vm1069_vm1, %v2654_v33, 0.0  ;;  %v3096_v3 = vmax.f32 %v3084_v61, 0.0  ;;  %v5641_v61 = vld [vmem:[%s5818_s7] ss:$0 sm:$0xff] }
 0x803   : > { %2677 = vadd.xlane.f32.xlu1 %v2676_v41  ;;  %v2618_v1 = vpop.xlane.xlu1 %2617 }
 0x804   : > { %v2634_v12 = vmul.f32 0.015625, %v2618_v1  ;;  %v2656_v50 = vmul.f32 %v5567_v51, %v5567_v51  ;;  %v2603_v45 = vpop.xlane.xlu0 %2602  ;;  %4201 = vmatpush3.bf16.msra.mxu1 %v4338_v16 }
 0x805   : > { %v2629_v7 = vmul.f32 0.015625, %v2603_v45  ;;  %4202 = vmatprep.subr.bf16.mxu1 %v4339_v59 }
 0x806   : > { %v5575_v6 = vsub.f32 %v5366_v14, %v2634_v12  ;;  %v2682_v42 = vsel %vm1069_vm1, %v2656_v50, 0.0  ;;  %v3095_v14 = vmax.f32 %v3083_v60, 0.0 }
 0x807   : > { %2683 = vadd.xlane.f32.xlu1 %v2682_v42  ;;  %v2624_v58 = vpop.xlane.xlu1 %2623  ;;  %v5599_v35 = vsub.f32 %v5346_v10, %v2629_v7  ;;  %v5637_v42 = vld [vmem:[%s5817_s11] ss:$0 sm:$0xff]  ;;  %s5714_s11 = scalar_lea.vmem [#allocation4], %s5302_s16  ;;  %s3992_s16 = sshll.u32 (%p4726_p5), %s4711_s0, 4 }
 0x808   : > { %v2636_v2 = vmul.f32 0.015625, %v2624_v58  ;;  %v2658_v48 = vmul.f32 %v5575_v6, %v5575_v6  ;;  %v3247_v4 = vpack.c.bf16 %v3096_v3, %v3095_v14  ;;  %v2609_v37 = vpop.xlane.xlu0 %2608  ;;  %4203 = vmatpush3.bf16.msra.mxu1 %v4339_v59  ;;  %s3576_s7 = scalar_lea.vmem (%p4726_p5), %s4688_s25, %s3992_s16 }
 0x809   : > { %v2631_v17 = vmul.f32 0.015625, %v2609_v37  ;;  %v2653_v11 = vmul.f32 %v5599_v35, %v5599_v35  ;;  %4204 = vmatprep.subr.bf16.mxu1 %v4340_v63 }
 0x80a   : > { %v5583_v5 = vsub.f32 %v5376_v44, %v2636_v2  ;;  %v2688_v9 = vsel %vm1069_vm1, %v2658_v48, 0.0  ;;  %v5591_v44 = vsub.f32 %v5332_v15, %v2627_v19  ;;  %v2652_v15 = vmul.f32 %v5594_v0, %v5594_v0 }
 0x80b   : > { %2689 = vadd.xlane.f32.xlu1 %v2688_v9  ;;  %v5605_v13 = vsub.f32 %v5354_v56, %v2631_v17  ;;  %v2673_v40 = vsel %vm1069_vm1, %v2653_v11, 0.0 }
 0x80c   : > { %v2660_v55 = vmul.f32 %v5583_v5, %v5583_v5  ;;  %v2651_v8 = vmul.f32 %v5591_v44, %v5591_v44  ;;  %v2615_v28 = vpop.xlane.xlu0 %2614  ;;  %v2670_v25 = vsel %vm1069_vm1, %v2652_v15, 0.0  ;;  %4205 = vmatpush3.bf16.msra.mxu1 %v4340_v63 }
 0x80d   : > { %v2633_v43 = vmul.f32 0.015625, %v2615_v28  ;;  %v2655_v18 = vmul.f32 %v5605_v13, %v5605_v13 }
 0x80e   : > { %v2694_v47 = vsel %vm1069_vm1, %v2660_v55, 0.0  ;;  %v2667_v62 = vsel %vm1069_vm1, %v2651_v8, 0.0 }
 0x80f   : > { %2695 = vadd.xlane.f32.xlu1 %v2694_v47  ;;  %v5611_v10 = vsub.f32 %v5362_v24, %v2633_v43  ;;  %v2679_v36 = vsel %vm1069_vm1, %v2655_v18, 0.0 }
 0x810   : > { %v2621_v21 = vpop.xlane.xlu0 %2620 }
 0x811   : > { %3278 = vrot.lane.b32.xlu0 %v3247_v4, %s4540_s15  ;;  %v2635_v54 = vmul.f32 0.015625, %v2621_v21  ;;  %v2657_v27 = vmul.f32 %v5611_v10, %v5611_v10  ;;  %s5819_s15 = sld [smem:[#allocation16_spill]] }
 0x813   : > { %v5617_v56 = vsub.f32 %v5370_v26, %v2635_v54  ;;  %v2685_v24 = vsel %vm1069_vm1, %v2657_v27, 0.0 }
 0x815   : > { %v2659_v26 = vmul.f32 %v5617_v56, %v5617_v56 }
 0x817   : > { %v2691_v38 = vsel %vm1069_vm1, %v2659_v26, 0.0 }
 0x830   : > { %2668 = vadd.xlane.f32.xlu0 %v2667_v62 }
 0x834   : > { %2671 = vadd.xlane.f32.xlu0 %v2670_v25 }
 0x838   : > { %2674 = vadd.xlane.f32.xlu0 %v2673_v40 }
 0x83b   : > { %v3273_v39 = vpop.permute.xlu1 %3272 }
 0x83c   : > { %v3271_v46 = vpop.permute.xlu0 %3270  ;;  %2680 = vadd.xlane.f32.xlu0 %v2679_v36 }
 0x83d   : > { %4226 = vmatprep.mubr.msk.bf16.mxu0 %vm1069_vm1, %v3271_v46 }
 0x83e   : > { %4227 = vmatmul.mubr.msk.bf16.vlgmr.msra.gmra.mrb[36].mxu0 %vm1069_vm1, %v3273_v39 }
 0x840   : > { %2686 = vadd.xlane.f32.xlu0 %v2685_v24 }
 0x843   : > { %v3275_v30 = vpop.permute.xlu1 %3274 }
 0x844   : > { %4230 = vmatprep.mubr.msk.bf16.mxu0 %vm1069_vm1, %v3275_v30  ;;  %2692 = vadd.xlane.f32.xlu0 %v2691_v38 }
 0x847   : > { %v3277_v34 = vpop.permute.xlu1 %3276 }
 0x848   : > { %4231 = vmatmul.mubr.msk.bf16.gmra.mrb[40].mxu0 %vm1069_vm1, %v3277_v34 }
 0x84b   : > { %v3281_v53 = vpop.permute.xlu1 %3280 }
 0x888   : > { %v2663_v29 = vpop.xlane.xlu0 %2662 }
 0x889   : > { %v2697_v33 = vmul.f32 0.015625, %v2663_v29 }
 0x88a   : > { %v2666_v41 = vpop.xlane.xlu1 %2665 }
 0x88b   : > { %v2709_v1 = vadd.f32 1e-05, %v2697_v33  ;;  %v2698_v23 = vmul.f32 0.015625, %v2666_v41 }
 0x88c   : > { %v3279_v52 = vpop.permute.xlu0 %3278 }
 0x88d   : > { %4437 = vrsqrt.f32 %v2709_v1  ;;  %v2710_v12 = vadd.f32 1e-05, %v2698_v23  ;;  %4234 = vmatprep.mubr.msk.bf16.mxu0 %vm1069_vm1, %v3279_v52 }
 0x88e   : > { %4235 = vmatmul.mubr.msk.bf16.gmra.mrb[44].mxu0 %vm1069_vm1, %v3281_v53 }
 0x88f   : > { %4439 = vrsqrt.f32 %v2710_v12 }
 0x890   : > { %v2678_v31 = vpop.xlane.xlu1 %2677 }
 0x891   : > { %v2702_v45 = vmul.f32 0.015625, %v2678_v31 }
 0x893   : > { %v2714_v49 = vadd.f32 1e-05, %v2702_v45 }
 0x895   : > { %4441 = vrsqrt.f32 %v2714_v49 }
 0x897   : > { %v4438_v50 = vpop.eup %4437 }
 0x898   : > { %v2733_v58 = vmul.f32 %v4438_v50, %v5551_v22  ;;  %v2684_v22 = vpop.xlane.xlu1 %2683 }
 0x899   : > { %v4440_v60 = vpop.eup %4439  ;;  %v2704_v37 = vmul.f32 0.015625, %v2684_v22 }
 0x89a   : > { %v2734_v2 = vmul.f32 %v4440_v60, %v5548_v32  ;;  %v2751_v48 = vmul.f32 %v5637_v42, %v2733_v58 }
 0x89b   : > { %v2716_v28 = vadd.f32 1e-05, %v2704_v37 }
 0x89c   : > { %v2752_v9 = vmul.f32 %v5637_v42, %v2734_v2  ;;  %v2769_v14 = vadd.f32 %v5641_v61, %v2751_v48  ;;  %v2690_v19 = vpop.xlane.xlu1 %2689 }
 0x89d   : > { %v2706_v17 = vmul.f32 0.015625, %v2690_v19 }
 0x89e   : > { %v2770_v3 = vadd.f32 %v5641_v61, %v2752_v9  ;;  %v2781_v55 = vmax.f32 %v2769_v14, 0.0 }
 0x89f   : > { %v2718_v11 = vadd.f32 1e-05, %v2706_v17  ;;  %v4442_v39 = vpop.eup %4441 }
 0x8a0   : > { %v2782_v47 = vmax.f32 %v2770_v3, 0.0  ;;  %v2696_v15 = vpop.xlane.xlu1 %2695  ;;  %v2738_v34 = vmul.f32 %v4442_v39, %v5560_v20 }
 0x8a1   : > { %v2708_v21 = vmul.f32 0.015625, %v2696_v15 }
 0x8a2   : > { %v3099_v4 = vpack.c.bf16 %v2782_v47, %v2781_v55  ;;  %v2756_v23 = vmul.f32 %v5637_v42, %v2738_v34 }
 0x8a3   : > { %v2720_v36 = vadd.f32 1e-05, %v2708_v21 }
 0x8a4   : > { %4206 = vmatprep.mubr.msk.bf16.mxu1 %vm1069_vm1, %v3099_v4 }
 0x8bd   : > { %v2669_v32 = vpop.xlane.xlu0 %2668 }
 0x8be   : > { %v2699_v7 = vmul.f32 0.015625, %v2669_v32 }
 0x8c0   : > { %v2711_v8 = vadd.f32 1e-05, %v2699_v7 }
 0x8c1   : > { %v2672_v62 = vpop.xlane.xlu0 %2671 }
 0x8c2   : > { %4443 = vrsqrt.f32 %v2711_v8  ;;  %v2700_v43 = vmul.f32 0.015625, %v2672_v62 }
 0x8c3   : > { %4445 = vrsqrt.f32 %v2716_v28 }
 0x8c4   : > { %v2712_v25 = vadd.f32 1e-05, %v2700_v43 }
 0x8c5   : > { %v2675_v54 = vpop.xlane.xlu0 %2674 }
 0x8c6   : > { %4447 = vrsqrt.f32 %v2712_v25  ;;  %v2701_v40 = vmul.f32 0.015625, %v2675_v54 }
 0x8c7   : > { %4449 = vrsqrt.f32 %v2718_v11 }
 0x8c8   : > { %v2713_v18 = vadd.f32 1e-05, %v2701_v40 }
 0x8c9   : > { %v2681_v27 = vpop.xlane.xlu0 %2680 }
 0x8ca   : > { %4451 = vrsqrt.f32 %v2713_v18  ;;  %v2703_v46 = vmul.f32 0.015625, %v2681_v27 }
 0x8cb   : > { %4453 = vrsqrt.f32 %v2720_v36 }
 0x8cc   : > { %v4444_v24 = vpop.eup %4443  ;;  %v2715_v26 = vadd.f32 1e-05, %v2703_v46 }
 0x8cd   : > { %v2735_v30 = vmul.f32 %v4444_v24, %v5591_v44  ;;  %v2687_v38 = vpop.xlane.xlu0 %2686  ;;  %v4446_v16 = vpop.eup %4445 }
 0x8ce   : > { %4455 = vrsqrt.f32 %v2715_v26  ;;  %v2705_v57 = vmul.f32 0.015625, %v2687_v38  ;;  %v2740_v41 = vmul.f32 %v4446_v16, %v5567_v51 }
 0x8cf   : > { %v2753_v59 = vmul.f32 %v5637_v42, %v2735_v30 }
 0x8d0   : > { %v4448_v63 = vpop.eup %4447  ;;  %v2717_v53 = vadd.f32 1e-05, %v2705_v57  ;;  %v2758_v51 = vmul.f32 %v5637_v42, %v2740_v41 }
 0x8d1   : > { %v2736_v29 = vmul.f32 %v4448_v63, %v5594_v0  ;;  %v2693_v33 = vpop.xlane.xlu0 %2692  ;;  %v4450_v44 = vpop.eup %4449  ;;  %v2771_v52 = vadd.f32 %v5641_v61, %v2753_v59  ;;  %v2774_v0 = vadd.f32 %v5641_v61, %v2756_v23 }
 0x8d2   : > { %4457 = vrsqrt.f32 %v2717_v53  ;;  %v2707_v1 = vmul.f32 0.015625, %v2693_v33  ;;  %v2742_v48 = vmul.f32 %v4450_v44, %v5575_v6 }
 0x8d3   : > { %v2754_v20 = vmul.f32 %v5637_v42, %v2736_v29  ;;  %v2783_v9 = vmax.f32 %v2771_v52, 0.0  ;;  %v2786_v22 = vmax.f32 %v2774_v0, 0.0 }
 0x8d4   : > { %v4452_v12 = vpop.eup %4451  ;;  %v2719_v50 = vadd.f32 1e-05, %v2707_v1  ;;  %v2760_v49 = vmul.f32 %v5637_v42, %v2742_v48 }
 0x8d5   : > { %v2772_v58 = vadd.f32 %v5641_v61, %v2754_v20  ;;  %v2737_v60 = vmul.f32 %v4452_v12, %v5599_v35  ;;  %v4454_v2 = vpop.eup %4453  ;;  %v2776_v35 = vadd.f32 %v5641_v61, %v2758_v51 }
 0x8d6   : > { %4459 = vrsqrt.f32 %v2719_v50  ;;  %v2744_v45 = vmul.f32 %v4454_v2, %v5583_v5  ;;  %v2778_v5 = vadd.f32 %v5641_v61, %v2760_v49 }
 0x8d7   : > { %v2784_v14 = vmax.f32 %v2772_v58, 0.0  ;;  %v2755_v3 = vmul.f32 %v5637_v42, %v2737_v60  ;;  %v2788_v8 = vmax.f32 %v2776_v35, 0.0 }
 0x8d8   : > { %v4456_v55 = vpop.eup %4455  ;;  %v2762_v62 = vmul.f32 %v5637_v42, %v2744_v45  ;;  %v2790_v21 = vmax.f32 %v2778_v5, 0.0 }
 0x8d9   : > { %v2739_v47 = vmul.f32 %v4456_v55, %v5605_v13  ;;  %v3100_v4 = vpack.c.bf16 %v2784_v14, %v2783_v9  ;;  %v2773_v31 = vadd.f32 %v5641_v61, %v2755_v3 }
 0x8da   : > { %v2780_v40 = vadd.f32 %v5641_v61, %v2762_v62 }
 0x8db   : > { %4207 = vmatmul.mubr.msk.bf16.vlgmr.msra.gmra.mrb[32].mxu1 %vm1069_vm1, %v3100_v4  ;;  %v2785_v19 = vmax.f32 %v2773_v31, 0.0  ;;  %v2757_v6 = vmul.f32 %v5637_v42, %v2739_v47 }
 0x8dc   : > { %v4458_v37 = vpop.eup %4457  ;;  %v2792_v46 = vmax.f32 %v2780_v40, 0.0 }
 0x8dd   : > { %v2741_v32 = vmul.f32 %v4458_v37, %v5611_v10  ;;  %v3101_v7 = vpack.c.bf16 %v2786_v22, %v2785_v19  ;;  %v2775_v13 = vadd.f32 %v5641_v61, %v2757_v6 }
 0x8df   : > { %4210 = vmatprep.mubr.msk.bf16.mxu1 %vm1069_vm1, %v3101_v7  ;;  %v2787_v28 = vmax.f32 %v2775_v13, 0.0  ;;  %v2759_v17 = vmul.f32 %v5637_v42, %v2741_v32 }
 0x8e0   : > { %v4460_v15 = vpop.eup %4459 }
 0x8e1   : > { %v2743_v43 = vmul.f32 %v4460_v15, %v5617_v56  ;;  %v3102_v25 = vpack.c.bf16 %v2788_v8, %v2787_v28  ;;  %v2777_v10 = vadd.f32 %v5641_v61, %v2759_v17  ;;  %v5685_v56 = vld [vmem:[%s5819_s15] ss:$0 sm:$0xff] }
 0x8e3   : > { %4211 = vmatmul.mubr.msk.bf16.gmra.mrb[36].mxu1 %vm1069_vm1, %v3102_v25  ;;  %v2789_v11 = vmax.f32 %v2777_v10, 0.0  ;;  %v2761_v54 = vmul.f32 %v5637_v42, %v2743_v43 }
 0x8e5   : > { %v3103_v18 = vpack.c.bf16 %v2790_v21, %v2789_v11  ;;  %v2779_v36 = vadd.f32 %v5641_v61, %v2761_v54 }
 0x8e7   : > { %4214 = vmatprep.mubr.msk.bf16.mxu1 %vm1069_vm1, %v3103_v18  ;;  %v2791_v27 = vmax.f32 %v2779_v36, 0.0 }
 0x8e9   : > { %v3104_v39 = vpack.c.bf16 %v2792_v46, %v2791_v27 }
 0x8eb   : > { %4215 = vmatmul.mubr.msk.bf16.gmra.mrb[40].mxu1 %vm1069_vm1, %v3104_v39 }
 0x911   : > { %v4228_v24 = vpop.f32.mrb[36].mxu0 }
 0x912   : > { %v3367_v26 = vadd.f32 %v4228_v24, %v5685_v56  ;;  %v3358_v30 = vpop.f32.mrb[37].mxu0 }
 0x913   : > { %v3359_v42 = vadd.f32 %v5685_v56, %v3358_v30  ;;  %v4229_v38 = vpop.f32.mrb[38].mxu0 }
 0x914   : > { %v3419_v34 = vmin.f32 %v3367_v26, 0.0  ;;  %v3370_v57 = vadd.f32 %v4229_v38, %v5685_v56  ;;  %v3361_v61 = vpop.f32.mrb[39].mxu0  ;;  %vm3407_vm3 = vcmp.gt.f32.partialorder %v3367_v26, 0.0 }
 0x915   : > { %v3417_v16 = vmin.f32 %v3359_v42, 0.0  ;;  %v3362_v59 = vadd.f32 %v5685_v56, %v3361_v61  ;;  %vm3405_vm4 = vcmp.gt.f32.partialorder %v3359_v42, 0.0 }
 0x916   : > { %v3433_v63 = vmul.f32 1.442695, %v3419_v34  ;;  %v3420_v53 = vmin.f32 %v3370_v57, 0.0  ;;  %vm3408_vm5 = vcmp.gt.f32.partialorder %v3370_v57, 0.0 }
 0x917   : > { %v3429_v29 = vmul.f32 1.442695, %v3417_v16  ;;  %v3418_v33 = vmin.f32 %v3362_v59, 0.0  ;;  %vm3406_vm6 = vcmp.gt.f32.partialorder %v3362_v59, 0.0 }
 0x918   : > { %4461 = vpow2.f32 %v3433_v63  ;;  %v3435_v41 = vmul.f32 1.442695, %v3420_v53 }
 0x919   : > { %4463 = vpow2.f32 %v3429_v29  ;;  %v3431_v1 = vmul.f32 1.442695, %v3418_v33 }
 0x91a   : > { %4465 = vpow2.f32 %v3435_v41 }
 0x91b   : > { %4467 = vpow2.f32 %v3431_v1  ;;  %v4232_v23 = vpop.f32.mrb[40].mxu0 }
 0x91c   : > { %v3383_v44 = vadd.f32 %v4232_v23, %v5685_v56  ;;  %v3374_v52 = vpop.f32.mrb[41].mxu0 }
 0x91d   : > { %v3375_v20 = vadd.f32 %v5685_v56, %v3374_v52  ;;  %v4233_v12 = vpop.f32.mrb[42].mxu0 }
 0x91e   : > { %v3423_v50 = vmin.f32 %v3383_v44, 0.0  ;;  %v3386_v58 = vadd.f32 %v4233_v12, %v5685_v56  ;;  %v3377_v60 = vpop.f32.mrb[43].mxu0  ;;  %vm3411_vm7 = vcmp.gt.f32.partialorder %v3383_v44, 0.0 }
 0x91f   : > { %v3421_v0 = vmin.f32 %v3375_v20, 0.0  ;;  %v3378_v51 = vadd.f32 %v5685_v56, %v3377_v60  ;;  %vm3409_vm8 = vcmp.gt.f32.partialorder %v3375_v20, 0.0 }
 0x920   : > { %v3441_v2 = vmul.f32 1.442695, %v3423_v50  ;;  %v3424_v48 = vmin.f32 %v3386_v58, 0.0  ;;  %vm3412_vm9 = vcmp.gt.f32.partialorder %v3386_v58, 0.0 }
 0x921   : > { %v3437_v9 = vmul.f32 1.442695, %v3421_v0  ;;  %v3422_v14 = vmin.f32 %v3378_v51, 0.0  ;;  %vm3410_vm10 = vcmp.gt.f32.partialorder %v3378_v51, 0.0 }
 0x922   : > { %v4462_v3 = vpop.eup %4461  ;;  %4469 = vpow2.f32 %v3441_v2  ;;  %v3443_v55 = vmul.f32 1.442695, %v3424_v48 }
 0x923   : > { %v4464_v47 = vpop.eup %4463  ;;  %v3975_v4 = vadd.f32 -1.0, %v4462_v3  ;;  %4471 = vpow2.f32 %v3437_v9  ;;  %v3439_v31 = vmul.f32 1.442695, %v3422_v14 }
 0x924   : > { %v4466_v22 = vpop.eup %4465  ;;  %v3973_v35 = vadd.f32 -1.0, %v4464_v47  ;;  %4473 = vpow2.f32 %v3443_v55 }
 0x925   : > { %v4468_v45 = vpop.eup %4467  ;;  %v3467_v19 = vsel %vm3407_vm3, %v3367_v26, %v3975_v4  ;;  %v3976_v6 = vadd.f32 -1.0, %v4466_v22  ;;  %4475 = vpow2.f32 %v3439_v31  ;;  %v3951_v31 = vld [vmem:[%s5820_s1] ss:$0 sm:$0xff] }
 0x926   : > { %v3479_v49 = vadd.f32 1.001, %v3467_v19  ;;  %v3465_v37 = vsel %vm3405_vm4, %v3359_v42, %v3973_v35  ;;  %v3974_v13 = vadd.f32 -1.0, %v4468_v45 }
 0x927   : > { %v3477_v32 = vadd.f32 1.001, %v3465_v37  ;;  %v3468_v7 = vsel %vm3408_vm5, %v3370_v57, %v3976_v6 }
 0x928   : > { %3505 = vrot.lane.b32.xlu1 %v3479_v49, %s4541_s26  ;;  %v3480_v8 = vadd.f32 1.001, %v3468_v7  ;;  %v3466_v28 = vsel %vm3406_vm6, %v3362_v59, %v3974_v13 }
 0x929   : > { %3501 = vrot.lane.b32.xlu0 %v3477_v32, %s4541_s26  ;;  %v3478_v43 = vadd.f32 1.001, %v3466_v28 }
 0x92c   : > { %v4470_v17 = vpop.eup %4469  ;;  %3507 = vrot.lane.b32.xlu1 %v3480_v8, %s4541_s26 }
 0x92d   : > { %v4472_v5 = vpop.eup %4471  ;;  %v3979_v62 = vadd.f32 -1.0, %v4470_v17 }
 0x92e   : > { %v4474_v15 = vpop.eup %4473  ;;  %v3977_v25 = vadd.f32 -1.0, %v4472_v5 }
 0x92f   : > { %v4476_v10 = vpop.eup %4475  ;;  %v3471_v11 = vsel %vm3411_vm7, %v3383_v44, %v3979_v62  ;;  %v3980_v21 = vadd.f32 -1.0, %v4474_v15 }
 0x930   : > { %v3483_v54 = vadd.f32 1.001, %v3471_v11  ;;  %v3978_v40 = vadd.f32 -1.0, %v4476_v10  ;;  %3503 = vrot.lane.b32.xlu1 %v3478_v43, %s4541_s26  ;;  %v3469_v18 = vsel %vm3409_vm8, %v3375_v20, %v3977_v25 }
 0x931   : > { %v3472_v36 = vsel %vm3412_vm9, %v3386_v58, %v3980_v21  ;;  %v3481_v39 = vadd.f32 1.001, %v3469_v18 }
 0x932   : > { %v3484_v27 = vadd.f32 1.001, %v3472_v36  ;;  %3513 = vrot.lane.b32.xlu0 %v3483_v54, %s4541_s26  ;;  %v3470_v46 = vsel %vm3410_vm10, %v3378_v51, %v3978_v40 }
 0x933   : > { %v3482_v24 = vadd.f32 1.001, %v3470_v46 }
 0x934   : > { %3515 = vrot.lane.b32.xlu1 %v3484_v27, %s4541_s26 }
 0x936   : > { %3509 = vrot.lane.b32.xlu0 %v3481_v39, %s4541_s26 }
 0x938   : > { %3511 = vrot.lane.b32.xlu1 %v3482_v24, %s4541_s26 }
 0x961   : > { %v4236_v26 = vpop.f32.mrb[44].mxu0 }
 0x962   : > { %v3399_v30 = vadd.f32 %v4236_v26, %v5685_v56  ;;  %v3390_v42 = vpop.f32.mrb[45].mxu0 }
 0x963   : > { %v3391_v38 = vadd.f32 %v5685_v56, %v3390_v42  ;;  %v4237_v34 = vpop.f32.mrb[46].mxu0 }
 0x964   : > { %v3427_v57 = vmin.f32 %v3399_v30, 0.0  ;;  %v3402_v61 = vadd.f32 %v4237_v34, %v5685_v56  ;;  %v3393_v16 = vpop.f32.mrb[47].mxu0  ;;  %vm3415_vm12 = vcmp.gt.f32.partialorder %v3399_v30, 0.0 }
 0x965   : > { %v3425_v59 = vmin.f32 %v3391_v38, 0.0  ;;  %v3394_v63 = vadd.f32 %v5685_v56, %v3393_v16  ;;  %vm3413_vm11 = vcmp.gt.f32.partialorder %v3391_v38, 0.0 }
 0x966   : > { %v3449_v53 = vmul.f32 1.442695, %v3427_v57  ;;  %v3428_v29 = vmin.f32 %v3402_v61, 0.0  ;;  %vm3416_vm14 = vcmp.gt.f32.partialorder %v3402_v61, 0.0 }
 0x967   : > { %v3445_v33 = vmul.f32 1.442695, %v3425_v59  ;;  %v3426_v41 = vmin.f32 %v3394_v63, 0.0  ;;  %vm3414_vm13 = vcmp.gt.f32.partialorder %v3394_v63, 0.0 }
 0x968   : > { %4477 = vpow2.f32 %v3449_v53  ;;  %v3451_v1 = vmul.f32 1.442695, %v3428_v29 }
 0x969   : > { %4479 = vpow2.f32 %v3445_v33  ;;  %v3447_v23 = vmul.f32 1.442695, %v3426_v41 }
 0x96a   : > { %4481 = vpow2.f32 %v3451_v1 }
 0x96b   : > { %4483 = vpow2.f32 %v3447_v23 }
 0x972   : > { %v4478_v44 = vpop.eup %4477 }
 0x973   : > { %v4480_v52 = vpop.eup %4479  ;;  %v3983_v12 = vadd.f32 -1.0, %v4478_v44 }
 0x974   : > { %v4482_v20 = vpop.eup %4481  ;;  %v3981_v50 = vadd.f32 -1.0, %v4480_v52 }
 0x975   : > { %v4484_v58 = vpop.eup %4483  ;;  %v3984_v0 = vadd.f32 -1.0, %v4482_v20  ;;  %v3475_v2 = vsel %vm3415_vm12, %v3399_v30, %v3983_v12 }
 0x976   : > { %v3473_v60 = vsel %vm3413_vm11, %v3391_v38, %v3981_v50  ;;  %v3982_v56 = vadd.f32 -1.0, %v4484_v58  ;;  %v3487_v3 = vadd.f32 1.001, %v3475_v2 }
 0x977   : > { %v3485_v51 = vadd.f32 1.001, %v3473_v60  ;;  %v3476_v14 = vsel %vm3416_vm14, %v3402_v61, %v3984_v0 }
 0x978   : > { %v3474_v48 = vsel %vm3414_vm13, %v3394_v63, %v3982_v56  ;;  %v3488_v55 = vadd.f32 1.001, %v3476_v14 }
 0x979   : > { %v3486_v9 = vadd.f32 1.001, %v3474_v48  ;;  %3517 = vrot.lane.b32.xlu0 %v3485_v51, %s4541_s26 }
 0x97b   : > { %3519 = vrot.lane.b32.xlu1 %v3486_v9, %s4541_s26 }
 0x97d   : > { %3521 = vrot.lane.b32.xlu0 %v3487_v3, %s4541_s26 }
 0x97f   : > { %3523 = vrot.lane.b32.xlu1 %v3488_v55, %s4541_s26 }
 0x99a   : > { %v3506_v47 = vpop.permute.xlu1 %3505 }
 0x99b   : > { %v3502_v22 = vpop.permute.xlu0 %3501 }
 0x99e   : > { %v3508_v4 = vpop.permute.xlu1 %3507 }
 0x9a2   : > { %v3504_v45 = vpop.permute.xlu1 %3503 }
 0x9a4   : > { %v3514_v17 = vpop.permute.xlu0 %3513 }
 0x9a6   : > { %v3516_v15 = vpop.permute.xlu1 %3515 }
 0x9a8   : > { %v3510_v54 = vpop.permute.xlu0 %3509 }
 0x9aa   : > { %v3512_v39 = vpop.permute.xlu1 %3511 }
 0x9ae   : > { %v4208_v35 = vpop.f32.mrb[32].mxu1 }
 0x9af   : > { %v3205_v19 = vadd.f32 %v4208_v35, %v3951_v31  ;;  %v3196_v6 = vpop.f32.mrb[33].mxu1 }
 0x9b0   : > { %v3197_v49 = vadd.f32 %v3951_v31, %v3196_v6  ;;  %v4209_v37 = vpop.f32.mrb[34].mxu1 }
 0x9b1   : > { %v3540_v32 = vsel %vm3537_vm15, %v3205_v19, %v3506_v47  ;;  %v3208_v7 = vadd.f32 %v4209_v37, %v3951_v31  ;;  %v3199_v13 = vpop.f32.mrb[35].mxu1 }
 0x9b2   : > { %3553 = vst.msk [vmem:[%s5714_s11 + $0x10] sm:$0xff] %vm3550_vm0, %v3540_v32  ;;  %v3538_v8 = vsel %vm3537_vm15, %v3197_v49, %v3502_v22  ;;  %v3200_v28 = vadd.f32 %v3951_v31, %v3199_v13 }
 0x9b3   : > { %3551 = vst.msk [vmem:[%s5714_s11] sm:$0xff] %vm3550_vm0, %v3538_v8  ;;  %v3541_v5 = vsel %vm3537_vm15, %v3208_v7, %v3508_v4 }
 0x9b4   : > { %3554 = vst.msk [vmem:[%s5714_s11 + $0x18] sm:$0xff] %vm3550_vm0, %v3541_v5  ;;  %v3539_v62 = vsel %vm3537_vm15, %v3200_v28, %v3504_v45 }
 0x9b5   : > { %3552 = vst.msk [vmem:[%s5714_s11 + $0x8] sm:$0xff] %vm3550_vm0, %v3539_v62 }
 0x9b6   : > { %v4212_v43 = vpop.f32.mrb[36].mxu1 }
 0x9b7   : > { %v3221_v25 = vadd.f32 %v4212_v43, %v3951_v31  ;;  %v3212_v10 = vpop.f32.mrb[37].mxu1 }
 0x9b8   : > { %v3213_v11 = vadd.f32 %v3951_v31, %v3212_v10  ;;  %v4213_v21 = vpop.f32.mrb[38].mxu1 }
 0x9b9   : > { %v3544_v40 = vsel %vm3537_vm15, %v3221_v25, %v3514_v17  ;;  %v3224_v18 = vadd.f32 %v4213_v21, %v3951_v31  ;;  %v3215_v36 = vpop.f32.mrb[39].mxu1  ;;  %v3630_v12 = vld [vmem:[%s5714_s11 + $0x10] sm:$0xff] (%p4726_p5) }
 0x9ba   : > { %3557 = vst.msk [vmem:[%s5714_s11 + $0x30] sm:$0xff] %vm3550_vm0, %v3544_v40  ;;  %v3542_v27 = vsel %vm3537_vm15, %v3213_v11, %v3510_v54  ;;  %v3216_v46 = vadd.f32 %v3951_v31, %v3215_v36  ;;  %v3626_v52 = vld [vmem:[%s5714_s11] sm:$0xff] (%p4726_p5)  ;;  %3631 = vst [vmem:[%s3576_s7 + $0x30] sm:$0xff] (%p4726_p5), %v3630_v12 }
 0x9bb   : > { %3555 = vst.msk [vmem:[%s5714_s11 + $0x20] sm:$0xff] %vm3550_vm0, %v3542_v27  ;;  %v3545_v24 = vsel %vm3537_vm15, %v3224_v18, %v3516_v15  ;;  %v3632_v50 = vld [vmem:[%s5714_s11 + $0x18] sm:$0xff] (%p4726_p5)  ;;  %3627 = vst [vmem:[%s3576_s7] sm:$0xff] (%p4726_p5), %v3626_v52 }
 0x9bc   : > { %3558 = vst.msk [vmem:[%s5714_s11 + $0x38] sm:$0xff] %vm3550_vm0, %v3545_v24  ;;  %v3543_v26 = vsel %vm3537_vm15, %v3216_v46, %v3512_v39  ;;  %v3628_v20 = vld [vmem:[%s5714_s11 + $0x8] sm:$0xff] (%p4726_p5)  ;;  %3633 = vst [vmem:[%s3576_s7 + $0x38] sm:$0xff] (%p4726_p5), %v3632_v50 }
 0x9bd   : > { %3556 = vst.msk [vmem:[%s5714_s11 + $0x28] sm:$0xff] %vm3550_vm0, %v3543_v26  ;;  %3629 = vst [vmem:[%s3576_s7 + $0x8] sm:$0xff] (%p4726_p5), %v3628_v20 }
 0x9be   : > { %v4216_v30 = vpop.f32.mrb[40].mxu1 }
 0x9bf   : > { %v3228_v42 = vpop.f32.mrb[41].mxu1  ;;  %v3237_v29 = vadd.f32 %v4216_v30, %v3951_v31 }
 0x9c0   : > { %v4217_v38 = vpop.f32.mrb[42].mxu1  ;;  %v3229_v61 = vadd.f32 %v3951_v31, %v3228_v42 }
 0x9c1   : > { %v3240_v34 = vadd.f32 %v4217_v38, %v3951_v31  ;;  %v3231_v57 = vpop.f32.mrb[43].mxu1  ;;  %v3638_v0 = vld [vmem:[%s5714_s11 + $0x30] sm:$0xff] (%p4726_p5) }
 0x9c2   : > { %v3232_v59 = vadd.f32 %v3951_v31, %v3231_v57  ;;  %v3634_v58 = vld [vmem:[%s5714_s11 + $0x20] sm:$0xff] (%p4726_p5)  ;;  %3639 = vst [vmem:[%s3576_s7 + $0x90] sm:$0xff] (%p4726_p5), %v3638_v0 }
 0x9c3   : > { %3635 = vst [vmem:[%s3576_s7 + $0x60] sm:$0xff] (%p4726_p5), %v3634_v58  ;;  %v3640_v56 = vld [vmem:[%s5714_s11 + $0x38] sm:$0xff] (%p4726_p5) }
 0x9c4   : > { %v3636_v60 = vld [vmem:[%s5714_s11 + $0x28] sm:$0xff] (%p4726_p5)  ;;  %3641 = vst [vmem:[%s3576_s7 + $0x98] sm:$0xff] (%p4726_p5), %v3640_v56 }
 0x9c5   : > { %3637 = vst [vmem:[%s3576_s7 + $0x68] sm:$0xff] (%p4726_p5), %v3636_v60 }
 0x9eb   : > { %v3518_v16 = vpop.permute.xlu0 %3517 }
 0x9ec   : > { %v3546_v63 = vsel %vm3537_vm15, %v3229_v61, %v3518_v16 }
 0x9ed   : > { %3559 = vst.msk [vmem:[%s5714_s11 + $0x40] sm:$0xff] %vm3550_vm0, %v3546_v63  ;;  %v3520_v53 = vpop.permute.xlu1 %3519  ;;  %3573 = sbr.rel (!%p4726_p5) target bundleno = 2556 (0x9fc), region = 177 }
 0x9ee   : > { %v3547_v33 = vsel %vm3537_vm15, %v3232_v59, %v3520_v53 }
 0x9ef   : > { %3560 = vst.msk [vmem:[%s5714_s11 + $0x48] sm:$0xff] %vm3550_vm0, %v3547_v33  ;;  %v3522_v41 = vpop.permute.xlu0 %3521 }
 0x9f0   : > { %v3548_v1 = vsel %vm3537_vm15, %v3237_v29, %v3522_v41 }
 0x9f1   : > { %3561 = vst.msk [vmem:[%s5714_s11 + $0x50] sm:$0xff] %vm3550_vm0, %v3548_v1  ;;  %v3524_v23 = vpop.permute.xlu1 %3523 }
 0x9f2   : > { %v3549_v44 = vsel %vm3537_vm15, %v3240_v34, %v3524_v23 }
 0x9f3   : > { %3562 = vst.msk [vmem:[%s5714_s11 + $0x58] sm:$0xff] %vm3550_vm0, %v3549_v44 }
 0x9f4   : > { %v3642_v51 = vld [vmem:[%s5714_s11 + $0x40] sm:$0xff] }
 0x9f5   : > { %3643 = vst [vmem:[%s3576_s7 + $0xc0] sm:$0xff] %v3642_v51 }
 0x9f6   : > { %v3644_v2 = vld [vmem:[%s5714_s11 + $0x48] sm:$0xff] }
 0x9f7   : > { %3645 = vst [vmem:[%s3576_s7 + $0xc8] sm:$0xff] %v3644_v2 }
 0x9f8   : > { %v3646_v48 = vld [vmem:[%s5714_s11 + $0x50] sm:$0xff] }
 0x9f9   : > { %3647 = vst [vmem:[%s3576_s7 + $0xf0] sm:$0xff] %v3646_v48 }
 0x9fa   : > { %v3648_v9 = vld [vmem:[%s5714_s11 + $0x58] sm:$0xff] }
 0x9fb   : > { %3649 = vst [vmem:[%s3576_s7 + $0xf8] sm:$0xff] %v3648_v9 }
 0x9fc PF: > { %3655 = sbr.rel (!%p4726_p5) target bundleno = 2564 (0xa04), region = 215  ;;  %s3993_s15 = sshll.u32 (%p4726_p5), %s4711_s0, 4  ;;  %v3708_v14 = vld [vmem:[%s5305_s22] sm:$0xff] (%p4726_p5)  ;;  %v3710_v3 = vld [vmem:[%s5305_s22 + $0x8] sm:$0xff] (%p4726_p5)  ;;  %v3712_v55 = vld [vmem:[%s5305_s22 + $0x10] sm:$0xff] (%p4726_p5) }
 0x9fd   : > { %s3658_s26 = scalar_lea.vmem (%p4726_p5), %s4693_s24, %s3993_s15  ;;  %v3714_v47 = vld [vmem:[%s5305_s22 + $0x18] sm:$0xff] (%p4726_p5)  ;;  %v3716_v4 = vld [vmem:[%s5305_s22 + $0x20] sm:$0xff] (%p4726_p5)  ;;  %v3718_v31 = vld [vmem:[%s5305_s22 + $0x28] sm:$0xff] (%p4726_p5) }
 0x9fe   : > { %3709 = vst [vmem:[%s3658_s26] sm:$0xff] (%p4726_p5), %v3708_v14  ;;  %3711 = vst [vmem:[%s3658_s26 + $0x8] sm:$0xff] (%p4726_p5), %v3710_v3  ;;  %v3720_v22 = vld [vmem:[%s5305_s22 + $0x30] sm:$0xff] (%p4726_p5)  ;;  %v3722_v35 = vld [vmem:[%s5305_s22 + $0x38] sm:$0xff] (%p4726_p5) }
 0x9ff   : > { %3713 = vst [vmem:[%s3658_s26 + $0x30] sm:$0xff] (%p4726_p5), %v3712_v55  ;;  %3715 = vst [vmem:[%s3658_s26 + $0x38] sm:$0xff] (%p4726_p5), %v3714_v47  ;;  %v3724_v45 = vld [vmem:[%s5305_s22 + $0x40] sm:$0xff] (%p4726_p5)  ;;  %v3726_v19 = vld [vmem:[%s5305_s22 + $0x48] sm:$0xff] (%p4726_p5) }
 0xa00   : > { %3717 = vst [vmem:[%s3658_s26 + $0x60] sm:$0xff] (%p4726_p5), %v3716_v4  ;;  %3719 = vst [vmem:[%s3658_s26 + $0x68] sm:$0xff] (%p4726_p5), %v3718_v31  ;;  %v3728_v6 = vld [vmem:[%s5305_s22 + $0x50] sm:$0xff] (%p4726_p5)  ;;  %v3730_v49 = vld [vmem:[%s5305_s22 + $0x58] sm:$0xff] (%p4726_p5) }
 0xa01   : > { %3721 = vst [vmem:[%s3658_s26 + $0x90] sm:$0xff] (%p4726_p5), %v3720_v22  ;;  %3723 = vst [vmem:[%s3658_s26 + $0x98] sm:$0xff] (%p4726_p5), %v3722_v35 }
 0xa02   : > { %3725 = vst [vmem:[%s3658_s26 + $0xc0] sm:$0xff] (%p4726_p5), %v3724_v45  ;;  %3727 = vst [vmem:[%s3658_s26 + $0xc8] sm:$0xff] (%p4726_p5), %v3726_v19 }
 0xa03   : > { %3729 = vst [vmem:[%s3658_s26 + $0xf0] sm:$0xff] %v3728_v6  ;;  %3731 = vst [vmem:[%s3658_s26 + $0xf8] sm:$0xff] %v3730_v49 }
 0xa04 PF: > { %p69_p11 = scmp.ge.s32.totalorder %s4714_s29, 5   ;;  %s5821_s7 = smov %s4503_s10 }
 0xa05   : > { %s5822_s10 = smov %s4724_s18  ;;  %s5823_s11 = smov %s4714_s29 }
 0xa06   :  { %71 = sbr.rel (!%p69_p11) target bundleno = 49 (0x31), region = 328 }

</bundles_post_ra>
